<compile_context>
chip_gen: v7x
topology: tpu7x:2x2x1
jax: 0.10.0
libtpu: 0.0.40
codegen_flags: <defaults>
</compile_context>

<pallas_src>
import functools

import jax
import jax.numpy as jnp
import numpy as np
from jax.experimental import pallas as pl
from jax.experimental.pallas import tpu as pltpu


def vcycle_kernel(x_ref, p_ref,
                  f2c_w1, f2c_b1, f2c_w2, f2c_b2,
                  c2f_w1, c2f_b1, c2f_w2, c2f_b2,
                  fw1, fb1, fw2, fb2,
                  out_ref, *, F, L):
    # x_ref : [tn, F*8*L]   native PyTorch layout, flattened (batch on sublanes)
    # p_ref : [8+F*L, F*8*L] constant reduction matrix
    # One MXU pass turns the raw tile into lane-dense reduced quantities
    # (batch moves onto the 128-lane axis here; no explicit transpose needed).
    ms = jax.lax.dot_general(
        p_ref[...], x_ref[...],
        dimension_numbers=(((1,), (1,)), ((), ())),   # 'kd,nd->kn'
        preferred_element_type=jnp.float32)           # [8 + F*L, tn]

    # Running total of sum_{f,l} hf0[l]  +  every 8-wide cascade update.
    u = ms[0:8, :]                                    # [8, tn]

    def two_layer(agg, w1, b1, w2, b2):
        # agg [1,tn]; w1,b1 [FD,1]; w2 [8,FD]; b2 [8,1]  ->  update [8,tn]
        h = jnp.maximum(w1 * agg + b1, 0.0)                          # [FD, tn] (VPU)
        return jnp.dot(w2, h, preferred_element_type=jnp.float32) + b2

    # F and L are small static ints -> fully unrolled; per-feature cascades are
    # independent, so the unrolled small matmuls have no cross-f dependencies.
    for f in range(F):
        base = 8 + f * L
        # evolving corner-mean of each level for this feature
        am = [ms[base + l:base + l + 1, :] for l in range(L)]        # each [1, tn]

        # fine -> coarse sweep (cascading updates)
        for i in range(L - 1, 0, -1):
            upd = two_layer(am[i], f2c_w1[i - 1], f2c_b1[i - 1],
                            f2c_w2[i - 1], f2c_b2[i - 1])            # [8, tn]
            u = u + upd
            am[i - 1] = am[i - 1] + jnp.mean(upd, axis=0, keepdims=True)

        # coarse -> fine sweep (cascading updates)
        for i in range(L - 1):
            upd = two_layer(am[i], c2f_w1[i], c2f_b1[i],
                            c2f_w2[i], c2f_b2[i])                    # [8, tn]
            u = u + upd
            if i + 1 < L - 1:            # am[L-1] is never read again
                am[i + 1] = am[i + 1] + jnp.mean(upd, axis=0, keepdims=True)

    # final MLP, all lane-dense: [8,tn] -> [FD,tn] -> [1,tn]
    h = jnp.maximum(
        jnp.dot(fw1[...], u, preferred_element_type=jnp.float32) + fb1[...], 0.0)
    # width-1 projection as VPU mul + sublane reduce (avoids an M=1 MXU matmul)
    out_ref[...] = jnp.sum(h * fw2[...], axis=0, keepdims=True) + fb2[...]


def vcycle_aggregator_pallas(octree, params, *, tn=None):
    """octree: [N, F, 8, L] float32, native PyTorch layout. Returns [N] float32."""
    N, F_, C, L = octree.shape
    assert C == 8, "Input octree_feats must have 8 corner features per voxel."
    D = F_ * 8 * L

    if tn is None:
        # Large batch tile (amortize the ~0.35us/step grid overhead) but keep
        # >=4 grid steps so the parallel axis can shard over v7x's two TCs.
        tn = max(128, min(2048, (N // 4) // 128 * 128))
    num_tiles = pl.cdiv(N, tn)
    n_pad = num_tiles * tn

    # --- constant reduction matrix (folds the /8 of the corner mean) --------
    p_np = np.zeros((8 + F_ * L, D), np.float32)
    for f in range(F_):
        for l in range(L):
            for c in range(8):
                d = f * 8 * L + c * L + l
                p_np[c, d] = 1.0                  # per-corner sum over (f, l)
                p_np[8 + f * L + l, d] = 0.125    # corner mean of (f, l)
    p_mat = jnp.asarray(p_np)

    # --- parameter repacking (tiny; runs fused under jit) -------------------
    # torch Linear(a, b).weight is [b, a]; keep that orientation and apply the
    # MLPs in left-multiply form on lane-dense [*, tn] activations.
    def stack_level(plist):
        w1 = jnp.stack([p[0] for p in plist])             # [L-1, FD, 1]
        b1 = jnp.stack([p[1][:, None] for p in plist])    # [L-1, FD, 1]
        w2 = jnp.stack([p[2] for p in plist])             # [L-1, 8, FD]
        b2 = jnp.stack([p[3][:, None] for p in plist])    # [L-1, 8, 1]
        return w1, b1, w2, b2

    f2c = stack_level(params["f2c"])
    c2f = stack_level(params["c2f"])
    fw1_t, fb1_t, fw2_t, fb2_t = params["final"]
    fw1 = fw1_t                        # [FD, 8]
    fb1 = fb1_t[:, None]               # [FD, 1]
    fw2 = fw2_t.reshape(-1, 1)         # [FD, 1]
    fb2 = fb2_t.reshape(1, 1)          # [1, 1]

    # --- input: native layout; reshape is free (no HBM transpose pass) ------
    x2 = octree.reshape(N, D).astype(jnp.float32)
    if n_pad != N:
        # TODO(synk): choose tn dividing N (or pre-pad upstream) to avoid this copy.
        x2 = jnp.pad(x2, ((0, n_pad - N), (0, 0)))

    full = lambda a: pl.BlockSpec(a.shape, lambda i: (0,) * a.ndim)
    kernel = functools.partial(vcycle_kernel, F=F_, L=L)

    out = pl.pallas_call(
        kernel,
        out_shape=jax.ShapeDtypeStruct((1, n_pad), jnp.float32),
        grid=(num_tiles,),
        in_specs=[
            pl.BlockSpec((tn, D), lambda i: (i, 0)),
            full(p_mat),
            full(f2c[0]), full(f2c[1]), full(f2c[2]), full(f2c[3]),
            full(c2f[0]), full(c2f[1]), full(c2f[2]), full(c2f[3]),
            full(fw1), full(fb1), full(fw2), full(fb2),
        ],
        out_specs=pl.BlockSpec((1, tn), lambda i: (0, i)),   # lane-dense output
        compiler_params=pltpu.CompilerParams(
            dimension_semantics=("parallel",)),
    )(x2, p_mat, *f2c, *c2f, fw1, fb1, fw2, fb2)

    return out[0, :N]


# ------------------------- pure-JAX reference -------------------------------
def vcycle_reference(octree, params):
    N, F_, C, L = octree.shape
    hf = [octree[..., i] for i in range(L)]                  # each [N, F, 8]

    def mlp(a, p):
        w1, b1, w2, b2 = p
        h = jax.nn.relu(a @ w1.T + b1)
        return h @ w2.T + b2

    for i in range(L - 1, 0, -1):
        agg = jnp.mean(hf[i], axis=2, keepdims=True)
        hf[i - 1] = hf[i - 1] + mlp(agg, params["f2c"][i - 1])
    for i in range(L - 1):
        agg = jnp.mean(hf[i], axis=2, keepdims=True)
        hf[i + 1] = hf[i + 1] + mlp(agg, params["c2f"][i])

    g = hf[0]
    for i in range(1, L):
        g = g + hf[i]
    g = jnp.sum(g, axis=1)                                   # [N, 8]

    fw1, fb1, fw2, fb2 = params["final"]
    h = jax.nn.relu(g @ fw1.T + fb1)
    sdf = h @ fw2.T + fb2                                    # [N, 1]
    return sdf[:, 0]


# ------------------------- parameter init -----------------------------------
def _linear_params(key, in_dim, out_dim):
    k1, k2 = jax.random.split(key)
    bound = 1.0 / np.sqrt(in_dim)
    w = jax.random.uniform(k1, (out_dim, in_dim), jnp.float32, -bound, bound)
    b = jax.random.uniform(k2, (out_dim,), jnp.float32, -bound, bound)
    return w, b


def init_params(key, L, feature_dim):
    keys = jax.random.split(key, 4 * (L - 1) + 2 + 1)
    kiter = iter(keys)
    f2c, c2f = [], []
    for _ in range(L - 1):
        w1, b1 = _linear_params(next(kiter), 1, feature_dim)
        w2, b2 = _linear_params(next(kiter), feature_dim, 8)
        f2c.append((w1, b1, w2, b2))
    for _ in range(L - 1):
        w1, b1 = _linear_params(next(kiter), 1, feature_dim)
        w2, b2 = _linear_params(next(kiter), feature_dim, 8)
        c2f.append((w1, b1, w2, b2))
    fw1, fb1 = _linear_params(next(kiter), 8, feature_dim)
    fw2, fb2 = _linear_params(next(kiter), feature_dim, 1)
    # layer_downsample params exist in the torch module but are unused in forward.
    return {"f2c": f2c, "c2f": c2f, "final": (fw1, fb1, fw2, fb2)}


if __name__ == "__main__":
    N, F_, C, L, FD = 2048, 4, 8, 3, 32
    key = jax.random.PRNGKey(0)
    k_data, k_param = jax.random.split(key)

    octree_feats = jax.random.normal(k_data, (N, F_, C, L), jnp.float32)
    params = init_params(k_param, L, FD)

    fwd = jax.jit(vcycle_aggregator_pallas)   # prepack/reshape run fused, once
    out = jax.block_until_ready(fwd(octree_feats, params))

    ref = vcycle_reference(octree_feats, params)
    np.testing.assert_allclose(np.asarray(out), np.asarray(ref),
                               rtol=1e-3, atol=1e-3)

    print("KERNEL_OK")
</pallas_src>

<mosaic_0001>
module attributes {stable_mosaic.version = 11 : i64} {
  func.func @vcycle_kernel(%arg0: i32, %arg1: memref<512x96xf32, #tpu.memory_space<vmem>>, %arg2: memref<20x96xf32, #tpu.memory_space<vmem>>, %arg3: memref<2x32x1xf32, #tpu.memory_space<vmem>>, %arg4: memref<2x32x1xf32, #tpu.memory_space<vmem>>, %arg5: memref<2x8x32xf32, #tpu.memory_space<vmem>>, %arg6: memref<2x8x1xf32, #tpu.memory_space<vmem>>, %arg7: memref<2x32x1xf32, #tpu.memory_space<vmem>>, %arg8: memref<2x32x1xf32, #tpu.memory_space<vmem>>, %arg9: memref<2x8x32xf32, #tpu.memory_space<vmem>>, %arg10: memref<2x8x1xf32, #tpu.memory_space<vmem>>, %arg11: memref<32x8xf32, #tpu.memory_space<vmem>>, %arg12: memref<32x1xf32, #tpu.memory_space<vmem>>, %arg13: memref<32x1xf32, #tpu.memory_space<vmem>>, %arg14: memref<1x1xf32, #tpu.memory_space<vmem>>, %arg15: memref<1x512xf32, #tpu.memory_space<vmem>>) attributes {dimension_semantics = [#tpu.dimension_semantics<parallel>], iteration_bounds = array<i64: 4>, scalar_prefetch = 0 : i64, scratch_operands = 0 : i64, tpu.core_type = #tpu.core_type<tc>, window_params = [{transform_indices = @transform_0, window_bounds = array<i64: 512, 96>}, {pipeline_mode = #tpu.pipeline_mode<synchronous>, transform_indices = @transform_1, window_bounds = array<i64: 20, 96>}, {pipeline_mode = #tpu.pipeline_mode<synchronous>, transform_indices = @transform_2, window_bounds = array<i64: 2, 32, 1>}, {pipeline_mode = #tpu.pipeline_mode<synchronous>, transform_indices = @transform_3, window_bounds = array<i64: 2, 32, 1>}, {pipeline_mode = #tpu.pipeline_mode<synchronous>, transform_indices = @transform_4, window_bounds = array<i64: 2, 8, 32>}, {pipeline_mode = #tpu.pipeline_mode<synchronous>, transform_indices = @transform_5, window_bounds = array<i64: 2, 8, 1>}, {pipeline_mode = #tpu.pipeline_mode<synchronous>, transform_indices = @transform_6, window_bounds = array<i64: 2, 32, 1>}, {pipeline_mode = #tpu.pipeline_mode<synchronous>, transform_indices = @transform_7, window_bounds = array<i64: 2, 32, 1>}, {pipeline_mode = #tpu.pipeline_mode<synchronous>, transform_indices = @transform_8, window_bounds = array<i64: 2, 8, 32>}, {pipeline_mode = #tpu.pipeline_mode<synchronous>, transform_indices = @transform_9, window_bounds = array<i64: 2, 8, 1>}, {pipeline_mode = #tpu.pipeline_mode<synchronous>, transform_indices = @transform_10, window_bounds = array<i64: 32, 8>}, {pipeline_mode = #tpu.pipeline_mode<synchronous>, transform_indices = @transform_11, window_bounds = array<i64: 32, 1>}, {pipeline_mode = #tpu.pipeline_mode<synchronous>, transform_indices = @transform_12, window_bounds = array<i64: 32, 1>}, {pipeline_mode = #tpu.pipeline_mode<synchronous>, transform_indices = @transform_13, window_bounds = array<i64: 1, 1>}, {transform_indices = @transform_14, window_bounds = array<i64: 1, 512>}]} {
    %c0 = arith.constant 0 : index
    %c0_0 = arith.constant 0 : index
    %0 = vector.load %arg2[%c0, %c0_0] : memref<20x96xf32, #tpu.memory_space<vmem>>, vector<20x96xf32>
    %c0_1 = arith.constant 0 : index
    %c0_2 = arith.constant 0 : index
    %1 = vector.load %arg1[%c0_1, %c0_2] : memref<512x96xf32, #tpu.memory_space<vmem>>, vector<512x96xf32>
    %cst = arith.constant dense<0.000000e+00> : vector<20x512xf32>
    %2 = tpu.matmul %0, %1, %cst {dimension_numbers = #tpu.dot_dimension_numbers<[1], [1], [0], [0], [0, 0, 1, 0], [], []>} : vector<20x96xf32>, vector<512x96xf32>, vector<20x512xf32> -> vector<20x512xf32>
    %3 = vector.extract_strided_slice %2 {offsets = [0, 0], sizes = [8, 512], strides = [1, 1]} : vector<20x512xf32> to vector<8x512xf32>
    %4 = vector.extract_strided_slice %2 {offsets = [8, 0], sizes = [1, 512], strides = [1, 1]} : vector<20x512xf32> to vector<1x512xf32>
    %5 = vector.extract_strided_slice %2 {offsets = [9, 0], sizes = [1, 512], strides = [1, 1]} : vector<20x512xf32> to vector<1x512xf32>
    %6 = vector.extract_strided_slice %2 {offsets = [10, 0], sizes = [1, 512], strides = [1, 1]} : vector<20x512xf32> to vector<1x512xf32>
    %c1 = arith.constant 1 : index
    %c0_3 = arith.constant 0 : index
    %c0_4 = arith.constant 0 : index
    %7 = vector.load %arg3[%c1, %c0_3, %c0_4] : memref<2x32x1xf32, #tpu.memory_space<vmem>>, vector<1x32x1xf32>
    %8 = vector.shape_cast %7 : vector<1x32x1xf32> to vector<32x1xf32>
    %c1_5 = arith.constant 1 : index
    %c0_6 = arith.constant 0 : index
    %c0_7 = arith.constant 0 : index
    %9 = vector.load %arg4[%c1_5, %c0_6, %c0_7] : memref<2x32x1xf32, #tpu.memory_space<vmem>>, vector<1x32x1xf32>
    %10 = vector.shape_cast %9 : vector<1x32x1xf32> to vector<32x1xf32>
    %c1_8 = arith.constant 1 : index
    %c0_9 = arith.constant 0 : index
    %c0_10 = arith.constant 0 : index
    %11 = vector.load %arg5[%c1_8, %c0_9, %c0_10] : memref<2x8x32xf32, #tpu.memory_space<vmem>>, vector<1x8x32xf32>
    %12 = vector.shape_cast %11 : vector<1x8x32xf32> to vector<8x32xf32>
    %c1_11 = arith.constant 1 : index
    %c0_12 = arith.constant 0 : index
    %c0_13 = arith.constant 0 : index
    %13 = vector.load %arg6[%c1_11, %c0_12, %c0_13] : memref<2x8x1xf32, #tpu.memory_space<vmem>>, vector<1x8x1xf32>
    %14 = vector.shape_cast %13 : vector<1x8x1xf32> to vector<8x1xf32>
    %15 = vector.broadcast %8 : vector<32x1xf32> to vector<32x512xf32>
    %16 = vector.broadcast %6 : vector<1x512xf32> to vector<32x512xf32>
    %17 = arith.mulf %15, %16 : vector<32x512xf32>
    %18 = vector.broadcast %10 : vector<32x1xf32> to vector<32x512xf32>
    %19 = arith.addf %17, %18 : vector<32x512xf32>
    %cst_14 = arith.constant 0.000000e+00 : f32
    %20 = vector.broadcast %cst_14 : f32 to vector<32x512xf32>
    %21 = arith.maximumf %19, %20 : vector<32x512xf32>
    %cst_15 = arith.constant dense<0.000000e+00> : vector<8x512xf32>
    %22 = tpu.matmul %12, %21, %cst_15 {dimension_numbers = #tpu.dot_dimension_numbers<[1], [0], [0], [1], [0, 0, 1, 1], [], []>} : vector<8x32xf32>, vector<32x512xf32>, vector<8x512xf32> -> vector<8x512xf32>
    %23 = vector.broadcast %14 : vector<8x1xf32> to vector<8x512xf32>
    %24 = arith.addf %22, %23 : vector<8x512xf32>
    %25 = arith.addf %3, %24 : vector<8x512xf32>
    %cst_16 = arith.constant dense<0.000000e+00> : vector<512xf32>
    %26 = vector.multi_reduction <add>, %24, %cst_16 [0] : vector<8x512xf32> to vector<512xf32>
    %27 = vector.shape_cast %26 : vector<512xf32> to vector<1x512xf32>
    %cst_17 = arith.constant 8.000000e+00 : f32
    %28 = vector.broadcast %cst_17 : f32 to vector<1x512xf32>
    %29 = arith.divf %27, %28 : vector<1x512xf32>
    %30 = arith.addf %5, %29 : vector<1x512xf32>
    %c0_18 = arith.constant 0 : index
    %c0_19 = arith.constant 0 : index
    %c0_20 = arith.constant 0 : index
    %31 = vector.load %arg3[%c0_18, %c0_19, %c0_20] : memref<2x32x1xf32, #tpu.memory_space<vmem>>, vector<1x32x1xf32>
    %32 = vector.shape_cast %31 : vector<1x32x1xf32> to vector<32x1xf32>
    %c0_21 = arith.constant 0 : index
    %c0_22 = arith.constant 0 : index
    %c0_23 = arith.constant 0 : index
    %33 = vector.load %arg4[%c0_21, %c0_22, %c0_23] : memref<2x32x1xf32, #tpu.memory_space<vmem>>, vector<1x32x1xf32>
    %34 = vector.shape_cast %33 : vector<1x32x1xf32> to vector<32x1xf32>
    %c0_24 = arith.constant 0 : index
    %c0_25 = arith.constant 0 : index
    %c0_26 = arith.constant 0 : index
    %35 = vector.load %arg5[%c0_24, %c0_25, %c0_26] : memref<2x8x32xf32, #tpu.memory_space<vmem>>, vector<1x8x32xf32>
    %36 = vector.shape_cast %35 : vector<1x8x32xf32> to vector<8x32xf32>
    %c0_27 = arith.constant 0 : index
    %c0_28 = arith.constant 0 : index
    %c0_29 = arith.constant 0 : index
    %37 = vector.load %arg6[%c0_27, %c0_28, %c0_29] : memref<2x8x1xf32, #tpu.memory_space<vmem>>, vector<1x8x1xf32>
    %38 = vector.shape_cast %37 : vector<1x8x1xf32> to vector<8x1xf32>
    %39 = vector.broadcast %32 : vector<32x1xf32> to vector<32x512xf32>
    %40 = vector.broadcast %30 : vector<1x512xf32> to vector<32x512xf32>
    %41 = arith.mulf %39, %40 : vector<32x512xf32>
    %42 = vector.broadcast %34 : vector<32x1xf32> to vector<32x512xf32>
    %43 = arith.addf %41, %42 : vector<32x512xf32>
    %cst_30 = arith.constant 0.000000e+00 : f32
    %44 = vector.broadcast %cst_30 : f32 to vector<32x512xf32>
    %45 = arith.maximumf %43, %44 : vector<32x512xf32>
    %cst_31 = arith.constant dense<0.000000e+00> : vector<8x512xf32>
    %46 = tpu.matmul %36, %45, %cst_31 {dimension_numbers = #tpu.dot_dimension_numbers<[1], [0], [0], [1], [0, 0, 1, 1], [], []>} : vector<8x32xf32>, vector<32x512xf32>, vector<8x512xf32> -> vector<8x512xf32>
    %47 = vector.broadcast %38 : vector<8x1xf32> to vector<8x512xf32>
    %48 = arith.addf %46, %47 : vector<8x512xf32>
    %49 = arith.addf %25, %48 : vector<8x512xf32>
    %cst_32 = arith.constant dense<0.000000e+00> : vector<512xf32>
    %50 = vector.multi_reduction <add>, %48, %cst_32 [0] : vector<8x512xf32> to vector<512xf32>
    %51 = vector.shape_cast %50 : vector<512xf32> to vector<1x512xf32>
    %cst_33 = arith.constant 8.000000e+00 : f32
    %52 = vector.broadcast %cst_33 : f32 to vector<1x512xf32>
    %53 = arith.divf %51, %52 : vector<1x512xf32>
    %54 = arith.addf %4, %53 : vector<1x512xf32>
    %c0_34 = arith.constant 0 : index
    %c0_35 = arith.constant 0 : index
    %c0_36 = arith.constant 0 : index
    %55 = vector.load %arg7[%c0_34, %c0_35, %c0_36] : memref<2x32x1xf32, #tpu.memory_space<vmem>>, vector<1x32x1xf32>
    %56 = vector.shape_cast %55 : vector<1x32x1xf32> to vector<32x1xf32>
    %c0_37 = arith.constant 0 : index
    %c0_38 = arith.constant 0 : index
    %c0_39 = arith.constant 0 : index
    %57 = vector.load %arg8[%c0_37, %c0_38, %c0_39] : memref<2x32x1xf32, #tpu.memory_space<vmem>>, vector<1x32x1xf32>
    %58 = vector.shape_cast %57 : vector<1x32x1xf32> to vector<32x1xf32>
    %c0_40 = arith.constant 0 : index
    %c0_41 = arith.constant 0 : index
    %c0_42 = arith.constant 0 : index
    %59 = vector.load %arg9[%c0_40, %c0_41, %c0_42] : memref<2x8x32xf32, #tpu.memory_space<vmem>>, vector<1x8x32xf32>
    %60 = vector.shape_cast %59 : vector<1x8x32xf32> to vector<8x32xf32>
    %c0_43 = arith.constant 0 : index
    %c0_44 = arith.constant 0 : index
    %c0_45 = arith.constant 0 : index
    %61 = vector.load %arg10[%c0_43, %c0_44, %c0_45] : memref<2x8x1xf32, #tpu.memory_space<vmem>>, vector<1x8x1xf32>
    %62 = vector.shape_cast %61 : vector<1x8x1xf32> to vector<8x1xf32>
    %63 = vector.broadcast %56 : vector<32x1xf32> to vector<32x512xf32>
    %64 = vector.broadcast %54 : vector<1x512xf32> to vector<32x512xf32>
    %65 = arith.mulf %63, %64 : vector<32x512xf32>
    %66 = vector.broadcast %58 : vector<32x1xf32> to vector<32x512xf32>
    %67 = arith.addf %65, %66 : vector<32x512xf32>
    %cst_46 = arith.constant 0.000000e+00 : f32
    %68 = vector.broadcast %cst_46 : f32 to vector<32x512xf32>
    %69 = arith.maximumf %67, %68 : vector<32x512xf32>
    %cst_47 = arith.constant dense<0.000000e+00> : vector<8x512xf32>
    %70 = tpu.matmul %60, %69, %cst_47 {dimension_numbers = #tpu.dot_dimension_numbers<[1], [0], [0], [1], [0, 0, 1, 1], [], []>} : vector<8x32xf32>, vector<32x512xf32>, vector<8x512xf32> -> vector<8x512xf32>
    %71 = vector.broadcast %62 : vector<8x1xf32> to vector<8x512xf32>
    %72 = arith.addf %70, %71 : vector<8x512xf32>
    %73 = arith.addf %49, %72 : vector<8x512xf32>
    %cst_48 = arith.constant dense<0.000000e+00> : vector<512xf32>
    %74 = vector.multi_reduction <add>, %72, %cst_48 [0] : vector<8x512xf32> to vector<512xf32>
    %75 = vector.shape_cast %74 : vector<512xf32> to vector<1x512xf32>
    %cst_49 = arith.constant 8.000000e+00 : f32
    %76 = vector.broadcast %cst_49 : f32 to vector<1x512xf32>
    %77 = arith.divf %75, %76 : vector<1x512xf32>
    %78 = arith.addf %30, %77 : vector<1x512xf32>
    %c1_50 = arith.constant 1 : index
    %c0_51 = arith.constant 0 : index
    %c0_52 = arith.constant 0 : index
    %79 = vector.load %arg7[%c1_50, %c0_51, %c0_52] : memref<2x32x1xf32, #tpu.memory_space<vmem>>, vector<1x32x1xf32>
    %80 = vector.shape_cast %79 : vector<1x32x1xf32> to vector<32x1xf32>
    %c1_53 = arith.constant 1 : index
    %c0_54 = arith.constant 0 : index
    %c0_55 = arith.constant 0 : index
    %81 = vector.load %arg8[%c1_53, %c0_54, %c0_55] : memref<2x32x1xf32, #tpu.memory_space<vmem>>, vector<1x32x1xf32>
    %82 = vector.shape_cast %81 : vector<1x32x1xf32> to vector<32x1xf32>
    %c1_56 = arith.constant 1 : index
    %c0_57 = arith.constant 0 : index
    %c0_58 = arith.constant 0 : index
    %83 = vector.load %arg9[%c1_56, %c0_57, %c0_58] : memref<2x8x32xf32, #tpu.memory_space<vmem>>, vector<1x8x32xf32>
    %84 = vector.shape_cast %83 : vector<1x8x32xf32> to vector<8x32xf32>
    %c1_59 = arith.constant 1 : index
    %c0_60 = arith.constant 0 : index
    %c0_61 = arith.constant 0 : index
    %85 = vector.load %arg10[%c1_59, %c0_60, %c0_61] : memref<2x8x1xf32, #tpu.memory_space<vmem>>, vector<1x8x1xf32>
    %86 = vector.shape_cast %85 : vector<1x8x1xf32> to vector<8x1xf32>
    %87 = vector.broadcast %80 : vector<32x1xf32> to vector<32x512xf32>
    %88 = vector.broadcast %78 : vector<1x512xf32> to vector<32x512xf32>
    %89 = arith.mulf %87, %88 : vector<32x512xf32>
    %90 = vector.broadcast %82 : vector<32x1xf32> to vector<32x512xf32>
    %91 = arith.addf %89, %90 : vector<32x512xf32>
    %cst_62 = arith.constant 0.000000e+00 : f32
    %92 = vector.broadcast %cst_62 : f32 to vector<32x512xf32>
    %93 = arith.maximumf %91, %92 : vector<32x512xf32>
    %cst_63 = arith.constant dense<0.000000e+00> : vector<8x512xf32>
    %94 = tpu.matmul %84, %93, %cst_63 {dimension_numbers = #tpu.dot_dimension_numbers<[1], [0], [0], [1], [0, 0, 1, 1], [], []>} : vector<8x32xf32>, vector<32x512xf32>, vector<8x512xf32> -> vector<8x512xf32>
    %95 = vector.broadcast %86 : vector<8x1xf32> to vector<8x512xf32>
    %96 = arith.addf %94, %95 : vector<8x512xf32>
    %97 = arith.addf %73, %96 : vector<8x512xf32>
    %98 = vector.extract_strided_slice %2 {offsets = [11, 0], sizes = [1, 512], strides = [1, 1]} : vector<20x512xf32> to vector<1x512xf32>
    %99 = vector.extract_strided_slice %2 {offsets = [12, 0], sizes = [1, 512], strides = [1, 1]} : vector<20x512xf32> to vector<1x512xf32>
    %100 = vector.extract_strided_slice %2 {offsets = [13, 0], sizes = [1, 512], strides = [1, 1]} : vector<20x512xf32> to vector<1x512xf32>
    %c1_64 = arith.constant 1 : index
    %c0_65 = arith.constant 0 : index
    %c0_66 = arith.constant 0 : index
    %101 = vector.load %arg3[%c1_64, %c0_65, %c0_66] : memref<2x32x1xf32, #tpu.memory_space<vmem>>, vector<1x32x1xf32>
    %102 = vector.shape_cast %101 : vector<1x32x1xf32> to vector<32x1xf32>
    %c1_67 = arith.constant 1 : index
    %c0_68 = arith.constant 0 : index
    %c0_69 = arith.constant 0 : index
    %103 = vector.load %arg4[%c1_67, %c0_68, %c0_69] : memref<2x32x1xf32, #tpu.memory_space<vmem>>, vector<1x32x1xf32>
    %104 = vector.shape_cast %103 : vector<1x32x1xf32> to vector<32x1xf32>
    %c1_70 = arith.constant 1 : index
    %c0_71 = arith.constant 0 : index
    %c0_72 = arith.constant 0 : index
    %105 = vector.load %arg5[%c1_70, %c0_71, %c0_72] : memref<2x8x32xf32, #tpu.memory_space<vmem>>, vector<1x8x32xf32>
    %106 = vector.shape_cast %105 : vector<1x8x32xf32> to vector<8x32xf32>
    %c1_73 = arith.constant 1 : index
    %c0_74 = arith.constant 0 : index
    %c0_75 = arith.constant 0 : index
    %107 = vector.load %arg6[%c1_73, %c0_74, %c0_75] : memref<2x8x1xf32, #tpu.memory_space<vmem>>, vector<1x8x1xf32>
    %108 = vector.shape_cast %107 : vector<1x8x1xf32> to vector<8x1xf32>
    %109 = vector.broadcast %102 : vector<32x1xf32> to vector<32x512xf32>
    %110 = vector.broadcast %100 : vector<1x512xf32> to vector<32x512xf32>
    %111 = arith.mulf %109, %110 : vector<32x512xf32>
    %112 = vector.broadcast %104 : vector<32x1xf32> to vector<32x512xf32>
    %113 = arith.addf %111, %112 : vector<32x512xf32>
    %cst_76 = arith.constant 0.000000e+00 : f32
    %114 = vector.broadcast %cst_76 : f32 to vector<32x512xf32>
    %115 = arith.maximumf %113, %114 : vector<32x512xf32>
    %cst_77 = arith.constant dense<0.000000e+00> : vector<8x512xf32>
    %116 = tpu.matmul %106, %115, %cst_77 {dimension_numbers = #tpu.dot_dimension_numbers<[1], [0], [0], [1], [0, 0, 1, 1], [], []>} : vector<8x32xf32>, vector<32x512xf32>, vector<8x512xf32> -> vector<8x512xf32>
    %117 = vector.broadcast %108 : vector<8x1xf32> to vector<8x512xf32>
    %118 = arith.addf %116, %117 : vector<8x512xf32>
    %119 = arith.addf %97, %118 : vector<8x512xf32>
    %cst_78 = arith.constant dense<0.000000e+00> : vector<512xf32>
    %120 = vector.multi_reduction <add>, %118, %cst_78 [0] : vector<8x512xf32> to vector<512xf32>
    %121 = vector.shape_cast %120 : vector<512xf32> to vector<1x512xf32>
    %cst_79 = arith.constant 8.000000e+00 : f32
    %122 = vector.broadcast %cst_79 : f32 to vector<1x512xf32>
    %123 = arith.divf %121, %122 : vector<1x512xf32>
    %124 = arith.addf %99, %123 : vector<1x512xf32>
    %c0_80 = arith.constant 0 : index
    %c0_81 = arith.constant 0 : index
    %c0_82 = arith.constant 0 : index
    %125 = vector.load %arg3[%c0_80, %c0_81, %c0_82] : memref<2x32x1xf32, #tpu.memory_space<vmem>>, vector<1x32x1xf32>
    %126 = vector.shape_cast %125 : vector<1x32x1xf32> to vector<32x1xf32>
    %c0_83 = arith.constant 0 : index
    %c0_84 = arith.constant 0 : index
    %c0_85 = arith.constant 0 : index
    %127 = vector.load %arg4[%c0_83, %c0_84, %c0_85] : memref<2x32x1xf32, #tpu.memory_space<vmem>>, vector<1x32x1xf32>
    %128 = vector.shape_cast %127 : vector<1x32x1xf32> to vector<32x1xf32>
    %c0_86 = arith.constant 0 : index
    %c0_87 = arith.constant 0 : index
    %c0_88 = arith.constant 0 : index
    %129 = vector.load %arg5[%c0_86, %c0_87, %c0_88] : memref<2x8x32xf32, #tpu.memory_space<vmem>>, vector<1x8x32xf32>
    %130 = vector.shape_cast %129 : vector<1x8x32xf32> to vector<8x32xf32>
    %c0_89 = arith.constant 0 : index
    %c0_90 = arith.constant 0 : index
    %c0_91 = arith.constant 0 : index
    %131 = vector.load %arg6[%c0_89, %c0_90, %c0_91] : memref<2x8x1xf32, #tpu.memory_space<vmem>>, vector<1x8x1xf32>
    %132 = vector.shape_cast %131 : vector<1x8x1xf32> to vector<8x1xf32>
    %133 = vector.broadcast %126 : vector<32x1xf32> to vector<32x512xf32>
    %134 = vector.broadcast %124 : vector<1x512xf32> to vector<32x512xf32>
    %135 = arith.mulf %133, %134 : vector<32x512xf32>
    %136 = vector.broadcast %128 : vector<32x1xf32> to vector<32x512xf32>
    %137 = arith.addf %135, %136 : vector<32x512xf32>
    %cst_92 = arith.constant 0.000000e+00 : f32
    %138 = vector.broadcast %cst_92 : f32 to vector<32x512xf32>
    %139 = arith.maximumf %137, %138 : vector<32x512xf32>
    %cst_93 = arith.constant dense<0.000000e+00> : vector<8x512xf32>
    %140 = tpu.matmul %130, %139, %cst_93 {dimension_numbers = #tpu.dot_dimension_numbers<[1], [0], [0], [1], [0, 0, 1, 1], [], []>} : vector<8x32xf32>, vector<32x512xf32>, vector<8x512xf32> -> vector<8x512xf32>
    %141 = vector.broadcast %132 : vector<8x1xf32> to vector<8x512xf32>
    %142 = arith.addf %140, %141 : vector<8x512xf32>
    %143 = arith.addf %119, %142 : vector<8x512xf32>
    %cst_94 = arith.constant dense<0.000000e+00> : vector<512xf32>
    %144 = vector.multi_reduction <add>, %142, %cst_94 [0] : vector<8x512xf32> to vector<512xf32>
    %145 = vector.shape_cast %144 : vector<512xf32> to vector<1x512xf32>
    %cst_95 = arith.constant 8.000000e+00 : f32
    %146 = vector.broadcast %cst_95 : f32 to vector<1x512xf32>
    %147 = arith.divf %145, %146 : vector<1x512xf32>
    %148 = arith.addf %98, %147 : vector<1x512xf32>
    %c0_96 = arith.constant 0 : index
    %c0_97 = arith.constant 0 : index
    %c0_98 = arith.constant 0 : index
    %149 = vector.load %arg7[%c0_96, %c0_97, %c0_98] : memref<2x32x1xf32, #tpu.memory_space<vmem>>, vector<1x32x1xf32>
    %150 = vector.shape_cast %149 : vector<1x32x1xf32> to vector<32x1xf32>
    %c0_99 = arith.constant 0 : index
    %c0_100 = arith.constant 0 : index
    %c0_101 = arith.constant 0 : index
    %151 = vector.load %arg8[%c0_99, %c0_100, %c0_101] : memref<2x32x1xf32, #tpu.memory_space<vmem>>, vector<1x32x1xf32>
    %152 = vector.shape_cast %151 : vector<1x32x1xf32> to vector<32x1xf32>
    %c0_102 = arith.constant 0 : index
    %c0_103 = arith.constant 0 : index
    %c0_104 = arith.constant 0 : index
    %153 = vector.load %arg9[%c0_102, %c0_103, %c0_104] : memref<2x8x32xf32, #tpu.memory_space<vmem>>, vector<1x8x32xf32>
    %154 = vector.shape_cast %153 : vector<1x8x32xf32> to vector<8x32xf32>
    %c0_105 = arith.constant 0 : index
    %c0_106 = arith.constant 0 : index
    %c0_107 = arith.constant 0 : index
    %155 = vector.load %arg10[%c0_105, %c0_106, %c0_107] : memref<2x8x1xf32, #tpu.memory_space<vmem>>, vector<1x8x1xf32>
    %156 = vector.shape_cast %155 : vector<1x8x1xf32> to vector<8x1xf32>
    %157 = vector.broadcast %150 : vector<32x1xf32> to vector<32x512xf32>
    %158 = vector.broadcast %148 : vector<1x512xf32> to vector<32x512xf32>
    %159 = arith.mulf %157, %158 : vector<32x512xf32>
    %160 = vector.broadcast %152 : vector<32x1xf32> to vector<32x512xf32>
    %161 = arith.addf %159, %160 : vector<32x512xf32>
    %cst_108 = arith.constant 0.000000e+00 : f32
    %162 = vector.broadcast %cst_108 : f32 to vector<32x512xf32>
    %163 = arith.maximumf %161, %162 : vector<32x512xf32>
    %cst_109 = arith.constant dense<0.000000e+00> : vector<8x512xf32>
    %164 = tpu.matmul %154, %163, %cst_109 {dimension_numbers = #tpu.dot_dimension_numbers<[1], [0], [0], [1], [0, 0, 1, 1], [], []>} : vector<8x32xf32>, vector<32x512xf32>, vector<8x512xf32> -> vector<8x512xf32>
    %165 = vector.broadcast %156 : vector<8x1xf32> to vector<8x512xf32>
    %166 = arith.addf %164, %165 : vector<8x512xf32>
    %167 = arith.addf %143, %166 : vector<8x512xf32>
    %cst_110 = arith.constant dense<0.000000e+00> : vector<512xf32>
    %168 = vector.multi_reduction <add>, %166, %cst_110 [0] : vector<8x512xf32> to vector<512xf32>
    %169 = vector.shape_cast %168 : vector<512xf32> to vector<1x512xf32>
    %cst_111 = arith.constant 8.000000e+00 : f32
    %170 = vector.broadcast %cst_111 : f32 to vector<1x512xf32>
    %171 = arith.divf %169, %170 : vector<1x512xf32>
    %172 = arith.addf %124, %171 : vector<1x512xf32>
    %c1_112 = arith.constant 1 : index
    %c0_113 = arith.constant 0 : index
    %c0_114 = arith.constant 0 : index
    %173 = vector.load %arg7[%c1_112, %c0_113, %c0_114] : memref<2x32x1xf32, #tpu.memory_space<vmem>>, vector<1x32x1xf32>
    %174 = vector.shape_cast %173 : vector<1x32x1xf32> to vector<32x1xf32>
    %c1_115 = arith.constant 1 : index
    %c0_116 = arith.constant 0 : index
    %c0_117 = arith.constant 0 : index
    %175 = vector.load %arg8[%c1_115, %c0_116, %c0_117] : memref<2x32x1xf32, #tpu.memory_space<vmem>>, vector<1x32x1xf32>
    %176 = vector.shape_cast %175 : vector<1x32x1xf32> to vector<32x1xf32>
    %c1_118 = arith.constant 1 : index
    %c0_119 = arith.constant 0 : index
    %c0_120 = arith.constant 0 : index
    %177 = vector.load %arg9[%c1_118, %c0_119, %c0_120] : memref<2x8x32xf32, #tpu.memory_space<vmem>>, vector<1x8x32xf32>
    %178 = vector.shape_cast %177 : vector<1x8x32xf32> to vector<8x32xf32>
    %c1_121 = arith.constant 1 : index
    %c0_122 = arith.constant 0 : index
    %c0_123 = arith.constant 0 : index
    %179 = vector.load %arg10[%c1_121, %c0_122, %c0_123] : memref<2x8x1xf32, #tpu.memory_space<vmem>>, vector<1x8x1xf32>
    %180 = vector.shape_cast %179 : vector<1x8x1xf32> to vector<8x1xf32>
    %181 = vector.broadcast %174 : vector<32x1xf32> to vector<32x512xf32>
    %182 = vector.broadcast %172 : vector<1x512xf32> to vector<32x512xf32>
    %183 = arith.mulf %181, %182 : vector<32x512xf32>
    %184 = vector.broadcast %176 : vector<32x1xf32> to vector<32x512xf32>
    %185 = arith.addf %183, %184 : vector<32x512xf32>
    %cst_124 = arith.constant 0.000000e+00 : f32
    %186 = vector.broadcast %cst_124 : f32 to vector<32x512xf32>
    %187 = arith.maximumf %185, %186 : vector<32x512xf32>
    %cst_125 = arith.constant dense<0.000000e+00> : vector<8x512xf32>
    %188 = tpu.matmul %178, %187, %cst_125 {dimension_numbers = #tpu.dot_dimension_numbers<[1], [0], [0], [1], [0, 0, 1, 1], [], []>} : vector<8x32xf32>, vector<32x512xf32>, vector<8x512xf32> -> vector<8x512xf32>
    %189 = vector.broadcast %180 : vector<8x1xf32> to vector<8x512xf32>
    %190 = arith.addf %188, %189 : vector<8x512xf32>
    %191 = arith.addf %167, %190 : vector<8x512xf32>
    %192 = vector.extract_strided_slice %2 {offsets = [14, 0], sizes = [1, 512], strides = [1, 1]} : vector<20x512xf32> to vector<1x512xf32>
    %193 = vector.extract_strided_slice %2 {offsets = [15, 0], sizes = [1, 512], strides = [1, 1]} : vector<20x512xf32> to vector<1x512xf32>
    %194 = vector.extract_strided_slice %2 {offsets = [16, 0], sizes = [1, 512], strides = [1, 1]} : vector<20x512xf32> to vector<1x512xf32>
    %c1_126 = arith.constant 1 : index
    %c0_127 = arith.constant 0 : index
    %c0_128 = arith.constant 0 : index
    %195 = vector.load %arg3[%c1_126, %c0_127, %c0_128] : memref<2x32x1xf32, #tpu.memory_space<vmem>>, vector<1x32x1xf32>
    %196 = vector.shape_cast %195 : vector<1x32x1xf32> to vector<32x1xf32>
    %c1_129 = arith.constant 1 : index
    %c0_130 = arith.constant 0 : index
    %c0_131 = arith.constant 0 : index
    %197 = vector.load %arg4[%c1_129, %c0_130, %c0_131] : memref<2x32x1xf32, #tpu.memory_space<vmem>>, vector<1x32x1xf32>
    %198 = vector.shape_cast %197 : vector<1x32x1xf32> to vector<32x1xf32>
    %c1_132 = arith.constant 1 : index
    %c0_133 = arith.constant 0 : index
    %c0_134 = arith.constant 0 : index
    %199 = vector.load %arg5[%c1_132, %c0_133, %c0_134] : memref<2x8x32xf32, #tpu.memory_space<vmem>>, vector<1x8x32xf32>
    %200 = vector.shape_cast %199 : vector<1x8x32xf32> to vector<8x32xf32>
    %c1_135 = arith.constant 1 : index
    %c0_136 = arith.constant 0 : index
    %c0_137 = arith.constant 0 : index
    %201 = vector.load %arg6[%c1_135, %c0_136, %c0_137] : memref<2x8x1xf32, #tpu.memory_space<vmem>>, vector<1x8x1xf32>
    %202 = vector.shape_cast %201 : vector<1x8x1xf32> to vector<8x1xf32>
    %203 = vector.broadcast %196 : vector<32x1xf32> to vector<32x512xf32>
    %204 = vector.broadcast %194 : vector<1x512xf32> to vector<32x512xf32>
    %205 = arith.mulf %203, %204 : vector<32x512xf32>
    %206 = vector.broadcast %198 : vector<32x1xf32> to vector<32x512xf32>
    %207 = arith.addf %205, %206 : vector<32x512xf32>
    %cst_138 = arith.constant 0.000000e+00 : f32
    %208 = vector.broadcast %cst_138 : f32 to vector<32x512xf32>
    %209 = arith.maximumf %207, %208 : vector<32x512xf32>
    %cst_139 = arith.constant dense<0.000000e+00> : vector<8x512xf32>
    %210 = tpu.matmul %200, %209, %cst_139 {dimension_numbers = #tpu.dot_dimension_numbers<[1], [0], [0], [1], [0, 0, 1, 1], [], []>} : vector<8x32xf32>, vector<32x512xf32>, vector<8x512xf32> -> vector<8x512xf32>
    %211 = vector.broadcast %202 : vector<8x1xf32> to vector<8x512xf32>
    %212 = arith.addf %210, %211 : vector<8x512xf32>
    %213 = arith.addf %191, %212 : vector<8x512xf32>
    %cst_140 = arith.constant dense<0.000000e+00> : vector<512xf32>
    %214 = vector.multi_reduction <add>, %212, %cst_140 [0] : vector<8x512xf32> to vector<512xf32>
    %215 = vector.shape_cast %214 : vector<512xf32> to vector<1x512xf32>
    %cst_141 = arith.constant 8.000000e+00 : f32
    %216 = vector.broadcast %cst_141 : f32 to vector<1x512xf32>
    %217 = arith.divf %215, %216 : vector<1x512xf32>
    %218 = arith.addf %193, %217 : vector<1x512xf32>
    %c0_142 = arith.constant 0 : index
    %c0_143 = arith.constant 0 : index
    %c0_144 = arith.constant 0 : index
    %219 = vector.load %arg3[%c0_142, %c0_143, %c0_144] : memref<2x32x1xf32, #tpu.memory_space<vmem>>, vector<1x32x1xf32>
    %220 = vector.shape_cast %219 : vector<1x32x1xf32> to vector<32x1xf32>
    %c0_145 = arith.constant 0 : index
    %c0_146 = arith.constant 0 : index
    %c0_147 = arith.constant 0 : index
    %221 = vector.load %arg4[%c0_145, %c0_146, %c0_147] : memref<2x32x1xf32, #tpu.memory_space<vmem>>, vector<1x32x1xf32>
    %222 = vector.shape_cast %221 : vector<1x32x1xf32> to vector<32x1xf32>
    %c0_148 = arith.constant 0 : index
    %c0_149 = arith.constant 0 : index
    %c0_150 = arith.constant 0 : index
    %223 = vector.load %arg5[%c0_148, %c0_149, %c0_150] : memref<2x8x32xf32, #tpu.memory_space<vmem>>, vector<1x8x32xf32>
    %224 = vector.shape_cast %223 : vector<1x8x32xf32> to vector<8x32xf32>
    %c0_151 = arith.constant 0 : index
    %c0_152 = arith.constant 0 : index
    %c0_153 = arith.constant 0 : index
    %225 = vector.load %arg6[%c0_151, %c0_152, %c0_153] : memref<2x8x1xf32, #tpu.memory_space<vmem>>, vector<1x8x1xf32>
    %226 = vector.shape_cast %225 : vector<1x8x1xf32> to vector<8x1xf32>
    %227 = vector.broadcast %220 : vector<32x1xf32> to vector<32x512xf32>
    %228 = vector.broadcast %218 : vector<1x512xf32> to vector<32x512xf32>
    %229 = arith.mulf %227, %228 : vector<32x512xf32>
    %230 = vector.broadcast %222 : vector<32x1xf32> to vector<32x512xf32>
    %231 = arith.addf %229, %230 : vector<32x512xf32>
    %cst_154 = arith.constant 0.000000e+00 : f32
    %232 = vector.broadcast %cst_154 : f32 to vector<32x512xf32>
    %233 = arith.maximumf %231, %232 : vector<32x512xf32>
    %cst_155 = arith.constant dense<0.000000e+00> : vector<8x512xf32>
    %234 = tpu.matmul %224, %233, %cst_155 {dimension_numbers = #tpu.dot_dimension_numbers<[1], [0], [0], [1], [0, 0, 1, 1], [], []>} : vector<8x32xf32>, vector<32x512xf32>, vector<8x512xf32> -> vector<8x512xf32>
    %235 = vector.broadcast %226 : vector<8x1xf32> to vector<8x512xf32>
    %236 = arith.addf %234, %235 : vector<8x512xf32>
    %237 = arith.addf %213, %236 : vector<8x512xf32>
    %cst_156 = arith.constant dense<0.000000e+00> : vector<512xf32>
    %238 = vector.multi_reduction <add>, %236, %cst_156 [0] : vector<8x512xf32> to vector<512xf32>
    %239 = vector.shape_cast %238 : vector<512xf32> to vector<1x512xf32>
    %cst_157 = arith.constant 8.000000e+00 : f32
    %240 = vector.broadcast %cst_157 : f32 to vector<1x512xf32>
    %241 = arith.divf %239, %240 : vector<1x512xf32>
    %242 = arith.addf %192, %241 : vector<1x512xf32>
    %c0_158 = arith.constant 0 : index
    %c0_159 = arith.constant 0 : index
    %c0_160 = arith.constant 0 : index
    %243 = vector.load %arg7[%c0_158, %c0_159, %c0_160] : memref<2x32x1xf32, #tpu.memory_space<vmem>>, vector<1x32x1xf32>
    %244 = vector.shape_cast %243 : vector<1x32x1xf32> to vector<32x1xf32>
    %c0_161 = arith.constant 0 : index
    %c0_162 = arith.constant 0 : index
    %c0_163 = arith.constant 0 : index
    %245 = vector.load %arg8[%c0_161, %c0_162, %c0_163] : memref<2x32x1xf32, #tpu.memory_space<vmem>>, vector<1x32x1xf32>
    %246 = vector.shape_cast %245 : vector<1x32x1xf32> to vector<32x1xf32>
    %c0_164 = arith.constant 0 : index
    %c0_165 = arith.constant 0 : index
    %c0_166 = arith.constant 0 : index
    %247 = vector.load %arg9[%c0_164, %c0_165, %c0_166] : memref<2x8x32xf32, #tpu.memory_space<vmem>>, vector<1x8x32xf32>
    %248 = vector.shape_cast %247 : vector<1x8x32xf32> to vector<8x32xf32>
    %c0_167 = arith.constant 0 : index
    %c0_168 = arith.constant 0 : index
    %c0_169 = arith.constant 0 : index
    %249 = vector.load %arg10[%c0_167, %c0_168, %c0_169] : memref<2x8x1xf32, #tpu.memory_space<vmem>>, vector<1x8x1xf32>
    %250 = vector.shape_cast %249 : vector<1x8x1xf32> to vector<8x1xf32>
    %251 = vector.broadcast %244 : vector<32x1xf32> to vector<32x512xf32>
    %252 = vector.broadcast %242 : vector<1x512xf32> to vector<32x512xf32>
    %253 = arith.mulf %251, %252 : vector<32x512xf32>
    %254 = vector.broadcast %246 : vector<32x1xf32> to vector<32x512xf32>
    %255 = arith.addf %253, %254 : vector<32x512xf32>
    %cst_170 = arith.constant 0.000000e+00 : f32
    %256 = vector.broadcast %cst_170 : f32 to vector<32x512xf32>
    %257 = arith.maximumf %255, %256 : vector<32x512xf32>
    %cst_171 = arith.constant dense<0.000000e+00> : vector<8x512xf32>
    %258 = tpu.matmul %248, %257, %cst_171 {dimension_numbers = #tpu.dot_dimension_numbers<[1], [0], [0], [1], [0, 0, 1, 1], [], []>} : vector<8x32xf32>, vector<32x512xf32>, vector<8x512xf32> -> vector<8x512xf32>
    %259 = vector.broadcast %250 : vector<8x1xf32> to vector<8x512xf32>
    %260 = arith.addf %258, %259 : vector<8x512xf32>
    %261 = arith.addf %237, %260 : vector<8x512xf32>
    %cst_172 = arith.constant dense<0.000000e+00> : vector<512xf32>
    %262 = vector.multi_reduction <add>, %260, %cst_172 [0] : vector<8x512xf32> to vector<512xf32>
    %263 = vector.shape_cast %262 : vector<512xf32> to vector<1x512xf32>
    %cst_173 = arith.constant 8.000000e+00 : f32
    %264 = vector.broadcast %cst_173 : f32 to vector<1x512xf32>
    %265 = arith.divf %263, %264 : vector<1x512xf32>
    %266 = arith.addf %218, %265 : vector<1x512xf32>
    %c1_174 = arith.constant 1 : index
    %c0_175 = arith.constant 0 : index
    %c0_176 = arith.constant 0 : index
    %267 = vector.load %arg7[%c1_174, %c0_175, %c0_176] : memref<2x32x1xf32, #tpu.memory_space<vmem>>, vector<1x32x1xf32>
    %268 = vector.shape_cast %267 : vector<1x32x1xf32> to vector<32x1xf32>
    %c1_177 = arith.constant 1 : index
    %c0_178 = arith.constant 0 : index
    %c0_179 = arith.constant 0 : index
    %269 = vector.load %arg8[%c1_177, %c0_178, %c0_179] : memref<2x32x1xf32, #tpu.memory_space<vmem>>, vector<1x32x1xf32>
    %270 = vector.shape_cast %269 : vector<1x32x1xf32> to vector<32x1xf32>
    %c1_180 = arith.constant 1 : index
    %c0_181 = arith.constant 0 : index
    %c0_182 = arith.constant 0 : index
    %271 = vector.load %arg9[%c1_180, %c0_181, %c0_182] : memref<2x8x32xf32, #tpu.memory_space<vmem>>, vector<1x8x32xf32>
    %272 = vector.shape_cast %271 : vector<1x8x32xf32> to vector<8x32xf32>
    %c1_183 = arith.constant 1 : index
    %c0_184 = arith.constant 0 : index
    %c0_185 = arith.constant 0 : index
    %273 = vector.load %arg10[%c1_183, %c0_184, %c0_185] : memref<2x8x1xf32, #tpu.memory_space<vmem>>, vector<1x8x1xf32>
    %274 = vector.shape_cast %273 : vector<1x8x1xf32> to vector<8x1xf32>
    %275 = vector.broadcast %268 : vector<32x1xf32> to vector<32x512xf32>
    %276 = vector.broadcast %266 : vector<1x512xf32> to vector<32x512xf32>
    %277 = arith.mulf %275, %276 : vector<32x512xf32>
    %278 = vector.broadcast %270 : vector<32x1xf32> to vector<32x512xf32>
    %279 = arith.addf %277, %278 : vector<32x512xf32>
    %cst_186 = arith.constant 0.000000e+00 : f32
    %280 = vector.broadcast %cst_186 : f32 to vector<32x512xf32>
    %281 = arith.maximumf %279, %280 : vector<32x512xf32>
    %cst_187 = arith.constant dense<0.000000e+00> : vector<8x512xf32>
    %282 = tpu.matmul %272, %281, %cst_187 {dimension_numbers = #tpu.dot_dimension_numbers<[1], [0], [0], [1], [0, 0, 1, 1], [], []>} : vector<8x32xf32>, vector<32x512xf32>, vector<8x512xf32> -> vector<8x512xf32>
    %283 = vector.broadcast %274 : vector<8x1xf32> to vector<8x512xf32>
    %284 = arith.addf %282, %283 : vector<8x512xf32>
    %285 = arith.addf %261, %284 : vector<8x512xf32>
    %286 = vector.extract_strided_slice %2 {offsets = [17, 0], sizes = [1, 512], strides = [1, 1]} : vector<20x512xf32> to vector<1x512xf32>
    %287 = vector.extract_strided_slice %2 {offsets = [18, 0], sizes = [1, 512], strides = [1, 1]} : vector<20x512xf32> to vector<1x512xf32>
    %288 = vector.extract_strided_slice %2 {offsets = [19, 0], sizes = [1, 512], strides = [1, 1]} : vector<20x512xf32> to vector<1x512xf32>
    %c1_188 = arith.constant 1 : index
    %c0_189 = arith.constant 0 : index
    %c0_190 = arith.constant 0 : index
    %289 = vector.load %arg3[%c1_188, %c0_189, %c0_190] : memref<2x32x1xf32, #tpu.memory_space<vmem>>, vector<1x32x1xf32>
    %290 = vector.shape_cast %289 : vector<1x32x1xf32> to vector<32x1xf32>
    %c1_191 = arith.constant 1 : index
    %c0_192 = arith.constant 0 : index
    %c0_193 = arith.constant 0 : index
    %291 = vector.load %arg4[%c1_191, %c0_192, %c0_193] : memref<2x32x1xf32, #tpu.memory_space<vmem>>, vector<1x32x1xf32>
    %292 = vector.shape_cast %291 : vector<1x32x1xf32> to vector<32x1xf32>
    %c1_194 = arith.constant 1 : index
    %c0_195 = arith.constant 0 : index
    %c0_196 = arith.constant 0 : index
    %293 = vector.load %arg5[%c1_194, %c0_195, %c0_196] : memref<2x8x32xf32, #tpu.memory_space<vmem>>, vector<1x8x32xf32>
    %294 = vector.shape_cast %293 : vector<1x8x32xf32> to vector<8x32xf32>
    %c1_197 = arith.constant 1 : index
    %c0_198 = arith.constant 0 : index
    %c0_199 = arith.constant 0 : index
    %295 = vector.load %arg6[%c1_197, %c0_198, %c0_199] : memref<2x8x1xf32, #tpu.memory_space<vmem>>, vector<1x8x1xf32>
    %296 = vector.shape_cast %295 : vector<1x8x1xf32> to vector<8x1xf32>
    %297 = vector.broadcast %290 : vector<32x1xf32> to vector<32x512xf32>
    %298 = vector.broadcast %288 : vector<1x512xf32> to vector<32x512xf32>
    %299 = arith.mulf %297, %298 : vector<32x512xf32>
    %300 = vector.broadcast %292 : vector<32x1xf32> to vector<32x512xf32>
    %301 = arith.addf %299, %300 : vector<32x512xf32>
    %cst_200 = arith.constant 0.000000e+00 : f32
    %302 = vector.broadcast %cst_200 : f32 to vector<32x512xf32>
    %303 = arith.maximumf %301, %302 : vector<32x512xf32>
    %cst_201 = arith.constant dense<0.000000e+00> : vector<8x512xf32>
    %304 = tpu.matmul %294, %303, %cst_201 {dimension_numbers = #tpu.dot_dimension_numbers<[1], [0], [0], [1], [0, 0, 1, 1], [], []>} : vector<8x32xf32>, vector<32x512xf32>, vector<8x512xf32> -> vector<8x512xf32>
    %305 = vector.broadcast %296 : vector<8x1xf32> to vector<8x512xf32>
    %306 = arith.addf %304, %305 : vector<8x512xf32>
    %307 = arith.addf %285, %306 : vector<8x512xf32>
    %cst_202 = arith.constant dense<0.000000e+00> : vector<512xf32>
    %308 = vector.multi_reduction <add>, %306, %cst_202 [0] : vector<8x512xf32> to vector<512xf32>
    %309 = vector.shape_cast %308 : vector<512xf32> to vector<1x512xf32>
    %cst_203 = arith.constant 8.000000e+00 : f32
    %310 = vector.broadcast %cst_203 : f32 to vector<1x512xf32>
    %311 = arith.divf %309, %310 : vector<1x512xf32>
    %312 = arith.addf %287, %311 : vector<1x512xf32>
    %c0_204 = arith.constant 0 : index
    %c0_205 = arith.constant 0 : index
    %c0_206 = arith.constant 0 : index
    %313 = vector.load %arg3[%c0_204, %c0_205, %c0_206] : memref<2x32x1xf32, #tpu.memory_space<vmem>>, vector<1x32x1xf32>
    %314 = vector.shape_cast %313 : vector<1x32x1xf32> to vector<32x1xf32>
    %c0_207 = arith.constant 0 : index
    %c0_208 = arith.constant 0 : index
    %c0_209 = arith.constant 0 : index
    %315 = vector.load %arg4[%c0_207, %c0_208, %c0_209] : memref<2x32x1xf32, #tpu.memory_space<vmem>>, vector<1x32x1xf32>
    %316 = vector.shape_cast %315 : vector<1x32x1xf32> to vector<32x1xf32>
    %c0_210 = arith.constant 0 : index
    %c0_211 = arith.constant 0 : index
    %c0_212 = arith.constant 0 : index
    %317 = vector.load %arg5[%c0_210, %c0_211, %c0_212] : memref<2x8x32xf32, #tpu.memory_space<vmem>>, vector<1x8x32xf32>
    %318 = vector.shape_cast %317 : vector<1x8x32xf32> to vector<8x32xf32>
    %c0_213 = arith.constant 0 : index
    %c0_214 = arith.constant 0 : index
    %c0_215 = arith.constant 0 : index
    %319 = vector.load %arg6[%c0_213, %c0_214, %c0_215] : memref<2x8x1xf32, #tpu.memory_space<vmem>>, vector<1x8x1xf32>
    %320 = vector.shape_cast %319 : vector<1x8x1xf32> to vector<8x1xf32>
    %321 = vector.broadcast %314 : vector<32x1xf32> to vector<32x512xf32>
    %322 = vector.broadcast %312 : vector<1x512xf32> to vector<32x512xf32>
    %323 = arith.mulf %321, %322 : vector<32x512xf32>
    %324 = vector.broadcast %316 : vector<32x1xf32> to vector<32x512xf32>
    %325 = arith.addf %323, %324 : vector<32x512xf32>
    %cst_216 = arith.constant 0.000000e+00 : f32
    %326 = vector.broadcast %cst_216 : f32 to vector<32x512xf32>
    %327 = arith.maximumf %325, %326 : vector<32x512xf32>
    %cst_217 = arith.constant dense<0.000000e+00> : vector<8x512xf32>
    %328 = tpu.matmul %318, %327, %cst_217 {dimension_numbers = #tpu.dot_dimension_numbers<[1], [0], [0], [1], [0, 0, 1, 1], [], []>} : vector<8x32xf32>, vector<32x512xf32>, vector<8x512xf32> -> vector<8x512xf32>
    %329 = vector.broadcast %320 : vector<8x1xf32> to vector<8x512xf32>
    %330 = arith.addf %328, %329 : vector<8x512xf32>
    %331 = arith.addf %307, %330 : vector<8x512xf32>
    %cst_218 = arith.constant dense<0.000000e+00> : vector<512xf32>
    %332 = vector.multi_reduction <add>, %330, %cst_218 [0] : vector<8x512xf32> to vector<512xf32>
    %333 = vector.shape_cast %332 : vector<512xf32> to vector<1x512xf32>
    %cst_219 = arith.constant 8.000000e+00 : f32
    %334 = vector.broadcast %cst_219 : f32 to vector<1x512xf32>
    %335 = arith.divf %333, %334 : vector<1x512xf32>
    %336 = arith.addf %286, %335 : vector<1x512xf32>
    %c0_220 = arith.constant 0 : index
    %c0_221 = arith.constant 0 : index
    %c0_222 = arith.constant 0 : index
    %337 = vector.load %arg7[%c0_220, %c0_221, %c0_222] : memref<2x32x1xf32, #tpu.memory_space<vmem>>, vector<1x32x1xf32>
    %338 = vector.shape_cast %337 : vector<1x32x1xf32> to vector<32x1xf32>
    %c0_223 = arith.constant 0 : index
    %c0_224 = arith.constant 0 : index
    %c0_225 = arith.constant 0 : index
    %339 = vector.load %arg8[%c0_223, %c0_224, %c0_225] : memref<2x32x1xf32, #tpu.memory_space<vmem>>, vector<1x32x1xf32>
    %340 = vector.shape_cast %339 : vector<1x32x1xf32> to vector<32x1xf32>
    %c0_226 = arith.constant 0 : index
    %c0_227 = arith.constant 0 : index
    %c0_228 = arith.constant 0 : index
    %341 = vector.load %arg9[%c0_226, %c0_227, %c0_228] : memref<2x8x32xf32, #tpu.memory_space<vmem>>, vector<1x8x32xf32>
    %342 = vector.shape_cast %341 : vector<1x8x32xf32> to vector<8x32xf32>
    %c0_229 = arith.constant 0 : index
    %c0_230 = arith.constant 0 : index
    %c0_231 = arith.constant 0 : index
    %343 = vector.load %arg10[%c0_229, %c0_230, %c0_231] : memref<2x8x1xf32, #tpu.memory_space<vmem>>, vector<1x8x1xf32>
    %344 = vector.shape_cast %343 : vector<1x8x1xf32> to vector<8x1xf32>
    %345 = vector.broadcast %338 : vector<32x1xf32> to vector<32x512xf32>
    %346 = vector.broadcast %336 : vector<1x512xf32> to vector<32x512xf32>
    %347 = arith.mulf %345, %346 : vector<32x512xf32>
    %348 = vector.broadcast %340 : vector<32x1xf32> to vector<32x512xf32>
    %349 = arith.addf %347, %348 : vector<32x512xf32>
    %cst_232 = arith.constant 0.000000e+00 : f32
    %350 = vector.broadcast %cst_232 : f32 to vector<32x512xf32>
    %351 = arith.maximumf %349, %350 : vector<32x512xf32>
    %cst_233 = arith.constant dense<0.000000e+00> : vector<8x512xf32>
    %352 = tpu.matmul %342, %351, %cst_233 {dimension_numbers = #tpu.dot_dimension_numbers<[1], [0], [0], [1], [0, 0, 1, 1], [], []>} : vector<8x32xf32>, vector<32x512xf32>, vector<8x512xf32> -> vector<8x512xf32>
    %353 = vector.broadcast %344 : vector<8x1xf32> to vector<8x512xf32>
    %354 = arith.addf %352, %353 : vector<8x512xf32>
    %355 = arith.addf %331, %354 : vector<8x512xf32>
    %cst_234 = arith.constant dense<0.000000e+00> : vector<512xf32>
    %356 = vector.multi_reduction <add>, %354, %cst_234 [0] : vector<8x512xf32> to vector<512xf32>
    %357 = vector.shape_cast %356 : vector<512xf32> to vector<1x512xf32>
    %cst_235 = arith.constant 8.000000e+00 : f32
    %358 = vector.broadcast %cst_235 : f32 to vector<1x512xf32>
    %359 = arith.divf %357, %358 : vector<1x512xf32>
    %360 = arith.addf %312, %359 : vector<1x512xf32>
    %c1_236 = arith.constant 1 : index
    %c0_237 = arith.constant 0 : index
    %c0_238 = arith.constant 0 : index
    %361 = vector.load %arg7[%c1_236, %c0_237, %c0_238] : memref<2x32x1xf32, #tpu.memory_space<vmem>>, vector<1x32x1xf32>
    %362 = vector.shape_cast %361 : vector<1x32x1xf32> to vector<32x1xf32>
    %c1_239 = arith.constant 1 : index
    %c0_240 = arith.constant 0 : index
    %c0_241 = arith.constant 0 : index
    %363 = vector.load %arg8[%c1_239, %c0_240, %c0_241] : memref<2x32x1xf32, #tpu.memory_space<vmem>>, vector<1x32x1xf32>
    %364 = vector.shape_cast %363 : vector<1x32x1xf32> to vector<32x1xf32>
    %c1_242 = arith.constant 1 : index
    %c0_243 = arith.constant 0 : index
    %c0_244 = arith.constant 0 : index
    %365 = vector.load %arg9[%c1_242, %c0_243, %c0_244] : memref<2x8x32xf32, #tpu.memory_space<vmem>>, vector<1x8x32xf32>
    %366 = vector.shape_cast %365 : vector<1x8x32xf32> to vector<8x32xf32>
    %c1_245 = arith.constant 1 : index
    %c0_246 = arith.constant 0 : index
    %c0_247 = arith.constant 0 : index
    %367 = vector.load %arg10[%c1_245, %c0_246, %c0_247] : memref<2x8x1xf32, #tpu.memory_space<vmem>>, vector<1x8x1xf32>
    %368 = vector.shape_cast %367 : vector<1x8x1xf32> to vector<8x1xf32>
    %369 = vector.broadcast %362 : vector<32x1xf32> to vector<32x512xf32>
    %370 = vector.broadcast %360 : vector<1x512xf32> to vector<32x512xf32>
    %371 = arith.mulf %369, %370 : vector<32x512xf32>
    %372 = vector.broadcast %364 : vector<32x1xf32> to vector<32x512xf32>
    %373 = arith.addf %371, %372 : vector<32x512xf32>
    %cst_248 = arith.constant 0.000000e+00 : f32
    %374 = vector.broadcast %cst_248 : f32 to vector<32x512xf32>
    %375 = arith.maximumf %373, %374 : vector<32x512xf32>
    %cst_249 = arith.constant dense<0.000000e+00> : vector<8x512xf32>
    %376 = tpu.matmul %366, %375, %cst_249 {dimension_numbers = #tpu.dot_dimension_numbers<[1], [0], [0], [1], [0, 0, 1, 1], [], []>} : vector<8x32xf32>, vector<32x512xf32>, vector<8x512xf32> -> vector<8x512xf32>
    %377 = vector.broadcast %368 : vector<8x1xf32> to vector<8x512xf32>
    %378 = arith.addf %376, %377 : vector<8x512xf32>
    %379 = arith.addf %355, %378 : vector<8x512xf32>
    %c0_250 = arith.constant 0 : index
    %c0_251 = arith.constant 0 : index
    %380 = vector.load %arg11[%c0_250, %c0_251] : memref<32x8xf32, #tpu.memory_space<vmem>>, vector<32x8xf32>
    %cst_252 = arith.constant dense<0.000000e+00> : vector<32x512xf32>
    %381 = tpu.matmul %380, %379, %cst_252 {dimension_numbers = #tpu.dot_dimension_numbers<[1], [0], [0], [1], [0, 0, 1, 1], [], []>} : vector<32x8xf32>, vector<8x512xf32>, vector<32x512xf32> -> vector<32x512xf32>
    %c0_253 = arith.constant 0 : index
    %c0_254 = arith.constant 0 : index
    %382 = vector.load %arg12[%c0_253, %c0_254] : memref<32x1xf32, #tpu.memory_space<vmem>>, vector<32x1xf32>
    %383 = vector.broadcast %382 : vector<32x1xf32> to vector<32x512xf32>
    %384 = arith.addf %381, %383 : vector<32x512xf32>
    %cst_255 = arith.constant 0.000000e+00 : f32
    %385 = vector.broadcast %cst_255 : f32 to vector<32x512xf32>
    %386 = arith.maximumf %384, %385 : vector<32x512xf32>
    %c0_256 = arith.constant 0 : index
    %c0_257 = arith.constant 0 : index
    %387 = vector.load %arg13[%c0_256, %c0_257] : memref<32x1xf32, #tpu.memory_space<vmem>>, vector<32x1xf32>
    %388 = vector.broadcast %387 : vector<32x1xf32> to vector<32x512xf32>
    %389 = arith.mulf %386, %388 : vector<32x512xf32>
    %cst_258 = arith.constant dense<0.000000e+00> : vector<512xf32>
    %390 = vector.multi_reduction <add>, %389, %cst_258 [0] : vector<32x512xf32> to vector<512xf32>
    %391 = vector.shape_cast %390 : vector<512xf32> to vector<1x512xf32>
    %c0_259 = arith.constant 0 : index
    %c0_260 = arith.constant 0 : index
    %392 = vector.load %arg14[%c0_259, %c0_260] : memref<1x1xf32, #tpu.memory_space<vmem>>, vector<1x1xf32>
    %393 = vector.broadcast %392 : vector<1x1xf32> to vector<1x512xf32>
    %394 = arith.addf %391, %393 : vector<1x512xf32>
    %c0_261 = arith.constant 0 : index
    %c0_262 = arith.constant 0 : index
    %395 = vector.load %arg15[%c0_261, %c0_262] : memref<1x512xf32, #tpu.memory_space<vmem>>, vector<1x512xf32>
    tpu.vector_store %arg15[%c0_261, %c0_262], %394 {strides = array<i32>} : memref<1x512xf32, #tpu.memory_space<vmem>>, vector<1x512xf32>,
    return
  }
  func.func @transform_0(%arg0: i32) -> (i32, i32) {
    %c0_i32 = arith.constant 0 : i32
    %c0_i32_0 = arith.constant 0 : i32
    return %arg0, %c0_i32 : i32, i32
  }
  func.func @transform_1(%arg0: i32) -> (i32, i32) {
    %c0_i32 = arith.constant 0 : i32
    %c0_i32_0 = arith.constant 0 : i32
    %c0_i32_1 = arith.constant 0 : i32
    return %c0_i32, %c0_i32_0 : i32, i32
  }
  func.func @transform_2(%arg0: i32) -> (i32, i32, i32) {
    %c0_i32 = arith.constant 0 : i32
    %c0_i32_0 = arith.constant 0 : i32
    %c0_i32_1 = arith.constant 0 : i32
    %c0_i32_2 = arith.constant 0 : i32
    return %c0_i32, %c0_i32_0, %c0_i32_1 : i32, i32, i32
  }
  func.func @transform_3(%arg0: i32) -> (i32, i32, i32) {
    %c0_i32 = arith.constant 0 : i32
    %c0_i32_0 = arith.constant 0 : i32
    %c0_i32_1 = arith.constant 0 : i32
    %c0_i32_2 = arith.constant 0 : i32
    return %c0_i32, %c0_i32_0, %c0_i32_1 : i32, i32, i32
  }
  func.func @transform_4(%arg0: i32) -> (i32, i32, i32) {
    %c0_i32 = arith.constant 0 : i32
    %c0_i32_0 = arith.constant 0 : i32
    %c0_i32_1 = arith.constant 0 : i32
    %c0_i32_2 = arith.constant 0 : i32
    return %c0_i32, %c0_i32_0, %c0_i32_1 : i32, i32, i32
  }
  func.func @transform_5(%arg0: i32) -> (i32, i32, i32) {
    %c0_i32 = arith.constant 0 : i32
    %c0_i32_0 = arith.constant 0 : i32
    %c0_i32_1 = arith.constant 0 : i32
    %c0_i32_2 = arith.constant 0 : i32
    return %c0_i32, %c0_i32_0, %c0_i32_1 : i32, i32, i32
  }
  func.func @transform_6(%arg0: i32) -> (i32, i32, i32) {
    %c0_i32 = arith.constant 0 : i32
    %c0_i32_0 = arith.constant 0 : i32
    %c0_i32_1 = arith.constant 0 : i32
    %c0_i32_2 = arith.constant 0 : i32
    return %c0_i32, %c0_i32_0, %c0_i32_1 : i32, i32, i32
  }
  func.func @transform_7(%arg0: i32) -> (i32, i32, i32) {
    %c0_i32 = arith.constant 0 : i32
    %c0_i32_0 = arith.constant 0 : i32
    %c0_i32_1 = arith.constant 0 : i32
    %c0_i32_2 = arith.constant 0 : i32
    return %c0_i32, %c0_i32_0, %c0_i32_1 : i32, i32, i32
  }
  func.func @transform_8(%arg0: i32) -> (i32, i32, i32) {
    %c0_i32 = arith.constant 0 : i32
    %c0_i32_0 = arith.constant 0 : i32
    %c0_i32_1 = arith.constant 0 : i32
    %c0_i32_2 = arith.constant 0 : i32
    return %c0_i32, %c0_i32_0, %c0_i32_1 : i32, i32, i32
  }
  func.func @transform_9(%arg0: i32) -> (i32, i32, i32) {
    %c0_i32 = arith.constant 0 : i32
    %c0_i32_0 = arith.constant 0 : i32
    %c0_i32_1 = arith.constant 0 : i32
    %c0_i32_2 = arith.constant 0 : i32
    return %c0_i32, %c0_i32_0, %c0_i32_1 : i32, i32, i32
  }
  func.func @transform_10(%arg0: i32) -> (i32, i32) {
    %c0_i32 = arith.constant 0 : i32
    %c0_i32_0 = arith.constant 0 : i32
    %c0_i32_1 = arith.constant 0 : i32
    return %c0_i32, %c0_i32_0 : i32, i32
  }
  func.func @transform_11(%arg0: i32) -> (i32, i32) {
    %c0_i32 = arith.constant 0 : i32
    %c0_i32_0 = arith.constant 0 : i32
    %c0_i32_1 = arith.constant 0 : i32
    return %c0_i32, %c0_i32_0 : i32, i32
  }
  func.func @transform_12(%arg0: i32) -> (i32, i32) {
    %c0_i32 = arith.constant 0 : i32
    %c0_i32_0 = arith.constant 0 : i32
    %c0_i32_1 = arith.constant 0 : i32
    return %c0_i32, %c0_i32_0 : i32, i32
  }
  func.func @transform_13(%arg0: i32) -> (i32, i32) {
    %c0_i32 = arith.constant 0 : i32
    %c0_i32_0 = arith.constant 0 : i32
    %c0_i32_1 = arith.constant 0 : i32
    return %c0_i32, %c0_i32_0 : i32, i32
  }
  func.func @transform_14(%arg0: i32) -> (i32, i32) {
    %c0_i32 = arith.constant 0 : i32
    %c0_i32_0 = arith.constant 0 : i32
    return %c0_i32, %arg0 : i32, i32
  }
}

</mosaic_0001>

<bundles_post_ra>
// kernel: vcycle_aggregator_pallas.1
= control target key start
LH: loop header
LB: loop body
LE: loop exit
PB: predicated region body
PF: predicated region fallthrough
CT: control target
= control target key end

     0   :  { %s7947_s0 = inlined_call_operand.vmem [shape: f32[2048,96], index: 0, kind: input, shape index: {}]   ;;  %s7948_s1 = inlined_call_operand.vmem [shape: f32[20,96], index: 1, kind: input, shape index: {}]   ;;  %s7949_s2 = inlined_call_operand.vmem [shape: f32[2,32,1], index: 2, kind: input, shape index: {}]   ;;  %s7950_s3 = inlined_call_operand.vmem [shape: f32[2,32,1], index: 3, kind: input, shape index: {}]   ;;  %s7951_s4 = inlined_call_operand.vmem [shape: f32[2,8,32], index: 4, kind: input, shape index: {}]   ;;  %s7952_s5 = inlined_call_operand.vmem [shape: f32[2,8,1], index: 5, kind: input, shape index: {}]   ;;  %s7953_s6 = inlined_call_operand.vmem [shape: f32[2,32,1], index: 6, kind: input, shape index: {}]   ;;  %s7954_s7 = inlined_call_operand.vmem [shape: f32[2,32,1], index: 7, kind: input, shape index: {}]   ;;  %s7955_s8 = inlined_call_operand.vmem [shape: f32[2,8,32], index: 8, kind: input, shape index: {}]   ;;  %s7956_s9 = inlined_call_operand.vmem [shape: f32[2,8,1], index: 9, kind: input, shape index: {}]   ;;  %s7957_s10 = inlined_call_operand.vmem [shape: f32[32,8], index: 10, kind: input, shape index: {}]   ;;  %s7958_s11 = inlined_call_operand.vmem [shape: f32[32,1], index: 11, kind: input, shape index: {}]   ;;  %s7959_s12 = inlined_call_operand.vmem [shape: f32[32,1], index: 12, kind: input, shape index: {}]   ;;  %s7960_s13 = inlined_call_operand.<no memory space> [shape: f32[1,1], index: 13, kind: input, shape index: {}]   ;;  %s7961_s14 = inlined_call_operand.hbm [shape: f32[1,2048], index: 14, kind: output, shape index: {}]  }
   0x1   :  { %8083 = sst [smem:[#allocation44_spill]] %s7947_s0  ;;  %v19_v0 = vstv %s7960_s13 }
   0x2   :  { %20 = vst [vmem:[#allocation2] sm:$0x1] %v19_v0 }
   0x3   :  { %21 = vsyncpa [#allocation4], 0 }
   0x4   :  { %23 = vsyncpa [#allocation4 + $0x1], 0  ;;  %s6170_s15 = smov 0   ;;  %s6172_s16 = smov 0  }
   0x5   :  { %s6174_s17 = smov 0   ;;  %s6176_s18 = smov 0  }
   0x6 LB: > { %8084 = sst [smem:[#allocation6_spill]] %s6082_s17  ;;  %s5324_s13 = sadd.s32 4294967295, %s6086_s18   ;;  %s6086_s18 = sphi %s6176_s18, %s8242_s18   ;;  %s6082_s17 = sphi %s6174_s17, %s8239_s17   ;;  %s6078_s16 = sphi %s6172_s16, %s8241_s16   ;;  %s6074_s15 = sphi %s6170_s15, %s8240_s15  }
   0x7   : > { %s5325_s19 = sadd.s32 4294967294, %s6086_s18   ;;  %s6193_s20 = sadd.s32 1, %s6086_s18  }
   0x8   : > { %s335_s21 = sadd.s32 1, %s6082_s17  ;;  %s332_s22 = ssub.s32 %s6086_s18, %s6193_s20 }
   0x9   : > { %p345_p0 = scmp.ne.s32.totalorder %s6082_s17, %s6078_s16  ;;  %p333_p1 = scmp.eq.s32.totalorder %s332_s22, 0 }
   0xa   : > { %p346_p2 = scmp.eq.s32.totalorder %s5324_s13, 3  ;;  %p351_p3 = scmp.ne.s32.totalorder %s6078_s16, %s6074_s15 }
   0xb   : > { %p352_p4 = scmp.eq.s32.totalorder %s5325_s19, 3  ;;  %p5328_p7 = scmp.ge.s32.totalorder %s6086_s18, 1 }
   0xc   : > { %s6203_s23 = scalar_select %p333_p1, %s6082_s17, %s335_s21  }
   0xd   : > { %p6205_p5 = por %p346_p2, %p345_p0  ;;  %p6209_p6 = por %p352_p4, %p351_p3 }
   0xe   : > { %8085 = sst [smem:[#allocation7_spill]] %s6203_s23  ;;  %p418_p8 = scmp.lt.s32.totalorder %s6086_s18, 5 }
  0x10   : > { %p419_p9 = pnand %p5328_p7, %p418_p8 }
  0x12   : > { %422 = sbr.rel (%p419_p9) target bundleno = 3877 (0xf25), region = 76 }
  0x19   : > { %s6215_s26 = sshll.u32 %s5324_s13, 6  ;;  %vm538_vm0 = vcmask 785408   ;;  %v5402_v1 = vld [vmem:[%s7949_s2 + $0x20] sm:$0xff]  ;;  %v6088_v3 = vmov 0   ;;  %v5403_v5 = vld [vmem:[%s7949_s2 + $0x28] sm:$0xff]  ;;  %s8088_s0 = sld [smem:[#allocation44_spill]] }
  0x1a   : > { %v6223_v2 = vld [vmem:[%s7948_s1] sm:$0xff]  ;;  %p465_p10 = scmp.lt.s32.totalorder %s6215_s26, 255  ;;  %6018 = vset.pattern.permute.xlu0 %v6088_v3  ;;  %6019 = vset.pattern.permute.xlu1 %v6088_v3  ;;  %v5407_v6 = vld [vmem:[%s7950_s3 + $0x28] sm:$0xff]  ;;  %vm6247_vm1 = vmpackc.low %vm538_vm0, %vm538_vm0  ;;  %vm1029_vm2 = vcmask 261120   ;;  %vm4920_vm3 = vcmask 64512   ;;  %s461_s22 = sand.u32 1, %s6078_s16  }
  0x1b   : > { %5500 = vmatprep.mubr.msk.f32.mxu0 %vm538_vm0, %v6223_v2  ;;  %v5406_v4 = vld [vmem:[%s7950_s3 + $0x20] sm:$0xff]  ;;  %922 = vperm.xlu0 %6018, %v5402_v1   ;;  %v5404_v8 = vld [vmem:[%s7949_s2 + $0x30] sm:$0xff]  ;;  %v5405_v12 = vld [vmem:[%s7949_s2 + $0x38] sm:$0xff]  ;;  %s5329_s27 = sshll.u32 %s461_s22, 2  ;;  %s7905_s19 = scalar_lea.hbm %s7961_s14, %s6215_s26 }
  0x1c   : > { %5538 = vmatprep.mubr.msk.f32.mxu1 %vm538_vm0, %v6223_v2  ;;  %s466_s21 = scalar_select %p465_p10, %s6215_s26, 255  ;;  %974 = vperm.xlu1 %6019, %v5406_v4   ;;  %v5408_v28 = vld [vmem:[%s7950_s3 + $0x30] sm:$0xff]  ;;  %v5409_v29 = vld [vmem:[%s7950_s3 + $0x38] sm:$0xff]  ;;  %v5411_v39 = vld [vmem:[%s7952_s5 + $0x8] sm:$0xff] }
  0x1d   : > { %v1212_v43 = vld [vmem:[%s7949_s2] sm:$0xff]  ;;  %v1213_v44 = vld [vmem:[%s7949_s2 + $0x8] sm:$0xff]  ;;  %v1214_v59 = vld [vmem:[%s7949_s2 + $0x10] sm:$0xff]  ;;  %s5252_s17 = scalar_lea.sflag [#allocation4], %s461_s22 }
  0x1e   : > { %s5331_s28 = sshll.u32 %s466_s21, 3  ;;  %v1216_v53 = vld [vmem:[%s7950_s3] sm:$0xff]  ;;  %v1217_v55 = vld [vmem:[%s7950_s3 + $0x8] sm:$0xff]  ;;  %v1215_v60 = vld [vmem:[%s7949_s2 + $0x18] sm:$0xff]  ;;  %s6091_s21 = smov [#allocation3]  }
  0x1f   : > { %s6243_s13 = scalar_lea.vmem %s8088_s0, %s5331_s28  ;;  %927 = vperm.xlu0 %6018, %v5403_v5   ;;  %v4897_v7 = vld [vmem:[%s7958_s11 + $0x8] sm:$0xff] }
  0x20   : > { %v490_v9 = vld [vmem:[%s6243_s13 + $0x80] sm:$0xff]  ;;  %v491_v10 = vld [vmem:[%s6243_s13 + $0x88] sm:$0xff]  ;;  %979 = vperm.xlu1 %6019, %v5407_v6   ;;  %v492_v21 = vld [vmem:[%s6243_s13 + $0x90] sm:$0xff] }
  0x21   : > { %v522_v11 = vld [vmem:[%s6243_s13 + $0x180] sm:$0xff]  ;;  %v5544_v13 = vpack.c.bf16 %v491_v10, %v490_v9  ;;  %v523_v14 = vld [vmem:[%s6243_s13 + $0x188] sm:$0xff]  ;;  %v493_v23 = vld [vmem:[%s6243_s13 + $0x98] sm:$0xff] }
  0x22   : > { %v474_v15 = vld [vmem:[%s6243_s13] sm:$0xff]  ;;  %v475_v16 = vld [vmem:[%s6243_s13 + $0x8] sm:$0xff]  ;;  %v5592_v17 = vpack.c.bf16 %v523_v14, %v522_v11  ;;  %v524_v24 = vld [vmem:[%s6243_s13 + $0x190] sm:$0xff]  ;;  %v5550_v26 = vpack.c.bf16 %v493_v23, %v492_v21 }
  0x23   : > { %v5547_v18 = vpack.c.bf16 %v475_v16, %v474_v15  ;;  %v506_v19 = vld [vmem:[%s6243_s13 + $0x100] sm:$0xff]  ;;  %v507_v20 = vld [vmem:[%s6243_s13 + $0x108] sm:$0xff]  ;;  %5546 = vmatprep.subr.msk.bf16.mxu0 %vm6247_vm1, %v5544_v13  ;;  %v525_v25 = vld [vmem:[%s6243_s13 + $0x198] sm:$0xff]  ;;  %932 = vperm.xlu0 %6018, %v5404_v8  }
  0x24   : > { %v5595_v22 = vpack.c.bf16 %v507_v20, %v506_v19  ;;  %5594 = vmatprep.subr.msk.bf16.mxu1 %vm6247_vm1, %v5592_v17  ;;  %v5598_v27 = vpack.c.bf16 %v525_v25, %v524_v24  ;;  %v476_v30 = vld [vmem:[%s6243_s13 + $0x10] sm:$0xff]  ;;  %v477_v31 = vld [vmem:[%s6243_s13 + $0x18] sm:$0xff]  ;;  %937 = vperm.xlu1 %6019, %v5405_v12   ;;  %v494_v34 = vld [vmem:[%s6243_s13 + $0xa0] sm:$0xff] }
  0x25   : > { %5549 = vmatpush3.bf16.xpose.msk.msra.mxu0 %vm6247_vm1, %v5547_v18  ;;  %v508_v32 = vld [vmem:[%s6243_s13 + $0x110] sm:$0xff]  ;;  %v509_v33 = vld [vmem:[%s6243_s13 + $0x118] sm:$0xff]  ;;  %v495_v35 = vld [vmem:[%s6243_s13 + $0xa8] sm:$0xff]  ;;  %v5553_v38 = vpack.c.bf16 %v477_v31, %v476_v30 }
  0x26   : > { %5597 = vmatpush3.bf16.xpose.msk.msra.mxu1 %vm6247_vm1, %v5595_v22  ;;  %5552 = vmatprep.subr.msk.bf16.mxu0 %vm6247_vm1, %v5550_v26  ;;  %v526_v36 = vld [vmem:[%s6243_s13 + $0x1a0] sm:$0xff]  ;;  %v527_v37 = vld [vmem:[%s6243_s13 + $0x1a8] sm:$0xff]  ;;  %v5601_v40 = vpack.c.bf16 %v509_v33, %v508_v32  ;;  %v5556_v41 = vpack.c.bf16 %v495_v35, %v494_v34  ;;  %v496_v49 = vld [vmem:[%s6243_s13 + $0xb0] sm:$0xff] }
  0x27   : > { %5600 = vmatprep.subr.msk.bf16.mxu1 %vm6247_vm1, %v5598_v27  ;;  %984 = vperm.xlu0 %6018, %v5408_v28   ;;  %v5604_v42 = vpack.c.bf16 %v527_v37, %v526_v36  ;;  %v478_v45 = vld [vmem:[%s6243_s13 + $0x20] sm:$0xff]  ;;  %v479_v46 = vld [vmem:[%s6243_s13 + $0x28] sm:$0xff]  ;;  %v497_v50 = vld [vmem:[%s6243_s13 + $0xb8] sm:$0xff] }
  0x28   : > { %989 = vperm.xlu1 %6019, %v5409_v29   ;;  %v510_v47 = vld [vmem:[%s6243_s13 + $0x120] sm:$0xff]  ;;  %v511_v48 = vld [vmem:[%s6243_s13 + $0x128] sm:$0xff]  ;;  %v528_v51 = vld [vmem:[%s6243_s13 + $0x1b0] sm:$0xff]  ;;  %v5559_v54 = vpack.c.bf16 %v479_v46, %v478_v45  ;;  %v5562_v57 = vpack.c.bf16 %v497_v50, %v496_v49 }
  0x29   : > { %v529_v52 = vld [vmem:[%s6243_s13 + $0x1b8] sm:$0xff]  ;;  %v5607_v56 = vpack.c.bf16 %v511_v48, %v510_v47  ;;  %v480_v61 = vld [vmem:[%s6243_s13 + $0x30] sm:$0xff]  ;;  %v498_v1 = vld [vmem:[%s6243_s13 + $0xc0] sm:$0xff] }
  0x2a   : > { %v5610_v58 = vpack.c.bf16 %v529_v52, %v528_v51  ;;  %v481_v62 = vld [vmem:[%s6243_s13 + $0x38] sm:$0xff]  ;;  %v512_v63 = vld [vmem:[%s6243_s13 + $0x130] sm:$0xff]  ;;  %v499_v3 = vld [vmem:[%s6243_s13 + $0xc8] sm:$0xff] }
  0x2b   : > { %1026 = vperm.xlu0 %6018, %v5411_v39   ;;  %v513_v0 = vld [vmem:[%s6243_s13 + $0x138] sm:$0xff]  ;;  %v530_v4 = vld [vmem:[%s6243_s13 + $0x1c0] sm:$0xff]  ;;  %v531_v5 = vld [vmem:[%s6243_s13 + $0x1c8] sm:$0xff]  ;;  %v5565_v8 = vpack.c.bf16 %v481_v62, %v480_v61  ;;  %v5568_v11 = vpack.c.bf16 %v499_v3, %v498_v1 }
  0x2c   : > { %1224 = vperm.xlu1 %6019, %v1212_v43   ;;  %v1218_v6 = vld [vmem:[%s7950_s3 + $0x10] sm:$0xff]  ;;  %v1219_v9 = vld [vmem:[%s7950_s3 + $0x18] sm:$0xff]  ;;  %v5613_v10 = vpack.c.bf16 %v513_v0, %v512_v63  ;;  %v5616_v12 = vpack.c.bf16 %v531_v5, %v530_v4  ;;  %v1221_v13 = vld [vmem:[%s7952_s5] sm:$0xff] }
  0x2d   : > { %5555 = vmatpush3.bf16.xpose.msk.msra.mxu0 %vm6247_vm1, %v5553_v38  ;;  %v1512_v14 = vld [vmem:[%s7953_s6] sm:$0xff]  ;;  %v483_v16 = vld [vmem:[%s6243_s13 + $0x48] sm:$0xff]  ;;  %v500_v19 = vld [vmem:[%s6243_s13 + $0xd0] sm:$0xff] }
  0x2e   : > { %5603 = vmatpush3.bf16.xpose.msk.msra.mxu1 %vm6247_vm1, %v5601_v40  ;;  %5558 = vmatprep.subr.msk.bf16.mxu0 %vm6247_vm1, %v5556_v41  ;;  %v482_v15 = vld [vmem:[%s6243_s13 + $0x40] sm:$0xff]  ;;  %v515_v18 = vld [vmem:[%s6243_s13 + $0x148] sm:$0xff]  ;;  %v501_v20 = vld [vmem:[%s6243_s13 + $0xd8] sm:$0xff] }
  0x2f   : > { %5606 = vmatprep.subr.msk.bf16.mxu1 %vm6247_vm1, %v5604_v42  ;;  %1229 = vperm.xlu0 %6018, %v1213_v44   ;;  %v514_v17 = vld [vmem:[%s6243_s13 + $0x140] sm:$0xff]  ;;  %v532_v21 = vld [vmem:[%s6243_s13 + $0x1d0] sm:$0xff]  ;;  %v533_v22 = vld [vmem:[%s6243_s13 + $0x1d8] sm:$0xff]  ;;  %v5571_v24 = vpack.c.bf16 %v483_v16, %v482_v15  ;;  %v5574_v27 = vpack.c.bf16 %v501_v20, %v500_v19 }
  0x30   : > { %1276 = vperm.xlu1 %6019, %v1216_v53   ;;  %v1513_v23 = vld [vmem:[%s7953_s6 + $0x8] sm:$0xff]  ;;  %v1516_v25 = vld [vmem:[%s7954_s7] sm:$0xff]  ;;  %v5619_v26 = vpack.c.bf16 %v515_v18, %v514_v17  ;;  %v5622_v28 = vpack.c.bf16 %v533_v22, %v532_v21  ;;  %v1514_v30 = vld [vmem:[%s7953_s6 + $0x10] sm:$0xff]  ;;  %v7964_v21 = vmov 0.0   ;;  %v7963_v22 = vlaneseq }
  0x31   : > { %v1517_v29 = vld [vmem:[%s7954_s7 + $0x8] sm:$0xff]  ;;  %v484_v31 = vld [vmem:[%s6243_s13 + $0x50] sm:$0xff]  ;;  %v485_v32 = vld [vmem:[%s6243_s13 + $0x58] sm:$0xff] }
  0x32   : > { %v516_v33 = vld [vmem:[%s6243_s13 + $0x150] sm:$0xff]  ;;  %v517_v34 = vld [vmem:[%s6243_s13 + $0x158] sm:$0xff]  ;;  %v502_v35 = vld [vmem:[%s6243_s13 + $0xe0] sm:$0xff]  ;;  %v5577_v40 = vpack.c.bf16 %v485_v32, %v484_v31 }
  0x33   : > { %1281 = vperm.xlu0 %6018, %v1217_v55   ;;  %v503_v36 = vld [vmem:[%s6243_s13 + $0xe8] sm:$0xff]  ;;  %v534_v37 = vld [vmem:[%s6243_s13 + $0x1e0] sm:$0xff]  ;;  %v1515_v39 = vld [vmem:[%s7953_s6 + $0x18] sm:$0xff]  ;;  %v5625_v42 = vpack.c.bf16 %v517_v34, %v516_v33 }
  0x34   : > { %1234 = vperm.xlu1 %6019, %v1214_v59   ;;  %v535_v38 = vld [vmem:[%s6243_s13 + $0x1e8] sm:$0xff]  ;;  %v1518_v41 = vld [vmem:[%s7954_s7 + $0x10] sm:$0xff]  ;;  %v5580_v43 = vpack.c.bf16 %v503_v36, %v502_v35  ;;  %v1519_v45 = vld [vmem:[%s7954_s7 + $0x18] sm:$0xff] }
  0x35   : > { %5561 = vmatpush3.bf16.xpose.msk.msra.mxu0 %vm6247_vm1, %v5559_v54  ;;  %v5628_v44 = vpack.c.bf16 %v535_v38, %v534_v37  ;;  %v1521_v46 = vld [vmem:[%s7956_s9] sm:$0xff]  ;;  %v487_v48 = vld [vmem:[%s6243_s13 + $0x68] sm:$0xff]  ;;  %v504_v51 = vld [vmem:[%s6243_s13 + $0xf0] sm:$0xff] }
  0x36   : > { %5609 = vmatpush3.bf16.xpose.msk.msra.mxu1 %vm6247_vm1, %v5607_v56  ;;  %5564 = vmatprep.subr.msk.bf16.mxu0 %vm6247_vm1, %v5562_v57  ;;  %v486_v47 = vld [vmem:[%s6243_s13 + $0x60] sm:$0xff]  ;;  %v519_v50 = vld [vmem:[%s6243_s13 + $0x168] sm:$0xff]  ;;  %v505_v52 = vld [vmem:[%s6243_s13 + $0xf8] sm:$0xff] }
  0x37   : > { %5612 = vmatprep.subr.msk.bf16.mxu1 %vm6247_vm1, %v5610_v58  ;;  %1239 = vperm.xlu0 %6018, %v1215_v60   ;;  %v518_v49 = vld [vmem:[%s6243_s13 + $0x160] sm:$0xff]  ;;  %v536_v53 = vld [vmem:[%s6243_s13 + $0x1f0] sm:$0xff]  ;;  %v537_v54 = vld [vmem:[%s6243_s13 + $0x1f8] sm:$0xff]  ;;  %v5583_v56 = vpack.c.bf16 %v487_v48, %v486_v47  ;;  %v5586_v59 = vpack.c.bf16 %v505_v52, %v504_v51 }
  0x38   : > { %1286 = vperm.xlu1 %6019, %v1218_v6   ;;  %v5418_v55 = vld [vmem:[%s7953_s6 + $0x20] sm:$0xff]  ;;  %v5419_v57 = vld [vmem:[%s7953_s6 + $0x28] sm:$0xff]  ;;  %v5631_v58 = vpack.c.bf16 %v519_v50, %v518_v49  ;;  %v5634_v60 = vpack.c.bf16 %v537_v54, %v536_v53  ;;  %v488_v63 = vld [vmem:[%s6243_s13 + $0x70] sm:$0xff] }
  0x39   : > { %v5422_v61 = vld [vmem:[%s7954_s7 + $0x20] sm:$0xff]  ;;  %v5423_v62 = vld [vmem:[%s7954_s7 + $0x28] sm:$0xff]  ;;  %v489_v0 = vld [vmem:[%s6243_s13 + $0x78] sm:$0xff] }
  0x3a   : > { %v520_v1 = vld [vmem:[%s6243_s13 + $0x170] sm:$0xff]  ;;  %v521_v3 = vld [vmem:[%s6243_s13 + $0x178] sm:$0xff]  ;;  %v5589_v5 = vpack.c.bf16 %v489_v0, %v488_v63  ;;  %v5127_v16 = vld [vmem:[%s7959_s12] sm:$0xff]  ;;  %s463_s13 = scalar_lea.vmem [#allocation3], %s5329_s27  ;;  %s6028_s27 = sshll.u32 %s6091_s21, 4  ;;  %s6029_s27 = int_to_ptr.vmem [resolvable:$false] %s6028_s27 }
  0x3b   : > { %1291 = vperm.xlu0 %6018, %v1219_v9   ;;  %v5420_v4 = vld [vmem:[%s7953_s6 + $0x30] sm:$0xff]  ;;  %v5421_v6 = vld [vmem:[%s7953_s6 + $0x38] sm:$0xff]  ;;  %v5128_v17 = vld [vmem:[%s7959_s12 + $0x8] sm:$0xff]  ;;  %s5266_s28 = sshll.u32 %s463_s13, 4  ;;  %s6030_s0 = scalar_lea.vmem %s6029_s27, 128  ;;  %s7907_s28 = int_to_ptr.vmem [resolvable:$true] %s5266_s28 }
  0x3c   : > { %1328 = vperm.xlu1 %6019, %v1221_v13   ;;  %v5424_v9 = vld [vmem:[%s7954_s7 + $0x30] sm:$0xff]  ;;  %v472_v13 = vld [vmem:[%s7948_s1 + $0x8] sm:$0xff]  ;;  %v5130_v19 = vld [vmem:[%s7959_s12 + $0x18] sm:$0xff]  ;;  %s6024_s23 = scalar_lea.vmem %s7907_s28, 64  ;;  %p6031_p0 = scmp.lt.s32.totalorder %s7907_s28, %s6029_s27 }
  0x3d   : > { %5567 = vmatpush3.bf16.xpose.msk.msra.mxu0 %vm6247_vm1, %v5565_v8  ;;  %v5637_v8 = vpack.c.bf16 %v521_v3, %v520_v1  ;;  %v473_v15 = vld [vmem:[%s7948_s1 + $0x10] sm:$0xf]  ;;  %v5203_v20 = vld [vmem:[#allocation2] sm:$0x1]  ;;  %p6025_p11 = scmp.ne.s32.totalorder %s7907_s28, %s6024_s23  ;;  %p6032_p1 = scmp.lt.s32.totalorder %s6030_s0, %s6024_s23 }
  0x3e   : > { %5615 = vmatpush3.bf16.xpose.msk.msra.mxu1 %vm6247_vm1, %v5613_v10  ;;  %5570 = vmatprep.subr.msk.bf16.mxu0 %vm6247_vm1, %v5568_v11  ;;  %v5425_v10 = vld [vmem:[%s7954_s7 + $0x38] sm:$0xff]  ;;  %v5427_v11 = vld [vmem:[%s7956_s9 + $0x8] sm:$0xff]  ;;  %v5129_v18 = vld [vmem:[%s7959_s12 + $0x10] sm:$0xff] }
  0x3f   : > { %5618 = vmatprep.subr.msk.bf16.mxu1 %vm6247_vm1, %v5616_v12  ;;  %1524 = vperm.xlu0 %6018, %v1512_v14   ;;  %v4896_v12 = vld [vmem:[%s7958_s11] sm:$0xff]  ;;  %v4898_v14 = vld [vmem:[%s7958_s11 + $0x10] sm:$0xff]  ;;  %p6026_p12 = pnand %p6025_p11, %p6205_p5  ;;  %p6033_p2 = por %p6032_p1, %p6031_p0 }
  0x40   : > { %1529 = vperm.xlu1 %6019, %v1513_v23  }
  0x41   : > { %p6027_p13 = pneg %p6026_p12 }
  0x43   : > { %1576 = vperm.xlu0 %6018, %v1516_v25   ;;  %v6524_v25 = vshrl.u32 %v7963_v22, 7  ;;  %p6034_p3 = pnand %p6033_p2, %p6027_p13 }
  0x44   : > { %1581 = vperm.xlu1 %6019, %v1517_v29  }
  0x45   : > { %5573 = vmatpush3.bf16.xpose.msk.msra.mxu0 %vm6247_vm1, %v5571_v24  ;;  %8093 = vst [vmem:[#allocation10_spill] sm:$0xff] %v6524_v25 }
  0x46   : > { %5621 = vmatpush3.bf16.xpose.msk.msra.mxu1 %vm6247_vm1, %v5619_v26  ;;  %5576 = vmatprep.subr.msk.bf16.mxu0 %vm6247_vm1, %v5574_v27  ;;  %v6527_v26 = vsub.s32 2, %v6524_v25 }
  0x47   : > { %5624 = vmatprep.subr.msk.bf16.mxu1 %vm6247_vm1, %v5622_v28  ;;  %1534 = vperm.xlu0 %6018, %v1514_v30  }
  0x48   : > { %1539 = vperm.xlu1 %6019, %v1515_v39   ;;  %8094 = vst [vmem:[#allocation11_spill] sm:$0xff] %v6527_v26 }
  0x4b   : > { %1586 = vperm.xlu0 %6018, %v1518_v41  }
  0x4c   : > { %1591 = vperm.xlu1 %6019, %v1519_v45  }
  0x4d   : > { %5579 = vmatpush3.bf16.xpose.msk.msra.mxu0 %vm6247_vm1, %v5577_v40 }
  0x4e   : > { %5627 = vmatpush3.bf16.xpose.msk.msra.mxu1 %vm6247_vm1, %v5625_v42  ;;  %5582 = vmatprep.subr.msk.bf16.mxu0 %vm6247_vm1, %v5580_v43 }
  0x4f   : > { %5630 = vmatprep.subr.msk.bf16.mxu1 %vm6247_vm1, %v5628_v44  ;;  %1628 = vperm.xlu0 %6018, %v1521_v46  }
  0x50   : > { %1828 = vperm.xlu1 %6019, %v5418_v55  }
  0x53   : > { %1833 = vperm.xlu0 %6018, %v5419_v57  }
  0x54   : > { %1880 = vperm.xlu1 %6019, %v5422_v61  }
  0x55   : > { %5585 = vmatpush3.bf16.xpose.msk.msra.mxu0 %vm6247_vm1, %v5583_v56 }
  0x56   : > { %5633 = vmatpush3.bf16.xpose.msk.msra.mxu1 %vm6247_vm1, %v5631_v58  ;;  %5588 = vmatprep.subr.msk.bf16.mxu0 %vm6247_vm1, %v5586_v59 }
  0x57   : > { %5636 = vmatprep.subr.msk.bf16.mxu1 %vm6247_vm1, %v5634_v60  ;;  %1885 = vperm.xlu0 %6018, %v5423_v62  }
  0x58   : > { %1838 = vperm.xlu1 %6019, %v5420_v4  }
  0x5b   : > { %1843 = vperm.xlu0 %6018, %v5421_v6  }
  0x5c   : > { %1890 = vperm.xlu1 %6019, %v5424_v9  }
  0x5d   : > { %5591 = vmatpush3.bf16.xpose.msk.msra.mxu0 %vm6247_vm1, %v5589_v5 }
  0x5e   : > { %5639 = vmatpush3.bf16.xpose.msk.msra.mxu1 %vm6247_vm1, %v5637_v8 }
  0x5f   : > { %1895 = vperm.xlu0 %6018, %v5425_v10  }
  0x60   : > { %1932 = vperm.xlu1 %6019, %v5427_v11  }
  0x63   : > { %4902 = vperm.xlu0 %6018, %v4896_v12  }
  0x64   : > { %5501 = vmatmul.mubr.msk.f32.vlgmr.msra.gmra.mrb[0].mxu0 %vm538_vm0, %v6223_v2  ;;  %4907 = vperm.xlu1 %6019, %v4897_v7  }
  0x65   : > { %5539 = vmatmul.mubr.msk.f32.vlgmr.msra.gmra.mrb[0].mxu1 %vm538_vm0, %v6223_v2  ;;  %5502 = vmatprep.mubr.msk.f32.mxu0 %vm538_vm0, %v472_v13  ;;  %v4899_v2 = vld [vmem:[%s7958_s11 + $0x18] sm:$0xff] }
  0x66   : > { %5540 = vmatprep.mubr.msk.f32.mxu1 %vm538_vm0, %v472_v13 }
  0x67   : > { %4912 = vperm.xlu0 %6018, %v4898_v14  }
  0x68   : > { %5503 = vmatmul.mubr.msk.f32.gmra.mrb[2].mxu0 %vm538_vm0, %v472_v13  ;;  %4917 = vperm.xlu1 %6019, %v4899_v2  }
  0x69   : > { %5541 = vmatmul.mubr.msk.f32.gmra.mrb[2].mxu1 %vm538_vm0, %v472_v13  ;;  %5504 = vmatprep.mubr.msk.f32.mxu0 %vm538_vm0, %v473_v15 }
  0x6a   : > { %5542 = vmatprep.mubr.msk.f32.mxu1 %vm538_vm0, %v473_v15 }
  0x6b   : > { %5133 = vperm.xlu0 %6018, %v5127_v16  }
  0x6c   : > { %5505 = vmatmul.mubr.msk.f32.gmra.mrb[4].mxu0 %vm538_vm0, %v473_v15  ;;  %5138 = vperm.xlu1 %6019, %v5128_v17  }
  0x6d   : > { %5543 = vmatmul.mubr.msk.f32.gmra.mrb[4].mxu1 %vm538_vm0, %v473_v15  ;;  %1097 = vmatprep.mubr.f32.mxu0 %v7964_v21 }
  0x6e   : > { %1168 = vmatprep.mubr.f32.mxu1 %v7964_v21 }
  0x6f   : > { %5143 = vperm.xlu0 %6018, %v5129_v18  }
  0x70   : > { %5148 = vperm.xlu1 %6019, %v5130_v19  }
  0x73   : > { %5206 = vperm.xlu0 %6018, %v5203_v20  }
  0x9a   : > { %v6519_v23 = vpop.permute.xlu0 %922 }
  0x9b   : > { %8091 = vst [vmem:[#allocation8_spill] sm:$0xff] %v6519_v23  ;;  %v6521_v24 = vpop.permute.xlu1 %974 }
  0x9c   : > { %8092 = vst [vmem:[#allocation9_spill] sm:$0xff] %v6521_v24 }
  0x9e   : > { %v6529_v27 = vpop.permute.xlu0 %927 }
  0x9f   : > { %8095 = vst [vmem:[#allocation12_spill] sm:$0xff] %v6529_v27  ;;  %v6531_v28 = vpop.permute.xlu1 %979 }
  0xa0   : > { %8096 = vst [vmem:[#allocation13_spill] sm:$0xff] %v6531_v28 }
  0xa2   : > { %v6563_v48 = vpop.permute.xlu0 %932 }
  0xa3   : > { %v6567_v50 = vpop.permute.xlu1 %937 }
  0xa6   : > { %v6579_v8 = vpop.permute.xlu0 %984 }
  0xa7   : > { %v6583_v13 = vpop.permute.xlu1 %989 }
 0x13b   : > { %v6533_v29 = vpop.f32.mrb[2].mxu0 }
 0x13c   : > { %v943_v30 = vrot.slane %v6533_v29, %v6527_v26  ;;  %v6537_v31 = vpop.f32.mrb[2].mxu1  ;;  %v6539_v32 = vpop.f32.mrb[3].mxu0 }
 0x13d   : > { %8097 = vst [vmem:[#allocation14_spill] sm:$0xff] %v6537_v31  ;;  %v951_v33 = vrot.slane %v6537_v31, %v6527_v26  ;;  %v6543_v34 = vpop.f32.mrb[3].mxu1  ;;  %v947_v35 = vrot.slane %v6539_v32, %v6527_v26 }
 0x13e   : > { %8098 = vst [vmem:[#allocation15_spill] sm:$0xff] %v6543_v34  ;;  %v955_v36 = vrot.slane %v6543_v34, %v6527_v26  ;;  %v956_v40 = vmul.f32 %v943_v30, %v6519_v23  ;;  %v960_v41 = vmul.f32 %v943_v30, %v6529_v27  ;;  %v964_v53 = vmul.f32 %v943_v30, %v6563_v48 }
 0x13f   : > { %v6549_v37 = vpop.f32.mrb[4].mxu0  ;;  %v957_v38 = vmul.f32 %v947_v35, %v6519_v23  ;;  %v961_v39 = vmul.f32 %v947_v35, %v6529_v27  ;;  %v958_v46 = vmul.f32 %v951_v33, %v6519_v23  ;;  %v962_v47 = vmul.f32 %v951_v33, %v6529_v27 }
 0x140   : > { %8099 = vst [vmem:[#allocation16_spill] sm:$0xff] %v6549_v37  ;;  %v6555_v42 = vpop.f32.mrb[4].mxu1  ;;  %v6557_v43 = vpop.f32.mrb[5].mxu0  ;;  %v959_v44 = vmul.f32 %v955_v36, %v6519_v23  ;;  %v963_v45 = vmul.f32 %v955_v36, %v6529_v27  ;;  %v992_v56 = vadd.f32 %v6521_v24, %v956_v40  ;;  %v996_v57 = vadd.f32 %v6531_v28, %v960_v41 }
 0x141   : > { %8100 = vst [vmem:[#allocation17_spill] sm:$0xff] %v6555_v42  ;;  %8101 = vst [vmem:[#allocation18_spill] sm:$0xff] %v6557_v43  ;;  %v6565_v49 = vpop.f32.mrb[5].mxu1  ;;  %v993_v51 = vadd.f32 %v6521_v24, %v957_v38  ;;  %v997_v52 = vadd.f32 %v6531_v28, %v961_v39  ;;  %v994_v60 = vadd.f32 %v6521_v24, %v958_v46 }
 0x142   : > { %8102 = vst [vmem:[#allocation19_spill] sm:$0xff] %v6565_v49  ;;  %v995_v54 = vadd.f32 %v6521_v24, %v959_v44  ;;  %v999_v55 = vadd.f32 %v6531_v28, %v963_v45  ;;  %v998_v61 = vadd.f32 %v6531_v28, %v962_v47  ;;  %v1008_v0 = vmax.f32 %v992_v56, 0.0  ;;  %v6608_v56 = vpop.permute.xlu0 %1026 }
 0x143   : > { %v1009_v58 = vmax.f32 %v993_v51, 0.0  ;;  %v1013_v59 = vmax.f32 %v997_v52, 0.0  ;;  %v1012_v1 = vmax.f32 %v996_v57, 0.0  ;;  %v1010_v4 = vmax.f32 %v994_v60, 0.0 }
 0x144   : > { %v1011_v62 = vmax.f32 %v995_v54, 0.0  ;;  %v1015_v63 = vmax.f32 %v999_v55, 0.0  ;;  %v1014_v5 = vmax.f32 %v998_v61, 0.0  ;;  %v965_v6 = vmul.f32 %v947_v35, %v6563_v48  ;;  %v6600_v55 = vld [vmem:[%s7951_s4 + $0x8] sm:$0xff] }
 0x145   : > { %v5640_v3 = vpack.c.bf16 %v1013_v59, %v1009_v58  ;;  %v5642_v10 = vpack.c.bf16 %v1012_v1, %v1008_v0  ;;  %v969_v11 = vmul.f32 %v947_v35, %v6567_v50  ;;  %v967_v12 = vmul.f32 %v955_v36, %v6563_v48 }
 0x146   : > { %v5648_v9 = vpack.c.bf16 %v1015_v63, %v1011_v62  ;;  %v5650_v7 = vpack.c.bf16 %v1014_v5, %v1010_v4  ;;  %v1001_v14 = vadd.f32 %v6579_v8, %v965_v6  ;;  %v971_v15 = vmul.f32 %v955_v36, %v6567_v50 }
 0x147   : > { %5641 = vmatprep.subr.bf16.mxu0 %v5640_v3  ;;  %v968_v2 = vmul.f32 %v943_v30, %v6567_v50  ;;  %v1005_v16 = vadd.f32 %v6583_v13, %v969_v11  ;;  %v1003_v17 = vadd.f32 %v6579_v8, %v967_v12  ;;  %v1000_v18 = vadd.f32 %v6579_v8, %v964_v53  ;;  %v6628_v11 = vpop.permute.xlu1 %1224 }
 0x148   : > { %5649 = vmatprep.subr.bf16.mxu1 %v5648_v9  ;;  %5643 = vmatpush1.bf16.msra.mxu0 %v5642_v10  ;;  %v1017_v19 = vmax.f32 %v1001_v14, 0.0  ;;  %v1007_v20 = vadd.f32 %v6583_v13, %v971_v15  ;;  %v966_v38 = vmul.f32 %v951_v33, %v6563_v48  ;;  %v970_v30 = vmul.f32 %v951_v33, %v6567_v50  ;;  %v6631_v14 = vpop.permute.xlu0 %1229 }
 0x149   : > { %5651 = vmatpush1.bf16.msra.mxu1 %v5650_v7  ;;  %v1004_v35 = vadd.f32 %v6583_v13, %v968_v2  ;;  %v1021_v39 = vmax.f32 %v1005_v16, 0.0  ;;  %v1019_v36 = vmax.f32 %v1003_v17, 0.0  ;;  %v1016_v40 = vmax.f32 %v1000_v18, 0.0  ;;  %8103 = vst [vmem:[#allocation20_spill] sm:$0xff] %v6628_v11  ;;  %8104 = vst [vmem:[#allocation21_spill] sm:$0xff] %v6631_v14 }
 0x14a   : > { %v1023_v41 = vmax.f32 %v1007_v20, 0.0  ;;  %v1002_v45 = vadd.f32 %v6579_v8, %v966_v38  ;;  %v1006_v47 = vadd.f32 %v6583_v13, %v970_v30 }
 0x14b   : > { %v1020_v44 = vmax.f32 %v1004_v35, 0.0  ;;  %v5644_v46 = vpack.c.bf16 %v1021_v39, %v1017_v19 }
 0x14c   : > { %v5652_v51 = vpack.c.bf16 %v1023_v41, %v1019_v36  ;;  %v1018_v53 = vmax.f32 %v1002_v45, 0.0  ;;  %v1022_v54 = vmax.f32 %v1006_v47, 0.0  ;;  %v6634_v36 = vpop.permute.xlu1 %1276  ;;  %v6636_v41 = vpop.permute.xlu0 %1281  ;;  %v6639_v45 = vsub.s32 1, %v6524_v25 }
 0x14d   : > { %v5646_v52 = vpack.c.bf16 %v1020_v44, %v1016_v40  ;;  %5645 = vmatprep.subr.bf16.mxu0 %v5644_v46  ;;  %8105 = vst [vmem:[#allocation22_spill] sm:$0xff] %v6634_v36  ;;  %8106 = vst [vmem:[#allocation23_spill] sm:$0xff] %v6636_v41 }
 0x14e   : > { %5653 = vmatprep.subr.bf16.mxu1 %v5652_v51  ;;  %v5654_v33 = vpack.c.bf16 %v1022_v54, %v1018_v53  ;;  %8107 = vst [vmem:[#allocation24_spill] sm:$0xff] %v6639_v45 }
 0x14f   : > { %5647 = vmatpush1.bf16.msra.mxu0 %v5646_v52 }
 0x150   : > { %5655 = vmatpush1.bf16.msra.mxu1 %v5654_v33 }
 0x152   : > { %5412 = vmatmul.mubr.msk.f32.vlgmr.msra.gmra.mrb[6].mxu0 %vm1029_vm2, %v6600_v55 }
 0x153   : > { %1398 = vmatprep.mubr.f32.mxu0 %v7964_v21  ;;  %5413 = vmatmul.mubr.msk.f32.vlgmr.msra.gmra.mrb[6].mxu1 %vm1029_vm2, %v6600_v55 }
 0x154   : > { %1469 = vmatprep.mubr.f32.mxu1 %v7964_v21 }
 0x225   : > { %v1099_v57 = vpop.f32.mrb[6].mxu0 }
 0x226   : > { %v6611_v58 = vadd.f32 %v1099_v57, %v6608_v56  ;;  %v1101_v59 = vpop.f32.mrb[7].mxu0  ;;  %v1170_v62 = vpop.f32.mrb[6].mxu1 }
 0x227   : > { %v6614_v60 = vadd.f32 %v1101_v59, %v6608_v56  ;;  %v6618_v63 = vadd.f32 %v1170_v62, %v6608_v56  ;;  %v1172_v1 = vpop.f32.mrb[7].mxu1 }
 0x228   : > { %v1179_v61 = vrot.slane %v6611_v58, 4  ;;  %v6623_v4 = vadd.f32 %v1172_v1, %v6608_v56  ;;  %v6656_v1 = vpop.permute.xlu0 %1239 }
 0x229   : > { %v1185_v0 = vrot.slane %v6614_v60, 4  ;;  %v1191_v5 = vrot.slane %v6618_v63, 4  ;;  %8109 = vst [vmem:[#allocation26_spill] sm:$0xff] %v6656_v1 }
 0x22a   : > { %v1180_v3 = vadd.f32 %v1179_v61, %v6611_v58  ;;  %v1197_v10 = vrot.slane %v6623_v4, 4  ;;  %v6649_v61 = vpop.permute.xlu1 %1234 }
 0x22b   : > { %v1186_v6 = vadd.f32 %v1185_v0, %v6614_v60  ;;  %v1192_v12 = vadd.f32 %v1191_v5, %v6618_v63  ;;  %8108 = vst [vmem:[#allocation25_spill] sm:$0xff] %v6649_v61 }
 0x22c   : > { %v1181_v9 = vrot.slane %v1180_v3, 2  ;;  %v1198_v2 = vadd.f32 %v1197_v10, %v6623_v4 }
 0x22d   : > { %v1187_v7 = vrot.slane %v1186_v6, 2  ;;  %v1193_v16 = vrot.slane %v1192_v12, 2 }
 0x22e   : > { %v1182_v15 = vadd.f32 %v1181_v9, %v1180_v3  ;;  %v1199_v19 = vrot.slane %v1198_v2, 2 }
 0x22f   : > { %v1188_v17 = vadd.f32 %v1187_v7, %v1186_v6  ;;  %v1194_v20 = vadd.f32 %v1193_v16, %v1192_v12 }
 0x230   : > { %v1183_v18 = vrot.slane %v1182_v15, 1  ;;  %v1200_v39 = vadd.f32 %v1199_v19, %v1198_v2 }
 0x231   : > { %v1189_v35 = vrot.slane %v1188_v17, 1  ;;  %v1195_v40 = vrot.slane %v1194_v20, 1 }
 0x232   : > { %v1184_v38 = vadd.f32 %v1183_v18, %v1182_v15  ;;  %v1201_v46 = vrot.slane %v1200_v39, 1 }
 0x233   : > { %v1190_v30 = vadd.f32 %v1189_v35, %v1188_v17  ;;  %v1196_v47 = vadd.f32 %v1195_v40, %v1194_v20 }
 0x234   : > { %v1204_v44 = vmul.f32 0.125, %v1184_v38  ;;  %v1202_v53 = vadd.f32 %v1201_v46, %v1200_v39  ;;  %v6680_v46 = vpop.permute.xlu1 %1286 }
 0x235   : > { %v1205_v51 = vmul.f32 0.125, %v1190_v30  ;;  %v1206_v54 = vmul.f32 0.125, %v1196_v47  ;;  %8110 = vst [vmem:[#allocation27_spill] sm:$0xff] %v6680_v46 }
 0x236   : > { %v6642_v52 = vadd.f32 %v1204_v44, %v6533_v29  ;;  %v1207_v59 = vmul.f32 0.125, %v1202_v53 }
 0x237   : > { %v6645_v33 = vadd.f32 %v1205_v51, %v6539_v32  ;;  %v6652_v62 = vadd.f32 %v1206_v54, %v6537_v31 }
 0x238   : > { %v1245_v57 = vrot.slane %v6642_v52, %v6639_v45  ;;  %v6659_v3 = vadd.f32 %v1207_v59, %v6543_v34  ;;  %v6684_v59 = vpop.permute.xlu0 %1291 }
 0x239   : > { %v1249_v0 = vrot.slane %v6645_v33, %v6639_v45  ;;  %v1253_v10 = vrot.slane %v6652_v62, %v6639_v45  ;;  %8111 = vst [vmem:[#allocation28_spill] sm:$0xff] %v6684_v59 }
 0x23a   : > { %v1258_v5 = vmul.f32 %v1245_v57, %v6628_v11  ;;  %v1262_v6 = vmul.f32 %v1245_v57, %v6631_v14  ;;  %v1266_v9 = vmul.f32 %v1245_v57, %v6649_v61  ;;  %v1257_v2 = vrot.slane %v6659_v3, %v6639_v45 }
 0x23b   : > { %v1259_v12 = vmul.f32 %v1249_v0, %v6628_v11  ;;  %v1263_v7 = vmul.f32 %v1249_v0, %v6631_v14  ;;  %v1267_v15 = vmul.f32 %v1249_v0, %v6649_v61  ;;  %v1271_v18 = vmul.f32 %v1249_v0, %v6656_v1 }
 0x23c   : > { %v1294_v16 = vadd.f32 %v6634_v36, %v1258_v5  ;;  %v1298_v17 = vadd.f32 %v6636_v41, %v1262_v6  ;;  %v1260_v35 = vmul.f32 %v1253_v10, %v6628_v11  ;;  %v1264_v38 = vmul.f32 %v1253_v10, %v6631_v14 }
 0x23d   : > { %v1295_v19 = vadd.f32 %v6634_v36, %v1259_v12  ;;  %v1299_v20 = vadd.f32 %v6636_v41, %v1263_v7  ;;  %v1261_v39 = vmul.f32 %v1257_v2, %v6628_v11  ;;  %v1265_v40 = vmul.f32 %v1257_v2, %v6631_v14 }
 0x23e   : > { %v1310_v30 = vmax.f32 %v1294_v16, 0.0  ;;  %v1314_v44 = vmax.f32 %v1298_v17, 0.0  ;;  %v1296_v53 = vadd.f32 %v6634_v36, %v1260_v35  ;;  %v1300_v54 = vadd.f32 %v6636_v41, %v1264_v38 }
 0x23f   : > { %v1311_v47 = vmax.f32 %v1295_v19, 0.0  ;;  %v1315_v51 = vmax.f32 %v1299_v20, 0.0  ;;  %v1297_v0 = vadd.f32 %v6634_v36, %v1261_v39  ;;  %v1301_v5 = vadd.f32 %v6636_v41, %v1265_v40 }
 0x240   : > { %v5658_v6 = vpack.c.bf16 %v1314_v44, %v1310_v30  ;;  %v1303_v12 = vadd.f32 %v6680_v46, %v1267_v15  ;;  %v1312_v16 = vmax.f32 %v1296_v53, 0.0  ;;  %v1316_v17 = vmax.f32 %v1300_v54, 0.0 }
 0x241   : > { %v5656_v7 = vpack.c.bf16 %v1315_v51, %v1311_v47  ;;  %v1307_v22 = vadd.f32 %v6684_v59, %v1271_v18  ;;  %v1313_v19 = vmax.f32 %v1297_v0, 0.0  ;;  %v1317_v20 = vmax.f32 %v1301_v5, 0.0 }
 0x242   : > { %v1319_v21 = vmax.f32 %v1303_v12, 0.0  ;;  %v1269_v35 = vmul.f32 %v1257_v2, %v6649_v61  ;;  %v5666_v38 = vpack.c.bf16 %v1316_v17, %v1312_v16  ;;  %v1273_v39 = vmul.f32 %v1257_v2, %v6656_v1  ;;  %v6712_v17 = vpop.permute.xlu1 %1328 }
 0x243   : > { %5657 = vmatprep.subr.bf16.mxu0 %v5656_v7  ;;  %v1323_v26 = vmax.f32 %v1307_v22, 0.0  ;;  %v1270_v40 = vmul.f32 %v1245_v57, %v6656_v1  ;;  %v5664_v30 = vpack.c.bf16 %v1317_v20, %v1313_v19  ;;  %v1302_v44 = vadd.f32 %v6680_v46, %v1266_v9  ;;  %8114 = vst [vmem:[#allocation30_spill] sm:$0xff] %v6712_v17 }
 0x244   : > { %5659 = vmatpush1.bf16.msra.mxu0 %v5658_v6  ;;  %v1305_v15 = vadd.f32 %v6680_v46, %v1269_v35  ;;  %v1268_v18 = vmul.f32 %v1253_v10, %v6649_v61  ;;  %v1309_v51 = vadd.f32 %v6684_v59, %v1273_v39  ;;  %v1272_v54 = vmul.f32 %v1253_v10, %v6656_v1  ;;  %v6704_v10 = vld [vmem:[%s7951_s4] sm:$0xff] }
 0x245   : > { %v5660_v47 = vpack.c.bf16 %v1323_v26, %v1319_v21  ;;  %v1306_v53 = vadd.f32 %v6684_v59, %v1270_v40  ;;  %5665 = vmatprep.subr.bf16.mxu1 %v5664_v30  ;;  %v1318_v2 = vmax.f32 %v1302_v44, 0.0  ;;  %8112 = vst [vmem:[#allocation29_spill] sm:$0xff] %v6704_v10  ;;  %v8113_v16 = vmov 0.0  }
 0x246   : > { %v1321_v22 = vmax.f32 %v1305_v15, 0.0  ;;  %v1304_v57 = vadd.f32 %v6680_v46, %v1268_v18  ;;  %5667 = vmatpush1.bf16.msra.mxu1 %v5666_v38  ;;  %v1325_v0 = vmax.f32 %v1309_v51, 0.0  ;;  %v1308_v9 = vadd.f32 %v6684_v59, %v1272_v54 }
 0x247   : > { %5661 = vmatprep.subr.bf16.mxu0 %v5660_v47  ;;  %v1322_v5 = vmax.f32 %v1306_v53, 0.0 }
 0x248   : > { %v1320_v6 = vmax.f32 %v1304_v57, 0.0  ;;  %v5668_v12 = vpack.c.bf16 %v1325_v0, %v1321_v22  ;;  %v1324_v26 = vmax.f32 %v1308_v9, 0.0  ;;  %v6733_v57 = vpop.permute.xlu0 %1524 }
 0x249   : > { %v5662_v21 = vpack.c.bf16 %v1322_v5, %v1318_v2  ;;  %8115 = vst [vmem:[#allocation31_spill] sm:$0xff] %v6733_v57 }
 0x24a   : > { %5669 = vmatprep.subr.bf16.mxu1 %v5668_v12  ;;  %v5670_v7 = vpack.c.bf16 %v1324_v26, %v1320_v6  ;;  %v6736_v12 = vpop.permute.xlu1 %1529 }
 0x24b   : > { %5663 = vmatpush1.bf16.msra.mxu0 %v5662_v21  ;;  %8116 = vst [vmem:[#allocation32_spill] sm:$0xff] %v6736_v12 }
 0x24c   : > { %5671 = vmatpush1.bf16.msra.mxu1 %v5670_v7 }
 0x24e   : > { %5414 = vmatmul.mubr.msk.f32.vlgmr.msra.gmra.mrb[8].mxu0 %vm1029_vm2, %v6704_v10  ;;  %v6740_v43 = vpop.permute.xlu1 %1581 }
 0x24f   : > { %1698 = vmatprep.mubr.f32.mxu0 %v8113_v16  ;;  %5415 = vmatmul.mubr.msk.f32.vlgmr.msra.gmra.mrb[8].mxu1 %vm1029_vm2, %v6704_v10  ;;  %8118 = vst [vmem:[#allocation34_spill] sm:$0xff] %v6740_v43 }
 0x250   : > { %1769 = vmatprep.mubr.f32.mxu1 %v8113_v16 }
 0x321   : > { %v1400_v19 = vpop.f32.mrb[8].mxu0 }
 0x322   : > { %v6715_v20 = vadd.f32 %v1400_v19, %v6712_v17  ;;  %v1402_v35 = vpop.f32.mrb[9].mxu0  ;;  %v1471_v38 = vpop.f32.mrb[8].mxu1 }
 0x323   : > { %v6718_v39 = vadd.f32 %v1402_v35, %v6712_v17  ;;  %v6722_v30 = vadd.f32 %v1471_v38, %v6712_v17  ;;  %v1473_v15 = vpop.f32.mrb[9].mxu1 }
 0x324   : > { %v1480_v40 = vrot.slane %v6715_v20, 4  ;;  %v6726_v18 = vadd.f32 %v1473_v15, %v6712_v17 }
 0x325   : > { %v1486_v44 = vrot.slane %v6718_v39, 4  ;;  %v1492_v51 = vrot.slane %v6722_v30, 4 }
 0x326   : > { %v1481_v47 = vadd.f32 %v1480_v40, %v6715_v20  ;;  %v1498_v54 = vrot.slane %v6726_v18, 4 }
 0x327   : > { %v1487_v53 = vadd.f32 %v1486_v44, %v6718_v39  ;;  %v1493_v2 = vadd.f32 %v1492_v51, %v6722_v30  ;;  %v6738_v44 = vpop.permute.xlu0 %1576 }
 0x328   : > { %v1482_v22 = vrot.slane %v1481_v47, 2  ;;  %v1499_v5 = vadd.f32 %v1498_v54, %v6726_v18  ;;  %8117 = vst [vmem:[#allocation33_spill] sm:$0xff] %v6738_v44 }
 0x329   : > { %v1488_v0 = vrot.slane %v1487_v53, 2  ;;  %v1494_v6 = vrot.slane %v1493_v2, 2 }
 0x32a   : > { %v1483_v9 = vadd.f32 %v1482_v22, %v1481_v47  ;;  %v1500_v26 = vrot.slane %v1499_v5, 2  ;;  %v6743_v22 = vsub.s32 0, %v6524_v25 }
 0x32b   : > { %v1489_v21 = vadd.f32 %v1488_v0, %v1487_v53  ;;  %v1495_v19 = vadd.f32 %v1494_v6, %v1493_v2 }
 0x32c   : > { %v1484_v7 = vrot.slane %v1483_v9, 1  ;;  %v1501_v38 = vadd.f32 %v1500_v26, %v1499_v5  ;;  %8119 = vst [vmem:[#allocation35_spill] sm:$0xff] %v6743_v22 }
 0x32d   : > { %v1490_v35 = vrot.slane %v1489_v21, 1  ;;  %v1496_v15 = vrot.slane %v1495_v19, 1 }
 0x32e   : > { %v1485_v40 = vadd.f32 %v1484_v7, %v1483_v9  ;;  %v1502_v42 = vrot.slane %v1501_v38, 1 }
 0x32f   : > { %v1491_v51 = vadd.f32 %v1490_v35, %v1489_v21  ;;  %v1497_v49 = vadd.f32 %v1496_v15, %v1495_v19  ;;  %v6749_v21 = vpop.permute.xlu0 %1534  ;;  %v6757_v35 = vpop.permute.xlu1 %1539 }
 0x330   : > { %v1504_v37 = vmul.f32 0.125, %v1485_v40  ;;  %v1503_v54 = vadd.f32 %v1502_v42, %v1501_v38  ;;  %8120 = vst [vmem:[#allocation36_spill] sm:$0xff] %v6749_v21  ;;  %8121 = vst [vmem:[#allocation37_spill] sm:$0xff] %v6757_v35 }
 0x331   : > { %v1505_v47 = vmul.f32 0.125, %v1491_v51  ;;  %v1506_v2 = vmul.f32 0.125, %v1497_v49 }
 0x332   : > { %v1508_v53 = vadd.f32 %v1504_v37, %v6533_v29  ;;  %v1507_v5 = vmul.f32 0.125, %v1503_v54 }
 0x333   : > { %v1509_v0 = vadd.f32 %v1505_v47, %v6539_v32  ;;  %v1510_v6 = vadd.f32 %v1506_v2, %v6537_v31  ;;  %v6775_v41 = vpop.permute.xlu0 %1586 }
 0x334   : > { %v1545_v9 = vrot.slane %v1508_v53, %v6743_v22  ;;  %v1511_v7 = vadd.f32 %v1507_v5, %v6543_v34  ;;  %8122 = vst [vmem:[#allocation38_spill] sm:$0xff] %v6775_v41 }
 0x335   : > { %v1549_v26 = vrot.slane %v1509_v0, %v6743_v22  ;;  %v1553_v42 = vrot.slane %v1510_v6, %v6743_v22 }
 0x336   : > { %v1558_v19 = vmul.f32 %v1545_v9, %v6733_v57  ;;  %v1562_v37 = vmul.f32 %v1545_v9, %v6736_v12  ;;  %v1566_v49 = vmul.f32 %v1545_v9, %v6749_v21  ;;  %v1557_v38 = vrot.slane %v1511_v7, %v6743_v22 }
 0x337   : > { %v1559_v40 = vmul.f32 %v1549_v26, %v6733_v57  ;;  %v1563_v15 = vmul.f32 %v1549_v26, %v6736_v12  ;;  %v1567_v51 = vmul.f32 %v1549_v26, %v6749_v21  ;;  %v1560_v53 = vmul.f32 %v1553_v42, %v6733_v57 }
 0x338   : > { %v1594_v47 = vadd.f32 %v6738_v44, %v1558_v19  ;;  %v1598_v54 = vadd.f32 %v6740_v43, %v1562_v37  ;;  %v1564_v2 = vmul.f32 %v1553_v42, %v6736_v12  ;;  %v1561_v6 = vmul.f32 %v1557_v38, %v6733_v57 }
 0x339   : > { %v1595_v0 = vadd.f32 %v6738_v44, %v1559_v40  ;;  %v1599_v5 = vadd.f32 %v6740_v43, %v1563_v15  ;;  %v1565_v7 = vmul.f32 %v1557_v38, %v6736_v12  ;;  %v1596_v10 = vadd.f32 %v6738_v44, %v1560_v53  ;;  %v6778_v12 = vpop.permute.xlu1 %1591 }
 0x33a   : > { %v1610_v22 = vmax.f32 %v1594_v47, 0.0  ;;  %v1614_v17 = vmax.f32 %v1598_v54, 0.0  ;;  %v1600_v19 = vadd.f32 %v6740_v43, %v1564_v2  ;;  %v1597_v46 = vadd.f32 %v6738_v44, %v1561_v6  ;;  %8123 = vst [vmem:[#allocation39_spill] sm:$0xff] %v6778_v12 }
 0x33b   : > { %v1611_v59 = vmax.f32 %v1595_v0, 0.0  ;;  %v1615_v37 = vmax.f32 %v1599_v5, 0.0  ;;  %v1601_v1 = vadd.f32 %v6740_v43, %v1565_v7  ;;  %v1612_v15 = vmax.f32 %v1596_v10, 0.0 }
 0x33c   : > { %v5674_v40 = vpack.c.bf16 %v1614_v17, %v1610_v22  ;;  %v1616_v36 = vmax.f32 %v1600_v19, 0.0  ;;  %v1571_v57 = vmul.f32 %v1549_v26, %v6757_v35  ;;  %v1613_v54 = vmax.f32 %v1597_v46, 0.0 }
 0x33d   : > { %v5672_v47 = vpack.c.bf16 %v1615_v37, %v1611_v59  ;;  %v1617_v53 = vmax.f32 %v1601_v1, 0.0  ;;  %v1603_v2 = vadd.f32 %v6775_v41, %v1567_v51  ;;  %v1569_v6 = vmul.f32 %v1557_v38, %v6749_v21 }
 0x33e   : > { %v5682_v0 = vpack.c.bf16 %v1616_v36, %v1612_v15  ;;  %v1607_v5 = vadd.f32 %v6778_v12, %v1571_v57  ;;  %v1573_v7 = vmul.f32 %v1557_v38, %v6757_v35  ;;  %v1570_v22 = vmul.f32 %v1545_v9, %v6757_v35 }
 0x33f   : > { %5673 = vmatprep.subr.bf16.mxu0 %v5672_v47  ;;  %v5680_v17 = vpack.c.bf16 %v1617_v53, %v1613_v54  ;;  %v1619_v10 = vmax.f32 %v1603_v2, 0.0  ;;  %v1602_v26 = vadd.f32 %v6775_v41, %v1566_v49  ;;  %v1605_v1 = vadd.f32 %v6775_v41, %v1569_v6 }
 0x340   : > { %5675 = vmatpush1.bf16.msra.mxu0 %v5674_v40  ;;  %v1623_v59 = vmax.f32 %v1607_v5, 0.0  ;;  %v1609_v46 = vadd.f32 %v6778_v12, %v1573_v7  ;;  %v1568_v36 = vmul.f32 %v1553_v42, %v6749_v21  ;;  %v1606_v57 = vadd.f32 %v6778_v12, %v1570_v22  ;;  %v6808_v7 = vpop.permute.xlu0 %1628 }
 0x341   : > { %5681 = vmatprep.subr.bf16.mxu1 %v5680_v17  ;;  %v1618_v51 = vmax.f32 %v1602_v26, 0.0  ;;  %v1572_v38 = vmul.f32 %v1553_v42, %v6757_v35  ;;  %v1621_v37 = vmax.f32 %v1605_v1, 0.0  ;;  %v6796_v42 = vld [vmem:[%s7955_s8] sm:$0xff]  ;;  %8125 = vst [vmem:[#allocation41_spill] sm:$0xff] %v6808_v7  ;;  %v5912_v1 = vadd.f32 %v6718_v39, %v6614_v60 }
 0x342   : > { %5683 = vmatpush1.bf16.msra.mxu1 %v5682_v0  ;;  %v5676_v19 = vpack.c.bf16 %v1623_v59, %v1619_v10  ;;  %v1625_v9 = vmax.f32 %v1609_v46, 0.0  ;;  %v1604_v49 = vadd.f32 %v6775_v41, %v1568_v36  ;;  %v1622_v40 = vmax.f32 %v1606_v57, 0.0  ;;  %8124 = vst [vmem:[#allocation40_spill] sm:$0xff] %v6796_v42 }
 0x343   : > { %v1608_v15 = vadd.f32 %v6778_v12, %v1572_v38  ;;  %v2086_v0 = vsub.s32 5, %v6524_v25  ;;  %v5896_v10 = vadd.f32 %v6715_v20, %v6611_v58  ;;  %v5928_v58 = vadd.f32 %v6722_v30, %v6618_v63 }
 0x344   : > { %5677 = vmatprep.subr.bf16.mxu0 %v5676_v19  ;;  %v5684_v47 = vpack.c.bf16 %v1625_v9, %v1621_v37  ;;  %v1620_v54 = vmax.f32 %v1604_v49, 0.0  ;;  %v5678_v53 = vpack.c.bf16 %v1622_v40, %v1618_v51  ;;  %v5944_v60 = vadd.f32 %v6726_v18, %v6623_v4 }
 0x345   : > { %v1624_v2 = vmax.f32 %v1608_v15, 0.0  ;;  %v6806_v6 = vrot.slane %v6539_v32, %v2086_v0  ;;  %v6821_v51 = vrot.slane %v6543_v34, %v2086_v0  ;;  %v6834_v40 = vrot.slane %v6533_v29, %v2086_v0 }
 0x346   : > { %5685 = vmatprep.subr.bf16.mxu1 %v5684_v47  ;;  %5679 = vmatpush1.bf16.msra.mxu0 %v5678_v53  ;;  %v6844_v4 = vrot.slane %v6537_v31, %v2086_v0 }
 0x347   : > { %v5686_v5 = vpack.c.bf16 %v1624_v2, %v1620_v54  ;;  %v2101_v59 = vmul.f32 %v6806_v6, %v6519_v23  ;;  %v2105_v57 = vmul.f32 %v6806_v6, %v6529_v27  ;;  %v2100_v0 = vmul.f32 %v6834_v40, %v6519_v23 }
 0x349   : > { %5687 = vmatpush1.bf16.msra.mxu1 %v5686_v5  ;;  %5416 = vmatmul.mubr.msk.f32.vlgmr.msra.gmra.mrb[10].mxu0 %vm1029_vm2, %v6796_v42  ;;  %v6841_v2 = vadd.f32 %v2101_v59, %v6521_v24 }
 0x34a   : > { %2002 = vmatprep.mubr.f32.mxu0 %v8113_v16 }
 0x34c   : > { %5417 = vmatmul.mubr.msk.f32.vlgmr.msra.gmra.mrb[10].mxu1 %vm1029_vm2, %v6796_v42 }
 0x34d   : > { %2073 = vmatprep.mubr.f32.mxu1 %v8113_v16 }
 0x41c   : > { %v1700_v17 = vpop.f32.mrb[10].mxu0 }
 0x41d   : > { %v1701_v22 = vadd.f32 %v1700_v17, %v6808_v7  ;;  %v1702_v26 = vpop.f32.mrb[11].mxu0  ;;  %v2103_v17 = vmul.f32 %v6821_v51, %v6519_v23 }
 0x41e   : > { %v1703_v36 = vadd.f32 %v1702_v26, %v6808_v7 }
 0x41f   : > { %v1771_v46 = vpop.f32.mrb[10].mxu1  ;;  %v1780_v20 = vrot.slane %v1701_v22, 4  ;;  %v6825_v38 = vadd.f32 %v5896_v10, %v1701_v22  ;;  %v6848_v10 = vpop.permute.xlu1 %1828 }
 0x420   : > { %v1772_v19 = vadd.f32 %v1771_v46, %v6808_v7  ;;  %v1773_v37 = vpop.f32.mrb[11].mxu1  ;;  %v1786_v39 = vrot.slane %v1703_v36, 4  ;;  %v6830_v9 = vadd.f32 %v5912_v1, %v1703_v36  ;;  %8126 = vst [vmem:[#allocation42_spill] sm:$0xff] %v6848_v10  ;;  %v6851_v1 = vadd.f32 %v2105_v57, %v6531_v28 }
 0x421   : > { %v1774_v49 = vadd.f32 %v1773_v37, %v6808_v7  ;;  %v1781_v15 = vadd.f32 %v1780_v20, %v1701_v22  ;;  %v2107_v46 = vmul.f32 %v6821_v51, %v6529_v27  ;;  %v6859_v20 = vpop.permute.xlu0 %1833 }
 0x422   : > { %v1792_v47 = vrot.slane %v1772_v19, 4  ;;  %v6836_v63 = vadd.f32 %v5928_v58, %v1772_v19  ;;  %v1787_v30 = vadd.f32 %v1786_v39, %v1703_v36  ;;  %v2104_v58 = vmul.f32 %v6834_v40, %v6529_v27  ;;  %8127 = vst [vmem:[#allocation43_spill] sm:$0xff] %v6859_v20 }
 0x423   : > { %v1798_v54 = vrot.slane %v1774_v49, 4  ;;  %v6838_v53 = vadd.f32 %v5944_v60, %v1774_v49  ;;  %v1782_v18 = vrot.slane %v1781_v15, 2  ;;  %v6869_v7 = vadd.f32 %v2107_v46, %v6531_v28 }
 0x424   : > { %v1793_v5 = vadd.f32 %v1792_v47, %v1772_v19  ;;  %v1788_v22 = vrot.slane %v1787_v30, 2 }
 0x425   : > { %v1799_v26 = vadd.f32 %v1798_v54, %v1774_v49  ;;  %v1783_v59 = vadd.f32 %v1782_v18, %v1781_v15  ;;  %v6863_v49 = vadd.f32 %v2103_v17, %v6521_v24  ;;  %v2102_v15 = vmul.f32 %v6844_v4, %v6519_v23  ;;  %v6877_v17 = vpop.permute.xlu1 %1880 }
 0x426   : > { %v1794_v36 = vrot.slane %v1793_v5, 2  ;;  %v1789_v19 = vadd.f32 %v1788_v22, %v1787_v30  ;;  %v6872_v22 = vadd.f32 %v2100_v0, %v6521_v24 }
 0x427   : > { %v1800_v37 = vrot.slane %v1799_v26, 2  ;;  %v1784_v39 = vrot.slane %v1783_v59, 1  ;;  %v6885_v0 = vadd.f32 %v2102_v15, %v6521_v24 }
 0x428   : > { %v1795_v57 = vadd.f32 %v1794_v36, %v1793_v5  ;;  %v1790_v47 = vrot.slane %v1789_v19, 1  ;;  %v6875_v5 = vadd.f32 %v2104_v58, %v6531_v28 }
 0x429   : > { %v1801_v54 = vadd.f32 %v1800_v37, %v1799_v26  ;;  %v1785_v42 = vadd.f32 %v1784_v39, %v1783_v59  ;;  %v2106_v26 = vmul.f32 %v6844_v4, %v6529_v27  ;;  %v2109_v37 = vmul.f32 %v6806_v6, %v6563_v48  ;;  %v6887_v39 = vpop.permute.xlu0 %1885 }
 0x42a   : > { %v1796_v30 = vrot.slane %v1795_v57, 1  ;;  %v1791_v36 = vadd.f32 %v1790_v47, %v1789_v19  ;;  %v2113_v47 = vmul.f32 %v6806_v6, %v6567_v50 }
 0x42b   : > { %v1802_v60 = vrot.slane %v1801_v54, 1  ;;  %v1804_v46 = vmul.f32 0.125, %v1785_v42  ;;  %v6897_v59 = vadd.f32 %v2106_v26, %v6531_v28 }
 0x42c   : > { %v1797_v18 = vadd.f32 %v1796_v30, %v1795_v57  ;;  %v1805_v58 = vmul.f32 0.125, %v1791_v36  ;;  %v6917_v26 = vadd.f32 %v2113_v47, %v6583_v13 }
 0x42d   : > { %v1803_v23 = vadd.f32 %v1802_v60, %v1801_v54  ;;  %v1808_v27 = vadd.f32 %v1804_v46, %v6642_v52  ;;  %v6900_v60 = vadd.f32 %v2109_v37, %v6579_v8  ;;  %v6906_v52 = vmul.f32 %v6821_v51, %v6563_v48  ;;  %v6927_v46 = vpop.permute.xlu0 %1843 }
 0x42e   : > { %v1806_v12 = vmul.f32 0.125, %v1797_v18  ;;  %v1809_v30 = vadd.f32 %v1805_v58, %v6645_v33  ;;  %v6910_v18 = vmul.f32 %v6821_v51, %v6567_v50  ;;  %v6912_v33 = vpop.permute.xlu1 %1838 }
 0x42f   : > { %v1807_v15 = vmul.f32 0.125, %v1803_v23  ;;  %v1849_v54 = vrot.slane %v1808_v27, %v6639_v45  ;;  %v6921_v27 = vmul.f32 %v6834_v40, %v6563_v48 }
 0x430   : > { %v1810_v6 = vadd.f32 %v1806_v12, %v6652_v62  ;;  %v1853_v23 = vrot.slane %v1809_v30, %v6639_v45 }
 0x431   : > { %v1811_v36 = vadd.f32 %v1807_v15, %v6659_v3  ;;  %v1862_v12 = vmul.f32 %v1849_v54, %v6848_v10  ;;  %v1866_v51 = vmul.f32 %v1849_v54, %v6859_v20  ;;  %v1870_v37 = vmul.f32 %v1849_v54, %v6912_v33 }
 0x432   : > { %v1857_v62 = vrot.slane %v1810_v6, %v6639_v45  ;;  %v1863_v3 = vmul.f32 %v1853_v23, %v6848_v10  ;;  %v1867_v47 = vmul.f32 %v1853_v23, %v6859_v20  ;;  %v1871_v30 = vmul.f32 %v1853_v23, %v6912_v33  ;;  %v6945_v61 = vpop.permute.xlu1 %1890 }
 0x433   : > { %v1861_v58 = vrot.slane %v1811_v36, %v6639_v45  ;;  %v1898_v15 = vadd.f32 %v6877_v17, %v1862_v12  ;;  %v1902_v6 = vadd.f32 %v6887_v39, %v1866_v51 }
 0x434   : > { %v1864_v57 = vmul.f32 %v1857_v62, %v6848_v10  ;;  %v1868_v42 = vmul.f32 %v1857_v62, %v6859_v20  ;;  %v1899_v19 = vadd.f32 %v6877_v17, %v1863_v3  ;;  %v1903_v28 = vadd.f32 %v6887_v39, %v1867_v47 }
 0x435   : > { %v1865_v36 = vmul.f32 %v1861_v58, %v6848_v10  ;;  %v1869_v45 = vmul.f32 %v1861_v58, %v6859_v20  ;;  %v1914_v24 = vmax.f32 %v1898_v15, 0.0  ;;  %v1918_v41 = vmax.f32 %v1902_v6, 0.0  ;;  %v6948_v20 = vpop.permute.xlu0 %1895 }
 0x436   : > { %v1900_v35 = vadd.f32 %v6877_v17, %v1864_v57  ;;  %v1904_v12 = vadd.f32 %v6887_v39, %v1868_v42  ;;  %v1915_v43 = vmax.f32 %v1899_v19, 0.0  ;;  %v1919_v51 = vmax.f32 %v1903_v28, 0.0 }
 0x437   : > { %v1901_v44 = vadd.f32 %v6877_v17, %v1865_v36  ;;  %v1905_v21 = vadd.f32 %v6887_v39, %v1869_v45  ;;  %v5690_v3 = vpack.c.bf16 %v1918_v41, %v1914_v24  ;;  %v1875_v10 = vmul.f32 %v1853_v23, %v6927_v46 }
 0x438   : > { %v1916_v47 = vmax.f32 %v1900_v35, 0.0  ;;  %v1920_v14 = vmax.f32 %v1904_v12, 0.0  ;;  %v5688_v15 = vpack.c.bf16 %v1919_v51, %v1915_v43  ;;  %v1907_v42 = vadd.f32 %v6945_v61, %v1871_v30 }
 0x439   : > { %v1917_v6 = vmax.f32 %v1901_v44, 0.0  ;;  %v1921_v57 = vmax.f32 %v1905_v21, 0.0  ;;  %v1911_v28 = vadd.f32 %v6948_v20, %v1875_v10  ;;  %v1873_v36 = vmul.f32 %v1861_v58, %v6912_v33 }
 0x43a   : > { %v5698_v19 = vpack.c.bf16 %v1920_v14, %v1916_v47  ;;  %v1877_v45 = vmul.f32 %v1861_v58, %v6927_v46  ;;  %5689 = vmatprep.subr.bf16.mxu0 %v5688_v15  ;;  %v1923_v41 = vmax.f32 %v1907_v42, 0.0  ;;  %v1874_v35 = vmul.f32 %v1849_v54, %v6927_v46 }
 0x43b   : > { %v5696_v24 = vpack.c.bf16 %v1921_v57, %v1917_v6  ;;  %v1906_v23 = vadd.f32 %v6945_v61, %v1870_v37  ;;  %5691 = vmatpush1.bf16.msra.mxu0 %v5690_v3  ;;  %v1927_v43 = vmax.f32 %v1911_v28, 0.0  ;;  %v1909_v44 = vadd.f32 %v6945_v61, %v1873_v36 }
 0x43c   : > { %v1913_v21 = vadd.f32 %v6948_v20, %v1877_v45  ;;  %v1872_v14 = vmul.f32 %v1857_v62, %v6912_v33  ;;  %v1910_v10 = vadd.f32 %v6948_v20, %v1874_v35  ;;  %v1876_v58 = vmul.f32 %v1857_v62, %v6927_v46 }
 0x43d   : > { %5697 = vmatprep.subr.bf16.mxu1 %v5696_v24  ;;  %v1922_v30 = vmax.f32 %v1906_v23, 0.0  ;;  %v2112_v12 = vmul.f32 %v6834_v40, %v6567_v50  ;;  %v5692_v54 = vpack.c.bf16 %v1927_v43, %v1923_v41  ;;  %v1925_v37 = vmax.f32 %v1909_v44, 0.0 }
 0x43e   : > { %5699 = vmatpush1.bf16.msra.mxu1 %v5698_v19  ;;  %v1929_v51 = vmax.f32 %v1913_v21, 0.0  ;;  %v1908_v3 = vadd.f32 %v6945_v61, %v1872_v14  ;;  %v1926_v47 = vmax.f32 %v1910_v10, 0.0  ;;  %v1912_v15 = vadd.f32 %v6948_v20, %v1876_v58 }
 0x43f   : > { %v2110_v6 = vmul.f32 %v6844_v4, %v6563_v48  ;;  %v2114_v57 = vmul.f32 %v6844_v4, %v6567_v50  ;;  %5693 = vmatprep.subr.bf16.mxu0 %v5692_v54  ;;  %v2127_v40 = vadd.f32 %v6906_v52, %v6579_v8  ;;  %v2131_v19 = vadd.f32 %v6910_v18, %v6583_v13 }
 0x440   : > { %v5700_v62 = vpack.c.bf16 %v1929_v51, %v1925_v37  ;;  %v1924_v42 = vmax.f32 %v1908_v3, 0.0  ;;  %v5694_v28 = vpack.c.bf16 %v1926_v47, %v1922_v30  ;;  %v1928_v36 = vmax.f32 %v1912_v15, 0.0  ;;  %v1933_v3 = vpop.permute.xlu1 %1932 }
 0x441   : > { %v2124_v45 = vadd.f32 %v6921_v27, %v6579_v8  ;;  %v2128_v24 = vadd.f32 %v2112_v12, %v6583_v13  ;;  %v8128_v41 = vmax.f32 %v6841_v2, 0.0  ;;  %v8129_v4 = vmax.f32 %v6851_v1, 0.0  ;;  %v6986_v27 = vld [vmem:[%s7955_s8 + $0x8] sm:$0xff] }
 0x442   : > { %5701 = vmatprep.subr.bf16.mxu1 %v5700_v62  ;;  %v2134_v23 = vmax.f32 %v6885_v0, 0.0  ;;  %v2141_v52 = vmax.f32 %v6900_v60, 0.0  ;;  %v2145_v43 = vmax.f32 %v6917_v26, 0.0  ;;  %5695 = vmatpush1.bf16.msra.mxu0 %v5694_v28  ;;  %v5702_v18 = vpack.c.bf16 %v1928_v36, %v1924_v42 }
 0x443   : > { %v5704_v35 = vpack.c.bf16 %v8129_v4, %v8128_v41  ;;  %v2138_v44 = vmax.f32 %v6897_v59, 0.0  ;;  %v2126_v2 = vadd.f32 %v2110_v6, %v6579_v8  ;;  %v2130_v1 = vadd.f32 %v2114_v57, %v6583_v13 }
 0x444   : > { %v8130_v0 = vmax.f32 %v6863_v49, 0.0  ;;  %v8131_v60 = vmax.f32 %v6869_v7, 0.0  ;;  %v2143_v26 = vmax.f32 %v2127_v40, 0.0  ;;  %v2147_v14 = vmax.f32 %v2131_v19, 0.0  ;;  %5703 = vmatpush1.bf16.msra.mxu1 %v5702_v18 }
 0x445   : > { %5705 = vmatprep.subr.bf16.mxu0 %v5704_v35  ;;  %v8132_v10 = vmax.f32 %v6872_v22, 0.0  ;;  %v8133_v30 = vmax.f32 %v6875_v5, 0.0  ;;  %v2140_v12 = vmax.f32 %v2124_v45, 0.0  ;;  %v2144_v59 = vmax.f32 %v2128_v24, 0.0  ;;  %5428 = vmatmul.mubr.msk.f32.vlgmr.msra.gmra.mrb[0].mxu0 %vm1029_vm2, %v6986_v27 }
 0x446   : > { %v5712_v21 = vpack.c.bf16 %v8131_v60, %v8130_v0  ;;  %v5708_v54 = vpack.c.bf16 %v2145_v43, %v2141_v52  ;;  %v5714_v49 = vpack.c.bf16 %v2138_v44, %v2134_v23  ;;  %v2142_v37 = vmax.f32 %v2126_v2, 0.0  ;;  %2212 = vmatprep.mubr.f32.mxu0 %v8113_v16 }
 0x447   : > { %v5706_v58 = vpack.c.bf16 %v8133_v30, %v8132_v10  ;;  %v2146_v7 = vmax.f32 %v2130_v1, 0.0  ;;  %5429 = vmatmul.mubr.msk.f32.vlgmr.msra.gmra.mrb[0].mxu1 %vm1029_vm2, %v6986_v27  ;;  %v5716_v22 = vpack.c.bf16 %v2147_v14, %v2143_v26  ;;  %v5710_v5 = vpack.c.bf16 %v2144_v59, %v2140_v12 }
 0x448   : > { %5713 = vmatprep.subr.bf16.mxu1 %v5712_v21  ;;  %2283 = vmatprep.mubr.f32.mxu1 %v8113_v16  ;;  %v5898_v47 = vadd.f32 %v6825_v38, %v1933_v3  ;;  %v5914_v15 = vadd.f32 %v6830_v9, %v1933_v3  ;;  %v5930_v6 = vadd.f32 %v6836_v63, %v1933_v3 }
 0x449   : > { %5707 = vmatpush1.bf16.msra.mxu0 %v5706_v58  ;;  %5715 = vmatpush1.bf16.msra.mxu1 %v5714_v49  ;;  %v5718_v51 = vpack.c.bf16 %v2146_v7, %v2142_v37  ;;  %v5946_v57 = vadd.f32 %v6838_v53, %v1933_v3 }
 0x44a   : > { %5709 = vmatprep.subr.bf16.mxu0 %v5708_v54  ;;  %5717 = vmatprep.subr.bf16.mxu1 %v5716_v22  ;;  %v5899_v62 = vadd.f32 %v5898_v47, %v1933_v3  ;;  %v5915_v42 = vadd.f32 %v5914_v15, %v1933_v3  ;;  %v5931_v40 = vadd.f32 %v5930_v6, %v1933_v3 }
 0x44b   : > { %v5947_v19 = vadd.f32 %v5946_v57, %v1933_v3 }
 0x44c   : > { %v5900_v28 = vadd.f32 %v5899_v62, %v1933_v3  ;;  %v5916_v36 = vadd.f32 %v5915_v42, %v1933_v3  ;;  %v5932_v45 = vadd.f32 %v5931_v40, %v1933_v3  ;;  %v7028_v40 = vsub.s32 4, %v6524_v25 }
 0x44d   : > { %5711 = vmatpush1.bf16.msra.mxu0 %v5710_v5  ;;  %5719 = vmatpush1.bf16.msra.mxu1 %v5718_v51 }
 0x44e   : > { %v5901_v4 = vadd.f32 %v5900_v28, %v1933_v3  ;;  %v5917_v23 = vadd.f32 %v5916_v36, %v1933_v3  ;;  %v5933_v43 = vadd.f32 %v5932_v45, %v1933_v3 }
 0x450   : > { %5430 = vmatmul.mubr.msk.f32.vlgmr.msra.gmra.mrb[12].mxu0 %vm1029_vm2, %v6600_v55  ;;  %5431 = vmatmul.mubr.msk.f32.vlgmr.msra.gmra.mrb[12].mxu1 %vm1029_vm2, %v6600_v55  ;;  %v5948_v55 = vadd.f32 %v5947_v19, %v1933_v3 }
 0x451   : > { %2454 = vmatprep.mubr.f32.mxu0 %v8113_v16  ;;  %2525 = vmatprep.mubr.f32.mxu1 %v8113_v16 }
 0x452   : > { %v5949_v0 = vadd.f32 %v5948_v55, %v1933_v3 }
 0x523   : > { %v2214_v24 = vpop.f32.mrb[12].mxu0  ;;  %v2285_v38 = vpop.f32.mrb[12].mxu1 }
 0x524   : > { %v2215_v41 = vadd.f32 %v2214_v24, %v6608_v56  ;;  %v2216_v35 = vpop.f32.mrb[13].mxu0  ;;  %v2286_v53 = vadd.f32 %v2285_v38, %v6608_v56  ;;  %v2287_v18 = vpop.f32.mrb[13].mxu1 }
 0x525   : > { %v2217_v9 = vadd.f32 %v2216_v35, %v6608_v56  ;;  %v2288_v1 = vadd.f32 %v2287_v18, %v6608_v56  ;;  %v8135_v18 = vld [vmem:[#allocation25_spill] sm:$0xff] }
 0x526   : > { %v2294_v63 = vrot.slane %v2215_v41, 4  ;;  %v7017_v52 = vadd.f32 %v5901_v4, %v2215_v41  ;;  %v2306_v21 = vrot.slane %v2286_v53, 4  ;;  %v7023_v26 = vadd.f32 %v5933_v43, %v2286_v53 }
 0x527   : > { %v2300_v44 = vrot.slane %v2217_v9, 4  ;;  %v7020_v2 = vadd.f32 %v5917_v23, %v2217_v9  ;;  %v2312_v10 = vrot.slane %v2288_v1, 4  ;;  %v7025_v30 = vadd.f32 %v5949_v0, %v2288_v1 }
 0x528   : > { %v2295_v60 = vadd.f32 %v2294_v63, %v2215_v41  ;;  %v2307_v12 = vadd.f32 %v2306_v21, %v2286_v53  ;;  %v8134_v53 = vld [vmem:[#allocation21_spill] sm:$0xff] }
 0x529   : > { %v2301_v14 = vadd.f32 %v2300_v44, %v2217_v9  ;;  %v2313_v54 = vadd.f32 %v2312_v10, %v2288_v1 }
 0x52a   : > { %v2296_v58 = vrot.slane %v2295_v60, 2  ;;  %v2308_v37 = vrot.slane %v2307_v12, 2 }
 0x52b   : > { %v2302_v59 = vrot.slane %v2301_v14, 2  ;;  %v2314_v22 = vrot.slane %v2313_v54, 2 }
 0x52c   : > { %v2297_v49 = vadd.f32 %v2296_v58, %v2295_v60  ;;  %v2309_v51 = vadd.f32 %v2308_v37, %v2307_v12  ;;  %v8137_v58 = vld [vmem:[#allocation23_spill] sm:$0xff] }
 0x52d   : > { %v2303_v7 = vadd.f32 %v2302_v59, %v2301_v14  ;;  %v2315_v3 = vadd.f32 %v2314_v22, %v2313_v54  ;;  %v8136_v14 = vld [vmem:[#allocation22_spill] sm:$0xff] }
 0x52e   : > { %v2298_v5 = vrot.slane %v2297_v49, 1  ;;  %v2310_v6 = vrot.slane %v2309_v51, 1 }
 0x52f   : > { %v2304_v47 = vrot.slane %v2303_v7, 1  ;;  %v2316_v62 = vrot.slane %v2315_v3, 1 }
 0x530   : > { %v2299_v15 = vadd.f32 %v2298_v5, %v2297_v49  ;;  %v2311_v19 = vadd.f32 %v2310_v6, %v2309_v51 }
 0x531   : > { %v2305_v57 = vadd.f32 %v2304_v47, %v2303_v7  ;;  %v2317_v36 = vadd.f32 %v2316_v62, %v2315_v3 }
 0x532   : > { %v2318_v42 = vmul.f32 0.125, %v2299_v15  ;;  %v2320_v24 = vmul.f32 0.125, %v2311_v19 }
 0x533   : > { %v2319_v28 = vmul.f32 0.125, %v2305_v57  ;;  %v2321_v41 = vmul.f32 0.125, %v2317_v36  ;;  %v8138_v36 = vld [vmem:[#allocation26_spill] sm:$0xff] }
 0x534   : > { %v7031_v45 = vadd.f32 %v2318_v42, %v6533_v29  ;;  %v7039_v35 = vadd.f32 %v2320_v24, %v6537_v31 }
 0x535   : > { %v7034_v55 = vadd.f32 %v2319_v28, %v6539_v32  ;;  %v7044_v9 = vadd.f32 %v2321_v41, %v6543_v34 }
 0x536   : > { %v2329_v4 = vrot.slane %v7031_v45, %v7028_v40  ;;  %v2337_v23 = vrot.slane %v7039_v35, %v7028_v40 }
 0x537   : > { %v2333_v38 = vrot.slane %v7034_v55, %v7028_v40  ;;  %v2341_v1 = vrot.slane %v7044_v9, %v7028_v40 }
 0x538   : > { %v2342_v63 = vmul.f32 %v2329_v4, %v6628_v11  ;;  %v2346_v43 = vmul.f32 %v2329_v4, %v8134_v53  ;;  %v2350_v44 = vmul.f32 %v2329_v4, %v8135_v18  ;;  %v2344_v59 = vmul.f32 %v2337_v23, %v6628_v11 }
 0x539   : > { %v2343_v0 = vmul.f32 %v2333_v38, %v6628_v11  ;;  %v2347_v60 = vmul.f32 %v2333_v38, %v8134_v53  ;;  %v2351_v21 = vmul.f32 %v2333_v38, %v8135_v18  ;;  %v2348_v54 = vmul.f32 %v2337_v23, %v8134_v53 }
 0x53a   : > { %v2358_v10 = vadd.f32 %v2342_v63, %v8136_v14  ;;  %v2362_v12 = vadd.f32 %v2346_v43, %v8137_v58  ;;  %v2345_v7 = vmul.f32 %v2341_v1, %v6628_v11  ;;  %v2349_v22 = vmul.f32 %v2341_v1, %v8134_v53 }
 0x53b   : > { %v2359_v49 = vadd.f32 %v2343_v0, %v8136_v14  ;;  %v2363_v37 = vadd.f32 %v2347_v60, %v8137_v58  ;;  %v2360_v47 = vadd.f32 %v2344_v59, %v8136_v14  ;;  %v2364_v3 = vadd.f32 %v2348_v54, %v8137_v58  ;;  %v8139_v0 = vld [vmem:[#allocation27_spill] sm:$0xff] }
 0x53c   : > { %v2374_v5 = vmax.f32 %v2358_v10, 0.0  ;;  %v2378_v51 = vmax.f32 %v2362_v12, 0.0  ;;  %v2361_v57 = vadd.f32 %v2345_v7, %v8136_v14  ;;  %v2365_v62 = vadd.f32 %v2349_v22, %v8137_v58  ;;  %v8140_v12 = vld [vmem:[#allocation28_spill] sm:$0xff] }
 0x53d   : > { %v2375_v15 = vmax.f32 %v2359_v49, 0.0  ;;  %v2379_v6 = vmax.f32 %v2363_v37, 0.0  ;;  %v2376_v19 = vmax.f32 %v2360_v47, 0.0  ;;  %v2380_v28 = vmax.f32 %v2364_v3, 0.0 }
 0x53e   : > { %v5722_v42 = vpack.c.bf16 %v2378_v51, %v2374_v5  ;;  %v2355_v24 = vmul.f32 %v2333_v38, %v8138_v36  ;;  %v2377_v63 = vmax.f32 %v2361_v57, 0.0  ;;  %v2381_v43 = vmax.f32 %v2365_v62, 0.0 }
 0x53f   : > { %v5720_v41 = vpack.c.bf16 %v2379_v6, %v2375_v15  ;;  %v2367_v60 = vadd.f32 %v2351_v21, %v8139_v0  ;;  %v5730_v10 = vpack.c.bf16 %v2380_v28, %v2376_v19  ;;  %v2353_v54 = vmul.f32 %v2341_v1, %v8135_v18 }
 0x540   : > { %v2371_v59 = vadd.f32 %v2355_v24, %v8140_v12  ;;  %v2357_v49 = vmul.f32 %v2341_v1, %v8138_v36  ;;  %v5728_v37 = vpack.c.bf16 %v2381_v43, %v2377_v63  ;;  %v2354_v22 = vmul.f32 %v2329_v4, %v8138_v36  ;;  %v8141_v43 = vld [vmem:[#allocation29_spill] sm:$0xff] }
 0x541   : > { %5721 = vmatprep.subr.bf16.mxu0 %v5720_v41  ;;  %v2383_v7 = vmax.f32 %v2367_v60, 0.0  ;;  %v2366_v5 = vadd.f32 %v2350_v44, %v8139_v0  ;;  %v2369_v51 = vadd.f32 %v2353_v54, %v8139_v0  ;;  %v2352_v47 = vmul.f32 %v2337_v23, %v8135_v18  ;;  %v8142_v60 = vld [vmem:[#allocation30_spill] sm:$0xff] }
 0x542   : > { %5723 = vmatpush1.bf16.msra.mxu0 %v5722_v42  ;;  %v2387_v38 = vmax.f32 %v2371_v59, 0.0  ;;  %v2373_v21 = vadd.f32 %v2357_v49, %v8140_v12  ;;  %5729 = vmatprep.subr.bf16.mxu1 %v5728_v37  ;;  %v2370_v3 = vadd.f32 %v2354_v22, %v8140_v12  ;;  %v2356_v1 = vmul.f32 %v2337_v23, %v8138_v36 }
 0x543   : > { %v2382_v15 = vmax.f32 %v2366_v5, 0.0  ;;  %5731 = vmatpush1.bf16.msra.mxu1 %v5730_v10  ;;  %v2385_v57 = vmax.f32 %v2369_v51, 0.0  ;;  %v2368_v44 = vadd.f32 %v2352_v47, %v8139_v0 }
 0x544   : > { %v5724_v6 = vpack.c.bf16 %v2387_v38, %v2383_v7  ;;  %v2389_v4 = vmax.f32 %v2373_v21, 0.0  ;;  %v2386_v62 = vmax.f32 %v2370_v3, 0.0  ;;  %v2372_v42 = vadd.f32 %v2356_v1, %v8140_v12 }
 0x545   : > { %v2384_v28 = vmax.f32 %v2368_v44, 0.0 }
 0x546   : > { %5725 = vmatprep.subr.bf16.mxu0 %v5724_v6  ;;  %v5732_v19 = vpack.c.bf16 %v2389_v4, %v2385_v57  ;;  %v5726_v24 = vpack.c.bf16 %v2386_v62, %v2382_v15  ;;  %v2388_v41 = vmax.f32 %v2372_v42, 0.0 }
 0x548   : > { %5733 = vmatprep.subr.bf16.mxu1 %v5732_v19  ;;  %5727 = vmatpush1.bf16.msra.mxu0 %v5726_v24  ;;  %v5734_v63 = vpack.c.bf16 %v2388_v41, %v2384_v28 }
 0x54a   : > { %5735 = vmatpush1.bf16.msra.mxu1 %v5734_v63 }
 0x54b   : > { %5432 = vmatmul.mubr.msk.f32.vlgmr.msra.gmra.mrb[14].mxu0 %vm1029_vm2, %v8141_v43 }
 0x54c   : > { %2696 = vmatprep.mubr.f32.mxu0 %v8113_v16 }
 0x54d   : > { %5433 = vmatmul.mubr.msk.f32.vlgmr.msra.gmra.mrb[14].mxu1 %vm1029_vm2, %v8141_v43 }
 0x54e   : > { %2767 = vmatprep.mubr.f32.mxu1 %v8113_v16 }
 0x61e   : > { %v2456_v23 = vpop.f32.mrb[14].mxu0 }
 0x61f   : > { %v2457_v10 = vadd.f32 %v2456_v23, %v8142_v60  ;;  %v2458_v59 = vpop.f32.mrb[15].mxu0 }
 0x620   : > { %v2527_v54 = vpop.f32.mrb[14].mxu1  ;;  %v2459_v49 = vadd.f32 %v2458_v59, %v8142_v60 }
 0x621   : > { %v2536_v37 = vrot.slane %v2457_v10, 4  ;;  %v7091_v7 = vadd.f32 %v7017_v52, %v2457_v10  ;;  %v2528_v22 = vadd.f32 %v2527_v54, %v8142_v60  ;;  %v2529_v5 = vpop.f32.mrb[15].mxu1 }
 0x622   : > { %v2542_v38 = vrot.slane %v2459_v49, 4  ;;  %v7095_v51 = vadd.f32 %v7020_v2, %v2459_v49  ;;  %v2530_v21 = vadd.f32 %v2529_v5, %v8142_v60 }
 0x623   : > { %v2537_v47 = vadd.f32 %v2536_v37, %v2457_v10  ;;  %v2548_v3 = vrot.slane %v2528_v22, 4  ;;  %v7099_v15 = vadd.f32 %v7023_v26, %v2528_v22 }
 0x624   : > { %v2543_v1 = vadd.f32 %v2542_v38, %v2459_v49  ;;  %v2554_v6 = vrot.slane %v2530_v21, 4  ;;  %v7102_v57 = vadd.f32 %v7025_v30, %v2530_v21 }
 0x625   : > { %v2538_v52 = vrot.slane %v2537_v47, 2  ;;  %v2549_v4 = vadd.f32 %v2548_v3, %v2528_v22  ;;  %v7105_v22 = vsub.s32 3, %v6524_v25 }
 0x626   : > { %v2544_v44 = vrot.slane %v2543_v1, 2  ;;  %v2555_v62 = vadd.f32 %v2554_v6, %v2530_v21 }
 0x627   : > { %v2539_v42 = vadd.f32 %v2538_v52, %v2537_v47  ;;  %v2550_v19 = vrot.slane %v2549_v4, 2  ;;  %8143 = vst [vmem:[#allocation29_spill] sm:$0xff] %v7105_v22 }
 0x628   : > { %v2545_v2 = vadd.f32 %v2544_v44, %v2543_v1  ;;  %v2556_v28 = vrot.slane %v2555_v62, 2  ;;  %v8144_v44 = vld [vmem:[#allocation31_spill] sm:$0xff] }
 0x629   : > { %v2540_v24 = vrot.slane %v2539_v42, 1  ;;  %v2551_v41 = vadd.f32 %v2550_v19, %v2549_v4 }
 0x62a   : > { %v2546_v63 = vrot.slane %v2545_v2, 1  ;;  %v2557_v43 = vadd.f32 %v2556_v28, %v2555_v62 }
 0x62b   : > { %v2541_v23 = vadd.f32 %v2540_v24, %v2539_v42  ;;  %v2552_v26 = vrot.slane %v2551_v41, 1  ;;  %v8145_v42 = vld [vmem:[#allocation32_spill] sm:$0xff] }
 0x62c   : > { %v2547_v10 = vadd.f32 %v2546_v63, %v2545_v2  ;;  %v2558_v59 = vrot.slane %v2557_v43, 1  ;;  %v8146_v2 = vld [vmem:[#allocation36_spill] sm:$0xff] }
 0x62d   : > { %v2560_v54 = vmul.f32 0.125, %v2541_v23  ;;  %v2553_v49 = vadd.f32 %v2552_v26, %v2551_v41  ;;  %v8147_v23 = vld [vmem:[#allocation33_spill] sm:$0xff] }
 0x62e   : > { %v2561_v30 = vmul.f32 0.125, %v2547_v10  ;;  %v2559_v37 = vadd.f32 %v2558_v59, %v2557_v43  ;;  %v8148_v10 = vld [vmem:[#allocation34_spill] sm:$0xff] }
 0x62f   : > { %v2564_v5 = vadd.f32 %v2560_v54, %v6533_v29  ;;  %v2562_v38 = vmul.f32 0.125, %v2553_v49 }
 0x630   : > { %v2565_v21 = vadd.f32 %v2561_v30, %v6539_v32  ;;  %v2563_v47 = vmul.f32 0.125, %v2559_v37 }
 0x631   : > { %v2571_v3 = vrot.slane %v2564_v5, %v7105_v22  ;;  %v2566_v1 = vadd.f32 %v2562_v38, %v6537_v31 }
 0x632   : > { %v2575_v6 = vrot.slane %v2565_v21, %v7105_v22  ;;  %v2567_v52 = vadd.f32 %v2563_v47, %v6543_v34 }
 0x633   : > { %v2579_v4 = vrot.slane %v2566_v1, %v7105_v22  ;;  %v2584_v62 = vmul.f32 %v2571_v3, %v8144_v44  ;;  %v2588_v19 = vmul.f32 %v2571_v3, %v8145_v42  ;;  %v2592_v28 = vmul.f32 %v2571_v3, %v8146_v2 }
 0x634   : > { %v2583_v24 = vrot.slane %v2567_v52, %v7105_v22  ;;  %v2585_v41 = vmul.f32 %v2575_v6, %v8144_v44  ;;  %v2589_v63 = vmul.f32 %v2575_v6, %v8145_v42  ;;  %v2593_v43 = vmul.f32 %v2575_v6, %v8146_v2 }
 0x635   : > { %v2600_v26 = vadd.f32 %v2584_v62, %v8147_v23  ;;  %v2604_v59 = vadd.f32 %v2588_v19, %v8148_v10  ;;  %v2586_v54 = vmul.f32 %v2579_v4, %v8144_v44  ;;  %v2590_v49 = vmul.f32 %v2579_v4, %v8145_v42 }
 0x636   : > { %v2601_v30 = vadd.f32 %v2585_v41, %v8147_v23  ;;  %v2605_v37 = vadd.f32 %v2589_v63, %v8148_v10  ;;  %v2587_v5 = vmul.f32 %v2583_v24, %v8144_v44  ;;  %v2591_v38 = vmul.f32 %v2583_v24, %v8145_v42  ;;  %v8149_v63 = vld [vmem:[#allocation37_spill] sm:$0xff] }
 0x637   : > { %v2616_v21 = vmax.f32 %v2600_v26, 0.0  ;;  %v2620_v47 = vmax.f32 %v2604_v59, 0.0  ;;  %v2602_v1 = vadd.f32 %v2586_v54, %v8147_v23  ;;  %v2606_v52 = vadd.f32 %v2590_v49, %v8148_v10  ;;  %v8150_v26 = vld [vmem:[#allocation38_spill] sm:$0xff]  ;;  %v8151_v54 = vld [vmem:[#allocation39_spill] sm:$0xff] }
 0x638   : > { %v2617_v62 = vmax.f32 %v2601_v30, 0.0  ;;  %v2621_v19 = vmax.f32 %v2605_v37, 0.0  ;;  %v2603_v22 = vadd.f32 %v2587_v5, %v8147_v23  ;;  %v2607_v60 = vadd.f32 %v2591_v38, %v8148_v10 }
 0x639   : > { %v5738_v12 = vpack.c.bf16 %v2620_v47, %v2616_v21  ;;  %v2618_v41 = vmax.f32 %v2602_v1, 0.0  ;;  %v2622_v0 = vmax.f32 %v2606_v52, 0.0  ;;  %v2597_v36 = vmul.f32 %v2575_v6, %v8149_v63 }
 0x63a   : > { %v5736_v44 = vpack.c.bf16 %v2621_v19, %v2617_v62  ;;  %v2619_v58 = vmax.f32 %v2603_v22, 0.0  ;;  %v2623_v42 = vmax.f32 %v2607_v60, 0.0  ;;  %v2609_v59 = vadd.f32 %v2593_v43, %v8150_v26  ;;  %v8152_v19 = vld [vmem:[#allocation40_spill] sm:$0xff] }
 0x63b   : > { %v5746_v14 = vpack.c.bf16 %v2622_v0, %v2618_v41  ;;  %v2613_v18 = vadd.f32 %v2597_v36, %v8151_v54  ;;  %v2595_v49 = vmul.f32 %v2583_v24, %v8146_v2  ;;  %v2599_v30 = vmul.f32 %v2583_v24, %v8149_v63 }
 0x63c   : > { %5737 = vmatprep.subr.bf16.mxu0 %v5736_v44  ;;  %v5744_v37 = vpack.c.bf16 %v2623_v42, %v2619_v58  ;;  %v2625_v5 = vmax.f32 %v2609_v59, 0.0  ;;  %v2596_v38 = vmul.f32 %v2571_v3, %v8149_v63  ;;  %v2608_v21 = vadd.f32 %v2592_v28, %v8150_v26 }
 0x63d   : > { %5739 = vmatpush1.bf16.msra.mxu0 %v5738_v12  ;;  %v2629_v6 = vmax.f32 %v2613_v18, 0.0  ;;  %v2611_v60 = vadd.f32 %v2595_v49, %v8150_v26  ;;  %v2615_v22 = vadd.f32 %v2599_v30, %v8151_v54  ;;  %v2594_v0 = vmul.f32 %v2579_v4, %v8146_v2  ;;  %v8155_v49 = vld [vmem:[#allocation41_spill] sm:$0xff] }
 0x63e   : > { %5745 = vmatprep.subr.bf16.mxu1 %v5744_v37  ;;  %v2612_v36 = vadd.f32 %v2596_v38, %v8151_v54  ;;  %v2624_v43 = vmax.f32 %v2608_v21, 0.0  ;;  %v2598_v44 = vmul.f32 %v2579_v4, %v8149_v63  ;;  %v8154_v4 = vld [vmem:[#allocation18_spill] sm:$0xff] }
 0x63f   : > { %5747 = vmatpush1.bf16.msra.mxu1 %v5746_v14  ;;  %v5740_v58 = vpack.c.bf16 %v2629_v6, %v2625_v5  ;;  %v2627_v42 = vmax.f32 %v2611_v60, 0.0  ;;  %v2631_v3 = vmax.f32 %v2615_v22, 0.0  ;;  %v2610_v28 = vadd.f32 %v2594_v0, %v8150_v26  ;;  %v8153_v14 = vld [vmem:[#allocation35_spill] sm:$0xff]  ;;  %v8157_v60 = vld [vmem:[#allocation8_spill] sm:$0xff] }
 0x640   : > { %v2628_v12 = vmax.f32 %v2612_v36, 0.0  ;;  %v2614_v18 = vadd.f32 %v2598_v44, %v8151_v54  ;;  %v3027_v41 = vrot.slane %v8154_v4, %v8153_v14  ;;  %v8156_v5 = vld [vmem:[#allocation19_spill] sm:$0xff] }
 0x641   : > { %5741 = vmatprep.subr.bf16.mxu0 %v5740_v58  ;;  %v5748_v24 = vpack.c.bf16 %v2631_v3, %v2627_v42  ;;  %v2626_v47 = vmax.f32 %v2610_v28, 0.0  ;;  %v7158_v38 = vrot.slane %v8156_v5, %v8153_v14  ;;  %v8158_v58 = vld [vmem:[#allocation12_spill] sm:$0xff] }
 0x642   : > { %v5742_v1 = vpack.c.bf16 %v2628_v12, %v2624_v43  ;;  %v2630_v52 = vmax.f32 %v2614_v18, 0.0  ;;  %v3037_v22 = vmul.f32 %v3027_v41, %v8157_v60  ;;  %v3041_v42 = vmul.f32 %v3027_v41, %v8158_v58  ;;  %v8159_v18 = vld [vmem:[#allocation16_spill] sm:$0xff] }
 0x643   : > { %5749 = vmatprep.subr.bf16.mxu1 %v5748_v24  ;;  %v7173_v24 = vrot.slane %v8159_v18, %v8153_v14 }
 0x644   : > { %5743 = vmatpush1.bf16.msra.mxu0 %v5742_v1  ;;  %v5750_v62 = vpack.c.bf16 %v2630_v52, %v2626_v47 }
 0x646   : > { %5751 = vmatpush1.bf16.msra.mxu1 %v5750_v62 }
 0x647   : > { %5434 = vmatmul.mubr.msk.f32.vlgmr.msra.gmra.mrb[16].mxu0 %vm1029_vm2, %v8152_v19 }
 0x648   : > { %2938 = vmatprep.mubr.f32.mxu0 %v8113_v16 }
 0x649   : > { %5435 = vmatmul.mubr.msk.f32.vlgmr.msra.gmra.mrb[16].mxu1 %vm1029_vm2, %v8152_v19 }
 0x64a   : > { %3009 = vmatprep.mubr.f32.mxu1 %v8113_v16 }
 0x71a   : > { %v2698_v59 = vpop.f32.mrb[16].mxu0 }
 0x71b   : > { %v2699_v30 = vadd.f32 %v2698_v59, %v8155_v49  ;;  %v2700_v37 = vpop.f32.mrb[17].mxu0  ;;  %v8160_v59 = vld [vmem:[#allocation9_spill] sm:$0xff] }
 0x71c   : > { %v2769_v21 = vpop.f32.mrb[16].mxu1  ;;  %v2701_v6 = vadd.f32 %v2700_v37, %v8155_v49  ;;  %v7182_v37 = vadd.f32 %v3037_v22, %v8160_v59 }
 0x71d   : > { %v2778_v0 = vrot.slane %v2699_v30, 4  ;;  %v7163_v36 = vadd.f32 %v7091_v7, %v2699_v30  ;;  %v2770_v43 = vadd.f32 %v2769_v21, %v8155_v49  ;;  %v2771_v44 = vpop.f32.mrb[17].mxu1 }
 0x71e   : > { %v2784_v3 = vrot.slane %v2701_v6, 4  ;;  %v7168_v28 = vadd.f32 %v7095_v51, %v2701_v6  ;;  %v2772_v12 = vadd.f32 %v2771_v44, %v8155_v49  ;;  %v8161_v44 = vld [vmem:[#allocation13_spill] sm:$0xff] }
 0x71f   : > { %v2779_v47 = vadd.f32 %v2778_v0, %v2699_v30  ;;  %v2790_v1 = vrot.slane %v2770_v43, 4  ;;  %v7176_v7 = vadd.f32 %v7099_v15, %v2770_v43  ;;  %v7185_v5 = vadd.f32 %v3041_v42, %v8161_v44  ;;  %v8162_v0 = vld [vmem:[#allocation17_spill] sm:$0xff] }
 0x720   : > { %v2785_v52 = vadd.f32 %v2784_v3, %v2701_v6  ;;  %v2796_v62 = vrot.slane %v2772_v12, 4  ;;  %v7179_v19 = vadd.f32 %v7102_v57, %v2772_v12  ;;  %v3039_v30 = vmul.f32 %v7158_v38, %v8157_v60 }
 0x721   : > { %v2780_v51 = vrot.slane %v2779_v47, 2  ;;  %v2791_v21 = vadd.f32 %v2790_v1, %v2770_v43  ;;  %v7191_v15 = vrot.slane %v8162_v0, %v8153_v14  ;;  %v3043_v57 = vmul.f32 %v7158_v38, %v8158_v58 }
 0x722   : > { %v2786_v6 = vrot.slane %v2785_v52, 2  ;;  %v2797_v3 = vadd.f32 %v2796_v62, %v2772_v12  ;;  %v3036_v43 = vmul.f32 %v7173_v24, %v8157_v60  ;;  %v3040_v42 = vmul.f32 %v7173_v24, %v8158_v58 }
 0x723   : > { %v2781_v18 = vadd.f32 %v2780_v51, %v2779_v47  ;;  %v2792_v22 = vrot.slane %v2791_v21, 2  ;;  %v7202_v12 = vadd.f32 %v3039_v30, %v8160_v59  ;;  %v7205_v51 = vadd.f32 %v3043_v57, %v8161_v44 }
 0x724   : > { %v2787_v1 = vadd.f32 %v2786_v6, %v2785_v52  ;;  %v2798_v49 = vrot.slane %v2797_v3, 2  ;;  %v3038_v26 = vmul.f32 %v7191_v15, %v8157_v60  ;;  %v7210_v6 = vadd.f32 %v3036_v43, %v8160_v59 }
 0x725   : > { %v2782_v54 = vrot.slane %v2781_v18, 1  ;;  %v2793_v14 = vadd.f32 %v2792_v22, %v2791_v21  ;;  %v7213_v21 = vadd.f32 %v3040_v42, %v8161_v44  ;;  %v3042_v30 = vmul.f32 %v7191_v15, %v8158_v58 }
 0x726   : > { %v2788_v62 = vrot.slane %v2787_v1, 1  ;;  %v2799_v47 = vadd.f32 %v2798_v49, %v2797_v3  ;;  %v3045_v49 = vmul.f32 %v3027_v41, %v6563_v48  ;;  %v7222_v42 = vadd.f32 %v3038_v26, %v8160_v59 }
 0x727   : > { %v2783_v63 = vadd.f32 %v2782_v54, %v2781_v18  ;;  %v2794_v52 = vrot.slane %v2793_v14, 1  ;;  %v3049_v54 = vmul.f32 %v3027_v41, %v6567_v50 }
 0x728   : > { %v2789_v22 = vadd.f32 %v2788_v62, %v2787_v1  ;;  %v2800_v0 = vrot.slane %v2799_v47, 1  ;;  %v7232_v41 = vadd.f32 %v3045_v49, %v6579_v8  ;;  %v8163_v49 = vld [vmem:[#allocation42_spill] sm:$0xff] }
 0x729   : > { %v2802_v3 = vmul.f32 0.125, %v2783_v63  ;;  %v2795_v57 = vadd.f32 %v2794_v52, %v2793_v14  ;;  %v7229_v52 = vadd.f32 %v3042_v30, %v8161_v44  ;;  %v7251_v30 = vmul.f32 %v7173_v24, %v6563_v48 }
 0x72a   : > { %v2803_v18 = vmul.f32 0.125, %v2789_v22  ;;  %v2801_v60 = vadd.f32 %v2800_v0, %v2799_v47  ;;  %v7241_v47 = vmul.f32 %v7158_v38, %v6563_v48  ;;  %v7247_v22 = vmul.f32 %v7158_v38, %v6567_v50 }
 0x72b   : > { %v2806_v1 = vadd.f32 %v2802_v3, %v7031_v45  ;;  %v2804_v62 = vmul.f32 0.125, %v2795_v57  ;;  %v7237_v45 = vadd.f32 %v3049_v54, %v6583_v13  ;;  %v8164_v57 = vld [vmem:[#allocation43_spill] sm:$0xff] }
 0x72c   : > { %v2807_v63 = vadd.f32 %v2803_v18, %v7034_v55  ;;  %v2805_v14 = vmul.f32 0.125, %v2801_v60 }
 0x72d   : > { %v2813_v0 = vrot.slane %v2806_v1, %v7028_v40  ;;  %v2808_v26 = vadd.f32 %v2804_v62, %v7039_v35 }
 0x72e   : > { %v2817_v55 = vrot.slane %v2807_v63, %v7028_v40  ;;  %v2809_v60 = vadd.f32 %v2805_v14, %v7044_v9 }
 0x72f   : > { %v2821_v35 = vrot.slane %v2808_v26, %v7028_v40  ;;  %v2826_v3 = vmul.f32 %v2813_v0, %v8163_v49  ;;  %v2830_v54 = vmul.f32 %v2813_v0, %v8164_v57  ;;  %v2834_v18 = vmul.f32 %v2813_v0, %v6912_v33 }
 0x730   : > { %v2825_v1 = vrot.slane %v2809_v60, %v7028_v40  ;;  %v2827_v9 = vmul.f32 %v2817_v55, %v8163_v49  ;;  %v2831_v62 = vmul.f32 %v2817_v55, %v8164_v57  ;;  %v2835_v38 = vmul.f32 %v2817_v55, %v6912_v33 }
 0x731   : > { %v2842_v63 = vadd.f32 %v2826_v3, %v6877_v17  ;;  %v2846_v14 = vadd.f32 %v2830_v54, %v6887_v39  ;;  %v2828_v26 = vmul.f32 %v2821_v35, %v8163_v49  ;;  %v2832_v10 = vmul.f32 %v2821_v35, %v8164_v57 }
 0x732   : > { %v2843_v58 = vadd.f32 %v2827_v9, %v6877_v17  ;;  %v2847_v43 = vadd.f32 %v2831_v62, %v6887_v39  ;;  %v2829_v40 = vmul.f32 %v2825_v1, %v8163_v49  ;;  %v2833_v60 = vmul.f32 %v2825_v1, %v8164_v57 }
 0x733   : > { %v2858_v4 = vmax.f32 %v2842_v63, 0.0  ;;  %v2862_v44 = vmax.f32 %v2846_v14, 0.0  ;;  %v2844_v59 = vadd.f32 %v2828_v26, %v6877_v17  ;;  %v2848_v3 = vadd.f32 %v2832_v10, %v6887_v39 }
 0x734   : > { %v2859_v23 = vmax.f32 %v2843_v58, 0.0  ;;  %v2863_v54 = vmax.f32 %v2847_v43, 0.0  ;;  %v2845_v2 = vadd.f32 %v2829_v40, %v6877_v17  ;;  %v2849_v53 = vadd.f32 %v2833_v60, %v6887_v39 }
 0x735   : > { %v5754_v11 = vpack.c.bf16 %v2862_v44, %v2858_v4  ;;  %v2860_v9 = vmax.f32 %v2844_v59, 0.0  ;;  %v2864_v34 = vmax.f32 %v2848_v3, 0.0  ;;  %v2839_v62 = vmul.f32 %v2817_v55, %v6927_v46 }
 0x736   : > { %v5752_v49 = vpack.c.bf16 %v2863_v54, %v2859_v23  ;;  %v2861_v31 = vmax.f32 %v2845_v2, 0.0  ;;  %v2865_v57 = vmax.f32 %v2849_v53, 0.0  ;;  %v2851_v63 = vadd.f32 %v2835_v38, %v6945_v61 }
 0x737   : > { %v5762_v14 = vpack.c.bf16 %v2864_v34, %v2860_v9  ;;  %v2855_v26 = vadd.f32 %v2839_v62, %v6948_v20  ;;  %v2837_v10 = vmul.f32 %v2825_v1, %v6912_v33  ;;  %v2841_v58 = vmul.f32 %v2825_v1, %v6927_v46 }
 0x738   : > { %5753 = vmatprep.subr.bf16.mxu0 %v5752_v49  ;;  %v5760_v43 = vpack.c.bf16 %v2865_v57, %v2861_v31  ;;  %v2867_v40 = vmax.f32 %v2851_v63, 0.0  ;;  %v2838_v4 = vmul.f32 %v2813_v0, %v6927_v46  ;;  %v2850_v59 = vadd.f32 %v2834_v18, %v6945_v61 }
 0x739   : > { %5755 = vmatpush1.bf16.msra.mxu0 %v5754_v11  ;;  %v2871_v23 = vmax.f32 %v2855_v26, 0.0  ;;  %v2853_v53 = vadd.f32 %v2837_v10, %v6945_v61  ;;  %v2857_v2 = vadd.f32 %v2841_v58, %v6948_v20  ;;  %v2836_v34 = vmul.f32 %v2821_v35, %v6912_v33 }
 0x73a   : > { %5761 = vmatprep.subr.bf16.mxu1 %v5760_v43  ;;  %v2854_v44 = vadd.f32 %v2838_v4, %v6948_v20  ;;  %v2866_v55 = vmax.f32 %v2850_v59, 0.0  ;;  %v2840_v49 = vmul.f32 %v2821_v35, %v6927_v46  ;;  %v3048_v31 = vmul.f32 %v7173_v24, %v6567_v50 }
 0x73b   : > { %5763 = vmatpush1.bf16.msra.mxu1 %v5762_v14  ;;  %v5756_v0 = vpack.c.bf16 %v2871_v23, %v2867_v40  ;;  %v2869_v57 = vmax.f32 %v2853_v53, 0.0  ;;  %v2873_v11 = vmax.f32 %v2857_v2, 0.0  ;;  %v2852_v18 = vadd.f32 %v2836_v34, %v6945_v61 }
 0x73c   : > { %v2870_v1 = vmax.f32 %v2854_v44, 0.0  ;;  %v2856_v38 = vadd.f32 %v2840_v49, %v6948_v20  ;;  %v3046_v60 = vmul.f32 %v7191_v15, %v6563_v48  ;;  %v3050_v3 = vmul.f32 %v7191_v15, %v6567_v50 }
 0x73d   : > { %5757 = vmatprep.subr.bf16.mxu0 %v5756_v0  ;;  %v5764_v35 = vpack.c.bf16 %v2873_v11, %v2869_v57  ;;  %v2868_v54 = vmax.f32 %v2852_v18, 0.0  ;;  %v3063_v24 = vadd.f32 %v7241_v47, %v6579_v8  ;;  %v3067_v9 = vadd.f32 %v7247_v22, %v6583_v13 }
 0x73e   : > { %v5758_v62 = vpack.c.bf16 %v2870_v1, %v2866_v55  ;;  %v2872_v63 = vmax.f32 %v2856_v38, 0.0  ;;  %v3060_v14 = vadd.f32 %v7251_v30, %v6579_v8  ;;  %v3064_v26 = vadd.f32 %v3048_v31, %v6583_v13  ;;  %v7327_v31 = vld [vmem:[%s7951_s4 + $0x8] sm:$0xff] }
 0x73f   : > { %5765 = vmatprep.subr.bf16.mxu1 %v5764_v35  ;;  %v8165_v10 = vmax.f32 %v7182_v37, 0.0  ;;  %v8166_v15 = vmax.f32 %v7185_v5, 0.0  ;;  %v3070_v43 = vmax.f32 %v7222_v42, 0.0  ;;  %v3077_v47 = vmax.f32 %v7232_v41, 0.0 }
 0x740   : > { %v3081_v40 = vmax.f32 %v7237_v45, 0.0  ;;  %5759 = vmatpush1.bf16.msra.mxu0 %v5758_v62  ;;  %v5766_v22 = vpack.c.bf16 %v2872_v63, %v2868_v54  ;;  %v3074_v4 = vmax.f32 %v7229_v52, 0.0  ;;  %v3062_v30 = vadd.f32 %v3046_v60, %v6579_v8 }
 0x741   : > { %v5768_v58 = vpack.c.bf16 %v8166_v15, %v8165_v10  ;;  %v3066_v59 = vadd.f32 %v3050_v3, %v6583_v13  ;;  %v8167_v37 = vmax.f32 %v7202_v12, 0.0  ;;  %v8168_v5 = vmax.f32 %v7205_v51, 0.0 }
 0x742   : > { %v3079_v53 = vmax.f32 %v3063_v24, 0.0  ;;  %v3083_v42 = vmax.f32 %v3067_v9, 0.0  ;;  %5767 = vmatpush1.bf16.msra.mxu1 %v5766_v22  ;;  %v8169_v41 = vmax.f32 %v7210_v6, 0.0  ;;  %v8170_v45 = vmax.f32 %v7213_v21, 0.0 }
 0x743   : > { %5769 = vmatprep.subr.bf16.mxu0 %v5768_v58  ;;  %v5776_v23 = vpack.c.bf16 %v8168_v5, %v8167_v37  ;;  %v3076_v34 = vmax.f32 %v3060_v14, 0.0  ;;  %v3080_v52 = vmax.f32 %v3064_v26, 0.0  ;;  %5436 = vmatmul.mubr.msk.f32.vlgmr.msra.gmra.mrb[0].mxu0 %vm1029_vm2, %v6986_v27  ;;  %v5772_v44 = vpack.c.bf16 %v3081_v40, %v3077_v47 }
 0x744   : > { %v5770_v2 = vpack.c.bf16 %v8170_v45, %v8169_v41  ;;  %v5778_v12 = vpack.c.bf16 %v3074_v4, %v3070_v43  ;;  %v3078_v55 = vmax.f32 %v3062_v30, 0.0  ;;  %v3082_v51 = vmax.f32 %v3066_v59, 0.0  ;;  %3148 = vmatprep.mubr.f32.mxu0 %v8113_v16 }
 0x745   : > { %5777 = vmatprep.subr.bf16.mxu1 %v5776_v23  ;;  %5437 = vmatmul.mubr.msk.f32.vlgmr.msra.gmra.mrb[0].mxu1 %vm1029_vm2, %v6986_v27  ;;  %v5780_v6 = vpack.c.bf16 %v3083_v42, %v3079_v53  ;;  %v5774_v21 = vpack.c.bf16 %v3080_v52, %v3076_v34 }
 0x746   : > { %5771 = vmatpush1.bf16.msra.mxu0 %v5770_v2  ;;  %5779 = vmatpush1.bf16.msra.mxu1 %v5778_v12  ;;  %v5782_v49 = vpack.c.bf16 %v3082_v51, %v3078_v55  ;;  %v8171_v51 = vld [vmem:[#allocation14_spill] sm:$0xff] }
 0x747   : > { %5773 = vmatprep.subr.bf16.mxu0 %v5772_v44  ;;  %3219 = vmatprep.mubr.f32.mxu1 %v8113_v16 }
 0x748   : > { %5781 = vmatprep.subr.bf16.mxu1 %v5780_v6 }
 0x74a   : > { %5775 = vmatpush1.bf16.msra.mxu0 %v5774_v21  ;;  %5783 = vmatpush1.bf16.msra.mxu1 %v5782_v49  ;;  %v8172_v49 = vld [vmem:[#allocation15_spill] sm:$0xff] }
 0x74d   : > { %5438 = vmatmul.mubr.msk.f32.vlgmr.msra.gmra.mrb[18].mxu0 %vm1029_vm2, %v7327_v31  ;;  %5439 = vmatmul.mubr.msk.f32.vlgmr.msra.gmra.mrb[18].mxu1 %vm1029_vm2, %v7327_v31 }
 0x74e   : > { %3390 = vmatprep.mubr.f32.mxu0 %v8113_v16  ;;  %3461 = vmatprep.mubr.f32.mxu1 %v8113_v16 }
 0x820   : > { %v3150_v27 = vpop.f32.mrb[18].mxu0  ;;  %v3221_v11 = vpop.f32.mrb[18].mxu1 }
 0x821   : > { %v3151_v0 = vadd.f32 %v3150_v27, %v6608_v56  ;;  %v3152_v57 = vpop.f32.mrb[19].mxu0  ;;  %v3222_v60 = vadd.f32 %v3221_v11, %v6608_v56  ;;  %v3223_v3 = vpop.f32.mrb[19].mxu1 }
 0x822   : > { %v3153_v18 = vadd.f32 %v3152_v57, %v6608_v56  ;;  %v3224_v24 = vadd.f32 %v3223_v3, %v6608_v56  ;;  %v8173_v57 = vld [vmem:[#allocation20_spill] sm:$0xff] }
 0x823   : > { %v3230_v1 = vrot.slane %v3151_v0, 4  ;;  %v7338_v38 = vadd.f32 %v7163_v36, %v3151_v0  ;;  %v3242_v62 = vrot.slane %v3222_v60, 4  ;;  %v7346_v63 = vadd.f32 %v7176_v7, %v3222_v60 }
 0x824   : > { %v3236_v35 = vrot.slane %v3153_v18, 4  ;;  %v7342_v54 = vadd.f32 %v7168_v28, %v3153_v18  ;;  %v3248_v26 = vrot.slane %v3224_v24, 4  ;;  %v7349_v10 = vadd.f32 %v7179_v19, %v3224_v24 }
 0x825   : > { %v3231_v9 = vadd.f32 %v3230_v1, %v3151_v0  ;;  %v3243_v15 = vadd.f32 %v3242_v62, %v3222_v60  ;;  %v7352_v19 = vsub.s32 7, %v6524_v25  ;;  %v8175_v60 = vld [vmem:[#allocation25_spill] sm:$0xff] }
 0x826   : > { %v3237_v14 = vadd.f32 %v3236_v35, %v3153_v18  ;;  %v3249_v43 = vadd.f32 %v3248_v26, %v3224_v24  ;;  %v8174_v18 = vld [vmem:[#allocation21_spill] sm:$0xff] }
 0x827   : > { %v3232_v36 = vrot.slane %v3231_v9, 2  ;;  %v3244_v40 = vrot.slane %v3243_v15, 2 }
 0x828   : > { %v3238_v58 = vrot.slane %v3237_v14, 2  ;;  %v3250_v22 = vrot.slane %v3249_v43, 2 }
 0x829   : > { %v3233_v47 = vadd.f32 %v3232_v36, %v3231_v9  ;;  %v3245_v30 = vadd.f32 %v3244_v40, %v3243_v15  ;;  %v8177_v36 = vld [vmem:[#allocation23_spill] sm:$0xff] }
 0x82a   : > { %v3239_v28 = vadd.f32 %v3238_v58, %v3237_v14  ;;  %v3251_v37 = vadd.f32 %v3250_v22, %v3249_v43  ;;  %v8176_v14 = vld [vmem:[#allocation22_spill] sm:$0xff] }
 0x82b   : > { %v3234_v4 = vrot.slane %v3233_v47, 1  ;;  %v3246_v7 = vrot.slane %v3245_v30, 1 }
 0x82c   : > { %v3240_v59 = vrot.slane %v3239_v28, 1  ;;  %v3252_v53 = vrot.slane %v3251_v37, 1 }
 0x82d   : > { %v3235_v5 = vadd.f32 %v3234_v4, %v3233_v47  ;;  %v3247_v41 = vadd.f32 %v3246_v7, %v3245_v30 }
 0x82e   : > { %v3241_v23 = vadd.f32 %v3240_v59, %v3239_v28  ;;  %v3253_v2 = vadd.f32 %v3252_v53, %v3251_v37 }
 0x82f   : > { %v3254_v42 = vmul.f32 0.125, %v3235_v5  ;;  %v3256_v52 = vmul.f32 0.125, %v3247_v41 }
 0x830   : > { %v3255_v45 = vmul.f32 0.125, %v3241_v23  ;;  %v3257_v12 = vmul.f32 0.125, %v3253_v2  ;;  %v8178_v2 = vld [vmem:[#allocation26_spill] sm:$0xff] }
 0x831   : > { %v7355_v34 = vadd.f32 %v3254_v42, %v6533_v29  ;;  %v7363_v6 = vadd.f32 %v3256_v52, %v8171_v51 }
 0x832   : > { %v7358_v44 = vadd.f32 %v3255_v45, %v6539_v32  ;;  %v7368_v27 = vadd.f32 %v3257_v12, %v8172_v49 }
 0x833   : > { %v3265_v55 = vrot.slane %v7355_v34, %v7352_v19  ;;  %v3273_v0 = vrot.slane %v7363_v6, %v7352_v19 }
 0x834   : > { %v3269_v21 = vrot.slane %v7358_v44, %v7352_v19  ;;  %v3277_v35 = vrot.slane %v7368_v27, %v7352_v19 }
 0x835   : > { %v3278_v11 = vmul.f32 %v3265_v55, %v8173_v57  ;;  %v3282_v1 = vmul.f32 %v3265_v55, %v8174_v18  ;;  %v3286_v3 = vmul.f32 %v3265_v55, %v8175_v60  ;;  %v3280_v58 = vmul.f32 %v3273_v0, %v8173_v57 }
 0x836   : > { %v3279_v24 = vmul.f32 %v3269_v21, %v8173_v57  ;;  %v3283_v9 = vmul.f32 %v3269_v21, %v8174_v18  ;;  %v3287_v62 = vmul.f32 %v3269_v21, %v8175_v60  ;;  %v3284_v43 = vmul.f32 %v3273_v0, %v8174_v18 }
 0x837   : > { %v3294_v26 = vadd.f32 %v3278_v11, %v8176_v14  ;;  %v3298_v15 = vadd.f32 %v3282_v1, %v8177_v36  ;;  %v3281_v28 = vmul.f32 %v3277_v35, %v8173_v57  ;;  %v3285_v22 = vmul.f32 %v3277_v35, %v8174_v18 }
 0x838   : > { %v3295_v47 = vadd.f32 %v3279_v24, %v8176_v14  ;;  %v3299_v40 = vadd.f32 %v3283_v9, %v8177_v36  ;;  %v3296_v59 = vadd.f32 %v3280_v58, %v8176_v14  ;;  %v3300_v37 = vadd.f32 %v3284_v43, %v8177_v36  ;;  %v8179_v24 = vld [vmem:[#allocation27_spill] sm:$0xff] }
 0x839   : > { %v3310_v4 = vmax.f32 %v3294_v26, 0.0  ;;  %v3314_v30 = vmax.f32 %v3298_v15, 0.0  ;;  %v3297_v23 = vadd.f32 %v3281_v28, %v8176_v14  ;;  %v3301_v53 = vadd.f32 %v3285_v22, %v8177_v36  ;;  %v8180_v15 = vld [vmem:[#allocation28_spill] sm:$0xff] }
 0x83a   : > { %v3311_v5 = vmax.f32 %v3295_v47, 0.0  ;;  %v3315_v7 = vmax.f32 %v3299_v40, 0.0  ;;  %v3312_v41 = vmax.f32 %v3296_v59, 0.0  ;;  %v3316_v45 = vmax.f32 %v3300_v37, 0.0 }
 0x83b   : > { %v5786_v42 = vpack.c.bf16 %v3314_v30, %v3310_v4  ;;  %v3291_v52 = vmul.f32 %v3269_v21, %v8178_v2  ;;  %v3313_v11 = vmax.f32 %v3297_v23, 0.0  ;;  %v3317_v1 = vmax.f32 %v3301_v53, 0.0 }
 0x83c   : > { %v5784_v12 = vpack.c.bf16 %v3315_v7, %v3311_v5  ;;  %v3303_v9 = vadd.f32 %v3287_v62, %v8179_v24  ;;  %v5794_v26 = vpack.c.bf16 %v3316_v45, %v3312_v41  ;;  %v3289_v43 = vmul.f32 %v3277_v35, %v8175_v60 }
 0x83d   : > { %v3307_v58 = vadd.f32 %v3291_v52, %v8180_v15  ;;  %v3293_v47 = vmul.f32 %v3277_v35, %v8178_v2  ;;  %v5792_v40 = vpack.c.bf16 %v3317_v1, %v3313_v11  ;;  %v3290_v22 = vmul.f32 %v3265_v55, %v8178_v2 }
 0x83e   : > { %5785 = vmatprep.subr.bf16.mxu0 %v5784_v12  ;;  %v3319_v28 = vmax.f32 %v3303_v9, 0.0  ;;  %v3302_v4 = vadd.f32 %v3286_v3, %v8179_v24  ;;  %v3305_v30 = vadd.f32 %v3289_v43, %v8179_v24  ;;  %v3288_v59 = vmul.f32 %v3273_v0, %v8175_v60  ;;  %v8182_v9 = vld [vmem:[#allocation30_spill] sm:$0xff] }
 0x83f   : > { %5787 = vmatpush1.bf16.msra.mxu0 %v5786_v42  ;;  %v3323_v21 = vmax.f32 %v3307_v58, 0.0  ;;  %v3309_v62 = vadd.f32 %v3293_v47, %v8180_v15  ;;  %5793 = vmatprep.subr.bf16.mxu1 %v5792_v40  ;;  %v3306_v37 = vadd.f32 %v3290_v22, %v8180_v15  ;;  %v3292_v35 = vmul.f32 %v3273_v0, %v8178_v2  ;;  %v7409_v0 = vld [vmem:[%s7951_s4] sm:$0xff] }
 0x840   : > { %v3318_v5 = vmax.f32 %v3302_v4, 0.0  ;;  %5795 = vmatpush1.bf16.msra.mxu1 %v5794_v26  ;;  %v3321_v23 = vmax.f32 %v3305_v30, 0.0  ;;  %v3304_v3 = vadd.f32 %v3288_v59, %v8179_v24  ;;  %8181 = vst [vmem:[#allocation40_spill] sm:$0xff] %v7409_v0 }
 0x841   : > { %v5788_v7 = vpack.c.bf16 %v3323_v21, %v3319_v28  ;;  %v3325_v55 = vmax.f32 %v3309_v62, 0.0  ;;  %v3322_v53 = vmax.f32 %v3306_v37, 0.0  ;;  %v3308_v42 = vadd.f32 %v3292_v35, %v8180_v15 }
 0x842   : > { %v3320_v45 = vmax.f32 %v3304_v3, 0.0 }
 0x843   : > { %5789 = vmatprep.subr.bf16.mxu0 %v5788_v7  ;;  %v5796_v41 = vpack.c.bf16 %v3325_v55, %v3321_v23  ;;  %v5790_v52 = vpack.c.bf16 %v3322_v53, %v3318_v5  ;;  %v3324_v12 = vmax.f32 %v3308_v42, 0.0 }
 0x845   : > { %5797 = vmatprep.subr.bf16.mxu1 %v5796_v41  ;;  %5791 = vmatpush1.bf16.msra.mxu0 %v5790_v52  ;;  %v5798_v11 = vpack.c.bf16 %v3324_v12, %v3320_v45 }
 0x847   : > { %5799 = vmatpush1.bf16.msra.mxu1 %v5798_v11 }
 0x848   : > { %5440 = vmatmul.mubr.msk.f32.vlgmr.msra.gmra.mrb[20].mxu0 %vm1029_vm2, %v7409_v0 }
 0x849   : > { %3632 = vmatprep.mubr.f32.mxu0 %v8113_v16 }
 0x84a   : > { %5441 = vmatmul.mubr.msk.f32.vlgmr.msra.gmra.mrb[20].mxu1 %vm1029_vm2, %v7409_v0 }
 0x84b   : > { %3703 = vmatprep.mubr.f32.mxu1 %v8113_v16 }
 0x91b   : > { %v3392_v1 = vpop.f32.mrb[20].mxu0 }
 0x91c   : > { %v3393_v26 = vadd.f32 %v3392_v1, %v8182_v9  ;;  %v3394_v58 = vpop.f32.mrb[21].mxu0 }
 0x91d   : > { %v3463_v43 = vpop.f32.mrb[20].mxu1  ;;  %v3395_v47 = vadd.f32 %v3394_v58, %v8182_v9 }
 0x91e   : > { %v3472_v40 = vrot.slane %v3393_v26, 4  ;;  %v7420_v28 = vadd.f32 %v7338_v38, %v3393_v26  ;;  %v3464_v22 = vadd.f32 %v3463_v43, %v8182_v9  ;;  %v3465_v4 = vpop.f32.mrb[21].mxu1 }
 0x91f   : > { %v3478_v21 = vrot.slane %v3395_v47, 4  ;;  %v7424_v30 = vadd.f32 %v7342_v54, %v3395_v47  ;;  %v3466_v62 = vadd.f32 %v3465_v4, %v8182_v9 }
 0x920   : > { %v3473_v59 = vadd.f32 %v3472_v40, %v3393_v26  ;;  %v3484_v37 = vrot.slane %v3464_v22, 4  ;;  %v7428_v5 = vadd.f32 %v7346_v63, %v3464_v22 }
 0x921   : > { %v3479_v35 = vadd.f32 %v3478_v21, %v3395_v47  ;;  %v3490_v7 = vrot.slane %v3466_v62, 4  ;;  %v7431_v23 = vadd.f32 %v7349_v10, %v3466_v62  ;;  %v3506_v10 = vsub.s32 6, %v6524_v25 }
 0x922   : > { %v3474_v38 = vrot.slane %v3473_v59, 2  ;;  %v3485_v55 = vadd.f32 %v3484_v37, %v3464_v22 }
 0x923   : > { %v3480_v3 = vrot.slane %v3479_v35, 2  ;;  %v3491_v53 = vadd.f32 %v3490_v7, %v3466_v62 }
 0x924   : > { %v3475_v42 = vadd.f32 %v3474_v38, %v3473_v59  ;;  %v3486_v41 = vrot.slane %v3485_v55, 2 }
 0x925   : > { %v3481_v54 = vadd.f32 %v3480_v3, %v3479_v35  ;;  %v3492_v45 = vrot.slane %v3491_v53, 2 }
 0x926   : > { %v3476_v52 = vrot.slane %v3475_v42, 1  ;;  %v3487_v12 = vadd.f32 %v3486_v41, %v3485_v55  ;;  %v8184_v41 = vld [vmem:[#allocation32_spill] sm:$0xff] }
 0x927   : > { %v3482_v11 = vrot.slane %v3481_v54, 1  ;;  %v3493_v1 = vadd.f32 %v3492_v45, %v3491_v53  ;;  %v8183_v53 = vld [vmem:[#allocation31_spill] sm:$0xff]  ;;  %v8185_v45 = vld [vmem:[#allocation36_spill] sm:$0xff] }
 0x928   : > { %v3477_v26 = vadd.f32 %v3476_v52, %v3475_v42  ;;  %v3488_v63 = vrot.slane %v3487_v12, 1 }
 0x929   : > { %v3483_v58 = vadd.f32 %v3482_v11, %v3481_v54  ;;  %v3494_v43 = vrot.slane %v3493_v1, 1 }
 0x92a   : > { %v3496_v47 = vmul.f32 0.125, %v3477_v26  ;;  %v3489_v40 = vadd.f32 %v3488_v63, %v3487_v12 }
 0x92b   : > { %v3497_v4 = vmul.f32 0.125, %v3483_v58  ;;  %v3495_v22 = vadd.f32 %v3494_v43, %v3493_v1  ;;  %v8186_v1 = vld [vmem:[#allocation33_spill] sm:$0xff] }
 0x92c   : > { %v3500_v21 = vadd.f32 %v3496_v47, %v6533_v29  ;;  %v3498_v62 = vmul.f32 0.125, %v3489_v40 }
 0x92d   : > { %v3501_v59 = vadd.f32 %v3497_v4, %v6539_v32  ;;  %v3499_v37 = vmul.f32 0.125, %v3495_v22 }
 0x92e   : > { %v3507_v35 = vrot.slane %v3500_v21, %v3506_v10  ;;  %v3502_v7 = vadd.f32 %v3498_v62, %v8171_v51  ;;  %v8187_v51 = vld [vmem:[#allocation34_spill] sm:$0xff] }
 0x92f   : > { %v3511_v38 = vrot.slane %v3501_v59, %v3506_v10  ;;  %v3503_v55 = vadd.f32 %v3499_v37, %v8172_v49 }
 0x930   : > { %v3515_v3 = vrot.slane %v3502_v7, %v3506_v10  ;;  %v3520_v42 = vmul.f32 %v3507_v35, %v8183_v53  ;;  %v3524_v54 = vmul.f32 %v3507_v35, %v8184_v41  ;;  %v3528_v52 = vmul.f32 %v3507_v35, %v8185_v45 }
 0x931   : > { %v3519_v12 = vrot.slane %v3503_v55, %v3506_v10  ;;  %v3521_v29 = vmul.f32 %v3511_v38, %v8183_v53  ;;  %v3525_v11 = vmul.f32 %v3511_v38, %v8184_v41  ;;  %v3529_v32 = vmul.f32 %v3511_v38, %v8185_v45 }
 0x932   : > { %v3536_v26 = vadd.f32 %v3520_v42, %v8186_v1  ;;  %v3540_v63 = vadd.f32 %v3524_v54, %v8187_v51  ;;  %v3522_v49 = vmul.f32 %v3515_v3, %v8183_v53  ;;  %v3526_v58 = vmul.f32 %v3515_v3, %v8184_v41 }
 0x933   : > { %v3537_v43 = vadd.f32 %v3521_v29, %v8186_v1  ;;  %v3541_v47 = vadd.f32 %v3525_v11, %v8187_v51  ;;  %v3523_v10 = vmul.f32 %v3519_v12, %v8183_v53  ;;  %v3527_v40 = vmul.f32 %v3519_v12, %v8184_v41  ;;  %v8188_v11 = vld [vmem:[#allocation37_spill] sm:$0xff] }
 0x934   : > { %v3552_v4 = vmax.f32 %v3536_v26, 0.0  ;;  %v3556_v22 = vmax.f32 %v3540_v63, 0.0  ;;  %v3538_v21 = vadd.f32 %v3522_v49, %v8186_v1  ;;  %v3542_v62 = vadd.f32 %v3526_v58, %v8187_v51  ;;  %v8189_v26 = vld [vmem:[#allocation38_spill] sm:$0xff]  ;;  %v8190_v49 = vld [vmem:[#allocation39_spill] sm:$0xff] }
 0x935   : > { %v3553_v59 = vmax.f32 %v3537_v43, 0.0  ;;  %v3557_v37 = vmax.f32 %v3541_v47, 0.0  ;;  %v3539_v7 = vadd.f32 %v3523_v10, %v8186_v1  ;;  %v3543_v55 = vadd.f32 %v3527_v40, %v8187_v51 }
 0x936   : > { %v5802_v42 = vpack.c.bf16 %v3556_v22, %v3552_v4  ;;  %v3554_v54 = vmax.f32 %v3538_v21, 0.0  ;;  %v3558_v29 = vmax.f32 %v3542_v62, 0.0  ;;  %v3533_v25 = vmul.f32 %v3511_v38, %v8188_v11 }
 0x937   : > { %v5800_v53 = vpack.c.bf16 %v3557_v37, %v3553_v59  ;;  %v3555_v9 = vmax.f32 %v3539_v7, 0.0  ;;  %v3559_v41 = vmax.f32 %v3543_v55, 0.0  ;;  %v3545_v63 = vadd.f32 %v3529_v32, %v8189_v26 }
 0x938   : > { %v5810_v0 = vpack.c.bf16 %v3558_v29, %v3554_v54  ;;  %v3549_v15 = vadd.f32 %v3533_v25, %v8190_v49  ;;  %v3531_v58 = vmul.f32 %v3519_v12, %v8185_v45  ;;  %v3535_v43 = vmul.f32 %v3519_v12, %v8188_v11  ;;  %v8193_v54 = vld [vmem:[#allocation18_spill] sm:$0xff] }
 0x939   : > { %5801 = vmatprep.subr.bf16.mxu0 %v5800_v53  ;;  %v5808_v47 = vpack.c.bf16 %v3559_v41, %v3555_v9  ;;  %v3561_v10 = vmax.f32 %v3545_v63, 0.0  ;;  %v3532_v40 = vmul.f32 %v3507_v35, %v8188_v11  ;;  %v3544_v4 = vadd.f32 %v3528_v52, %v8189_v26 }
 0x93a   : > { %5803 = vmatpush1.bf16.msra.mxu0 %v5802_v42  ;;  %v3565_v38 = vmax.f32 %v3549_v15, 0.0  ;;  %v3547_v22 = vadd.f32 %v3531_v58, %v8189_v26  ;;  %v3551_v32 = vadd.f32 %v3535_v43, %v8190_v49  ;;  %v3530_v21 = vmul.f32 %v3515_v3, %v8185_v45  ;;  %v8194_v58 = vld [vmem:[#allocation41_spill] sm:$0xff] }
 0x93b   : > { %5809 = vmatprep.subr.bf16.mxu1 %v5808_v47  ;;  %v3548_v25 = vadd.f32 %v3532_v40, %v8190_v49  ;;  %v3560_v62 = vmax.f32 %v3544_v4, 0.0  ;;  %v3534_v53 = vmul.f32 %v3515_v3, %v8188_v11  ;;  %v8192_v3 = vld [vmem:[#allocation29_spill] sm:$0xff] }
 0x93c   : > { %5811 = vmatpush1.bf16.msra.mxu1 %v5810_v0  ;;  %v5804_v9 = vpack.c.bf16 %v3565_v38, %v3561_v10  ;;  %v3563_v41 = vmax.f32 %v3547_v22, 0.0  ;;  %v3567_v35 = vmax.f32 %v3551_v32, 0.0  ;;  %v3546_v52 = vadd.f32 %v3530_v21, %v8189_v26  ;;  %v7473_v0 = vld [vmem:[%s7955_s8] sm:$0xff]  ;;  %v8196_v22 = vld [vmem:[#allocation8_spill] sm:$0xff] }
 0x93d   : > { %v3564_v12 = vmax.f32 %v3548_v25, 0.0  ;;  %v3550_v15 = vadd.f32 %v3534_v53, %v8190_v49  ;;  %8191 = vst [vmem:[#allocation14_spill] sm:$0xff] %v7473_v0  ;;  %v3963_v29 = vrot.slane %v8193_v54, %v8192_v3  ;;  %v8195_v10 = vld [vmem:[#allocation19_spill] sm:$0xff] }
 0x93e   : > { %5805 = vmatprep.subr.bf16.mxu0 %v5804_v9  ;;  %v5812_v59 = vpack.c.bf16 %v3567_v35, %v3563_v41  ;;  %v3562_v37 = vmax.f32 %v3546_v52, 0.0  ;;  %v7486_v40 = vrot.slane %v8195_v10, %v8192_v3  ;;  %v8197_v9 = vld [vmem:[#allocation12_spill] sm:$0xff] }
 0x93f   : > { %v5806_v7 = vpack.c.bf16 %v3564_v12, %v3560_v62  ;;  %v3566_v55 = vmax.f32 %v3550_v15, 0.0  ;;  %v3973_v32 = vmul.f32 %v3963_v29, %v8196_v22  ;;  %v3977_v41 = vmul.f32 %v3963_v29, %v8197_v9  ;;  %v8198_v15 = vld [vmem:[#allocation16_spill] sm:$0xff] }
 0x940   : > { %5813 = vmatprep.subr.bf16.mxu1 %v5812_v59  ;;  %v7501_v59 = vrot.slane %v8198_v15, %v8192_v3 }
 0x941   : > { %5807 = vmatpush1.bf16.msra.mxu0 %v5806_v7  ;;  %v5814_v42 = vpack.c.bf16 %v3566_v55, %v3562_v37 }
 0x943   : > { %5815 = vmatpush1.bf16.msra.mxu1 %v5814_v42 }
 0x944   : > { %5442 = vmatmul.mubr.msk.f32.vlgmr.msra.gmra.mrb[22].mxu0 %vm1029_vm2, %v7473_v0 }
 0x945   : > { %3874 = vmatprep.mubr.f32.mxu0 %v8113_v16 }
 0x946   : > { %5443 = vmatmul.mubr.msk.f32.vlgmr.msra.gmra.mrb[22].mxu1 %vm1029_vm2, %v7473_v0 }
 0x947   : > { %3945 = vmatprep.mubr.f32.mxu1 %v8113_v16 }
 0xa17   : > { %v3634_v63 = vpop.f32.mrb[22].mxu0 }
 0xa18   : > { %v3635_v43 = vadd.f32 %v3634_v63, %v8194_v58  ;;  %v3636_v47 = vpop.f32.mrb[23].mxu0 }
 0xa19   : > { %v3705_v4 = vpop.f32.mrb[22].mxu1  ;;  %v3637_v38 = vadd.f32 %v3636_v47, %v8194_v58  ;;  %v8199_v47 = vld [vmem:[#allocation9_spill] sm:$0xff] }
 0xa1a   : > { %v3714_v21 = vrot.slane %v3635_v43, 4  ;;  %v7491_v25 = vadd.f32 %v7420_v28, %v3635_v43  ;;  %v3706_v62 = vadd.f32 %v3705_v4, %v8194_v58  ;;  %v3707_v53 = vpop.f32.mrb[23].mxu1  ;;  %v7510_v4 = vadd.f32 %v3973_v32, %v8199_v47 }
 0xa1b   : > { %v3720_v35 = vrot.slane %v3637_v38, 4  ;;  %v7496_v52 = vadd.f32 %v7424_v30, %v3637_v38  ;;  %v3708_v12 = vadd.f32 %v3707_v53, %v8194_v58  ;;  %v8200_v53 = vld [vmem:[#allocation13_spill] sm:$0xff] }
 0xa1c   : > { %v3715_v37 = vadd.f32 %v3714_v21, %v3635_v43  ;;  %v3726_v7 = vrot.slane %v3706_v62, 4  ;;  %v7504_v28 = vadd.f32 %v7428_v5, %v3706_v62  ;;  %v7513_v58 = vadd.f32 %v3977_v41, %v8200_v53  ;;  %v8201_v21 = vld [vmem:[#allocation17_spill] sm:$0xff] }
 0xa1d   : > { %v3721_v55 = vadd.f32 %v3720_v35, %v3637_v38  ;;  %v3732_v42 = vrot.slane %v3708_v12, 4  ;;  %v7507_v63 = vadd.f32 %v7431_v23, %v3708_v12  ;;  %v3975_v43 = vmul.f32 %v7486_v40, %v8196_v22 }
 0xa1e   : > { %v3716_v30 = vrot.slane %v3715_v37, 2  ;;  %v3727_v0 = vadd.f32 %v3726_v7, %v3706_v62  ;;  %v7519_v5 = vrot.slane %v8201_v21, %v8192_v3  ;;  %v3979_v23 = vmul.f32 %v7486_v40, %v8197_v9 }
 0xa1f   : > { %v3722_v38 = vrot.slane %v3721_v55, 2  ;;  %v3733_v35 = vadd.f32 %v3732_v42, %v3708_v12  ;;  %v3972_v62 = vmul.f32 %v7501_v59, %v8196_v22  ;;  %v3976_v41 = vmul.f32 %v7501_v59, %v8197_v9 }
 0xa20   : > { %v3717_v49 = vadd.f32 %v3716_v30, %v3715_v37  ;;  %v3728_v32 = vrot.slane %v3727_v0, 2  ;;  %v7530_v12 = vadd.f32 %v3975_v43, %v8199_v47  ;;  %v7533_v30 = vadd.f32 %v3979_v23, %v8200_v53 }
 0xa21   : > { %v3723_v7 = vadd.f32 %v3722_v38, %v3721_v55  ;;  %v3734_v26 = vrot.slane %v3733_v35, 2  ;;  %v3974_v45 = vmul.f32 %v7519_v5, %v8196_v22  ;;  %v7538_v38 = vadd.f32 %v3972_v62, %v8199_v47 }
 0xa22   : > { %v3718_v51 = vrot.slane %v3717_v49, 1  ;;  %v3729_v3 = vadd.f32 %v3728_v32, %v3727_v0  ;;  %v7541_v0 = vadd.f32 %v3976_v41, %v8200_v53  ;;  %v3978_v43 = vmul.f32 %v7519_v5, %v8197_v9 }
 0xa23   : > { %v3724_v42 = vrot.slane %v3723_v7, 1  ;;  %v3735_v37 = vadd.f32 %v3734_v26, %v3733_v35  ;;  %v3981_v26 = vmul.f32 %v3963_v29, %v6563_v48  ;;  %v7550_v41 = vadd.f32 %v3974_v45, %v8199_v47 }
 0xa24   : > { %v3719_v24 = vadd.f32 %v3718_v51, %v3717_v49  ;;  %v3730_v55 = vrot.slane %v3729_v3, 1  ;;  %v3985_v51 = vmul.f32 %v3963_v29, %v6567_v50  ;;  %v7569_v47 = vmul.f32 %v7486_v40, %v6563_v48 }
 0xa25   : > { %v3725_v32 = vadd.f32 %v3724_v42, %v3723_v7  ;;  %v3736_v1 = vrot.slane %v3735_v37, 1 }
 0xa26   : > { %v3738_v35 = vmul.f32 0.125, %v3719_v24  ;;  %v3731_v23 = vadd.f32 %v3730_v55, %v3729_v3  ;;  %v7557_v55 = vadd.f32 %v3978_v43, %v8200_v53  ;;  %v7575_v53 = vmul.f32 %v7486_v40, %v6567_v50  ;;  %v8202_v43 = vld [vmem:[#allocation42_spill] sm:$0xff] }
 0xa27   : > { %v3739_v49 = vmul.f32 0.125, %v3725_v32  ;;  %v3737_v22 = vadd.f32 %v3736_v1, %v3735_v37  ;;  %v7560_v1 = vadd.f32 %v3981_v26, %v6579_v8  ;;  %v7579_v32 = vmul.f32 %v7501_v59, %v6563_v48 }
 0xa28   : > { %v3742_v7 = vadd.f32 %v3738_v35, %v7355_v34  ;;  %v3740_v42 = vmul.f32 0.125, %v3731_v23  ;;  %v7565_v34 = vadd.f32 %v3985_v51, %v6583_v13  ;;  %v8203_v35 = vld [vmem:[#allocation43_spill] sm:$0xff] }
 0xa29   : > { %v3743_v24 = vadd.f32 %v3739_v49, %v7358_v44  ;;  %v3741_v3 = vmul.f32 0.125, %v3737_v22 }
 0xa2a   : > { %v3749_v29 = vrot.slane %v3742_v7, %v7352_v19  ;;  %v3744_v45 = vadd.f32 %v3740_v42, %v7363_v6 }
 0xa2b   : > { %v3753_v44 = vrot.slane %v3743_v24, %v7352_v19  ;;  %v3745_v37 = vadd.f32 %v3741_v3, %v7368_v27 }
 0xa2c   : > { %v3757_v6 = vrot.slane %v3744_v45, %v7352_v19  ;;  %v3762_v26 = vmul.f32 %v3749_v29, %v8202_v43  ;;  %v3766_v23 = vmul.f32 %v3749_v29, %v8203_v35  ;;  %v3770_v51 = vmul.f32 %v3749_v29, %v6912_v33 }
 0xa2d   : > { %v3761_v49 = vrot.slane %v3745_v37, %v7352_v19  ;;  %v3763_v27 = vmul.f32 %v3753_v44, %v8202_v43  ;;  %v3767_v22 = vmul.f32 %v3753_v44, %v8203_v35  ;;  %v3771_v40 = vmul.f32 %v3753_v44, %v6912_v33 }
 0xa2e   : > { %v3778_v7 = vadd.f32 %v3762_v26, %v6877_v17  ;;  %v3782_v42 = vadd.f32 %v3766_v23, %v6887_v39  ;;  %v3764_v24 = vmul.f32 %v3757_v6, %v8202_v43  ;;  %v3768_v3 = vmul.f32 %v3757_v6, %v8203_v35 }
 0xa2f   : > { %v3779_v45 = vadd.f32 %v3763_v27, %v6877_v17  ;;  %v3783_v2 = vadd.f32 %v3767_v22, %v6887_v39  ;;  %v3765_v19 = vmul.f32 %v3761_v49, %v8202_v43  ;;  %v3769_v37 = vmul.f32 %v3761_v49, %v8203_v35 }
 0xa30   : > { %v3794_v9 = vmax.f32 %v3778_v7, 0.0  ;;  %v3798_v62 = vmax.f32 %v3782_v42, 0.0  ;;  %v3780_v11 = vadd.f32 %v3764_v24, %v6877_v17  ;;  %v3784_v26 = vadd.f32 %v3768_v3, %v6887_v39 }
 0xa31   : > { %v3795_v36 = vmax.f32 %v3779_v45, 0.0  ;;  %v3799_v23 = vmax.f32 %v3783_v2, 0.0  ;;  %v3781_v14 = vadd.f32 %v3765_v19, %v6877_v17  ;;  %v3785_v60 = vadd.f32 %v3769_v37, %v6887_v39 }
 0xa32   : > { %v5818_v18 = vpack.c.bf16 %v3798_v62, %v3794_v9  ;;  %v3796_v27 = vmax.f32 %v3780_v11, 0.0  ;;  %v3800_v57 = vmax.f32 %v3784_v26, 0.0  ;;  %v3775_v22 = vmul.f32 %v3753_v44, %v6927_v46 }
 0xa33   : > { %v5816_v43 = vpack.c.bf16 %v3799_v23, %v3795_v36  ;;  %v3797_v10 = vmax.f32 %v3781_v14, 0.0  ;;  %v3801_v35 = vmax.f32 %v3785_v60, 0.0  ;;  %v3787_v7 = vadd.f32 %v3771_v40, %v6945_v61 }
 0xa34   : > { %v5826_v42 = vpack.c.bf16 %v3800_v57, %v3796_v27  ;;  %v3791_v24 = vadd.f32 %v3775_v22, %v6948_v20  ;;  %v3773_v3 = vmul.f32 %v3761_v49, %v6912_v33  ;;  %v3777_v2 = vmul.f32 %v3761_v49, %v6927_v46 }
 0xa35   : > { %5817 = vmatprep.subr.bf16.mxu0 %v5816_v43  ;;  %v5824_v45 = vpack.c.bf16 %v3801_v35, %v3797_v10  ;;  %v3803_v19 = vmax.f32 %v3787_v7, 0.0  ;;  %v3774_v11 = vmul.f32 %v3749_v29, %v6927_v46  ;;  %v3786_v62 = vadd.f32 %v3770_v51, %v6945_v61 }
 0xa36   : > { %5819 = vmatpush1.bf16.msra.mxu0 %v5818_v18  ;;  %v3807_v36 = vmax.f32 %v3791_v24, 0.0  ;;  %v3789_v60 = vadd.f32 %v3773_v3, %v6945_v61  ;;  %v3793_v14 = vadd.f32 %v3777_v2, %v6948_v20  ;;  %v3772_v57 = vmul.f32 %v3757_v6, %v6912_v33 }
 0xa37   : > { %5825 = vmatprep.subr.bf16.mxu1 %v5824_v45  ;;  %v3790_v9 = vadd.f32 %v3774_v11, %v6948_v20  ;;  %v3802_v44 = vmax.f32 %v3786_v62, 0.0  ;;  %v3776_v43 = vmul.f32 %v3757_v6, %v6927_v46  ;;  %v3984_v10 = vmul.f32 %v7501_v59, %v6567_v50 }
 0xa38   : > { %5827 = vmatpush1.bf16.msra.mxu1 %v5826_v42  ;;  %v5820_v29 = vpack.c.bf16 %v3807_v36, %v3803_v19  ;;  %v3805_v35 = vmax.f32 %v3789_v60, 0.0  ;;  %v3809_v18 = vmax.f32 %v3793_v14, 0.0  ;;  %v3788_v51 = vadd.f32 %v3772_v57, %v6945_v61 }
 0xa39   : > { %v3806_v49 = vmax.f32 %v3790_v9, 0.0  ;;  %v3792_v40 = vadd.f32 %v3776_v43, %v6948_v20  ;;  %v3982_v37 = vmul.f32 %v7519_v5, %v6563_v48  ;;  %v3986_v26 = vmul.f32 %v7519_v5, %v6567_v50 }
 0xa3a   : > { %5821 = vmatprep.subr.bf16.mxu0 %v5820_v29  ;;  %v5828_v6 = vpack.c.bf16 %v3809_v18, %v3805_v35  ;;  %v3804_v23 = vmax.f32 %v3788_v51, 0.0  ;;  %v3999_v59 = vadd.f32 %v7569_v47, %v6579_v8  ;;  %v4003_v27 = vadd.f32 %v7575_v53, %v6583_v13 }
 0xa3b   : > { %v5822_v22 = vpack.c.bf16 %v3806_v49, %v3802_v44  ;;  %v3808_v7 = vmax.f32 %v3792_v40, 0.0  ;;  %v3996_v42 = vadd.f32 %v7579_v32, %v6579_v8  ;;  %v4000_v24 = vadd.f32 %v3984_v10, %v6583_v13 }
 0xa3c   : > { %5829 = vmatprep.subr.bf16.mxu1 %v5828_v6  ;;  %v8204_v48 = vmax.f32 %v7510_v4, 0.0  ;;  %v8205_v50 = vmax.f32 %v7513_v58, 0.0  ;;  %v4006_v3 = vmax.f32 %v7550_v41, 0.0  ;;  %v4013_v47 = vmax.f32 %v7560_v1, 0.0 }
 0xa3d   : > { %v4017_v2 = vmax.f32 %v7565_v34, 0.0  ;;  %5823 = vmatpush1.bf16.msra.mxu0 %v5822_v22  ;;  %v5830_v53 = vpack.c.bf16 %v3808_v7, %v3804_v23  ;;  %v4010_v45 = vmax.f32 %v7557_v55, 0.0  ;;  %v3998_v32 = vadd.f32 %v3982_v37, %v6579_v8  ;;  %v7649_v8 = vld [vmem:[%s7955_s8 + $0x8] sm:$0xff] }
 0xa3e   : > { %v5832_v5 = vpack.c.bf16 %v8205_v50, %v8204_v48  ;;  %v4002_v19 = vadd.f32 %v3986_v26, %v6583_v13  ;;  %v8206_v4 = vmax.f32 %v7530_v12, 0.0  ;;  %v8207_v58 = vmax.f32 %v7533_v30, 0.0 }
 0xa3f   : > { %v4015_v62 = vmax.f32 %v3999_v59, 0.0  ;;  %v4019_v41 = vmax.f32 %v4003_v27, 0.0  ;;  %5831 = vmatpush1.bf16.msra.mxu1 %v5830_v53  ;;  %v8208_v1 = vmax.f32 %v7538_v38, 0.0  ;;  %v8209_v34 = vmax.f32 %v7541_v0, 0.0 }
 0xa40   : > { %5833 = vmatprep.subr.bf16.mxu0 %v5832_v5  ;;  %v5840_v11 = vpack.c.bf16 %v8207_v58, %v8206_v4  ;;  %v4012_v60 = vmax.f32 %v3996_v42, 0.0  ;;  %v4016_v55 = vmax.f32 %v4000_v24, 0.0  ;;  %5444 = vmatmul.mubr.msk.f32.vlgmr.msra.gmra.mrb[0].mxu0 %vm1029_vm2, %v7649_v8  ;;  %v5836_v13 = vpack.c.bf16 %v4017_v2, %v4013_v47 }
 0xa41   : > { %v5834_v36 = vpack.c.bf16 %v8209_v34, %v8208_v1  ;;  %v5842_v12 = vpack.c.bf16 %v4010_v45, %v4006_v3  ;;  %v4014_v30 = vmax.f32 %v3998_v32, 0.0  ;;  %v4018_v14 = vmax.f32 %v4002_v19, 0.0  ;;  %4084 = vmatprep.mubr.f32.mxu0 %v8113_v16  ;;  %v8210_v34 = vld [vmem:[#allocation11_spill] sm:$0xff] }
 0xa42   : > { %5841 = vmatprep.subr.bf16.mxu1 %v5840_v11  ;;  %5445 = vmatmul.mubr.msk.f32.vlgmr.msra.gmra.mrb[0].mxu1 %vm1029_vm2, %v7649_v8  ;;  %v5844_v38 = vpack.c.bf16 %v4019_v41, %v4015_v62  ;;  %v5838_v0 = vpack.c.bf16 %v4016_v55, %v4012_v60 }
 0xa43   : > { %5835 = vmatpush1.bf16.msra.mxu0 %v5834_v36  ;;  %5843 = vmatpush1.bf16.msra.mxu1 %v5842_v12  ;;  %v5846_v57 = vpack.c.bf16 %v4018_v14, %v4014_v30  ;;  %v8212_v14 = vld [vmem:[#allocation20_spill] sm:$0xff] }
 0xa44   : > { %5837 = vmatprep.subr.bf16.mxu0 %v5836_v13  ;;  %4155 = vmatprep.mubr.f32.mxu1 %v8113_v16  ;;  %v8211_v13 = vld [vmem:[#allocation19_spill] sm:$0xff] }
 0xa45   : > { %5845 = vmatprep.subr.bf16.mxu1 %v5844_v38 }
 0xa47   : > { %5839 = vmatpush1.bf16.msra.mxu0 %v5838_v0  ;;  %5847 = vmatpush1.bf16.msra.mxu1 %v5846_v57  ;;  %v8213_v0 = vld [vmem:[#allocation21_spill] sm:$0xff] }
 0xa4a   : > { %5446 = vmatmul.mubr.msk.f32.vlgmr.msra.gmra.mrb[24].mxu0 %vm1029_vm2, %v7327_v31  ;;  %5447 = vmatmul.mubr.msk.f32.vlgmr.msra.gmra.mrb[24].mxu1 %vm1029_vm2, %v7327_v31 }
 0xa4b   : > { %4326 = vmatprep.mubr.f32.mxu0 %v8113_v16  ;;  %4397 = vmatprep.mubr.f32.mxu1 %v8113_v16 }
 0xb1d   : > { %v4086_v9 = vpop.f32.mrb[24].mxu0  ;;  %v4157_v10 = vpop.f32.mrb[24].mxu1 }
 0xb1e   : > { %v4087_v44 = vadd.f32 %v4086_v9, %v6608_v56  ;;  %v4088_v43 = vpop.f32.mrb[25].mxu0  ;;  %v4158_v51 = vadd.f32 %v4157_v10, %v6608_v56  ;;  %v4159_v49 = vpop.f32.mrb[25].mxu1  ;;  %v8214_v9 = vld [vmem:[#allocation25_spill] sm:$0xff] }
 0xb1f   : > { %v4089_v29 = vadd.f32 %v4088_v43, %v6608_v56  ;;  %v4160_v31 = vadd.f32 %v4159_v49, %v6608_v56 }
 0xb20   : > { %v4166_v35 = vrot.slane %v4087_v44, 4  ;;  %v7666_v18 = vadd.f32 %v7491_v25, %v4087_v44  ;;  %v4178_v6 = vrot.slane %v4158_v51, 4  ;;  %v7674_v23 = vadd.f32 %v7504_v28, %v4158_v51 }
 0xb21   : > { %v4172_v40 = vrot.slane %v4089_v29, 4  ;;  %v7670_v37 = vadd.f32 %v7496_v52, %v4089_v29  ;;  %v4184_v27 = vrot.slane %v4160_v31, 4  ;;  %v7677_v22 = vadd.f32 %v7507_v63, %v4160_v31 }
 0xb22   : > { %v4167_v26 = vadd.f32 %v4166_v35, %v4087_v44  ;;  %v4179_v7 = vadd.f32 %v4178_v6, %v4158_v51  ;;  %v8215_v51 = vld [vmem:[#allocation22_spill] sm:$0xff] }
 0xb23   : > { %v4173_v59 = vadd.f32 %v4172_v40, %v4089_v29  ;;  %v4185_v24 = vadd.f32 %v4184_v27, %v4160_v31  ;;  %v8216_v40 = vld [vmem:[#allocation23_spill] sm:$0xff] }
 0xb24   : > { %v4168_v25 = vrot.slane %v4167_v26, 2  ;;  %v4180_v50 = vrot.slane %v4179_v7, 2 }
 0xb25   : > { %v4174_v42 = vrot.slane %v4173_v59, 2  ;;  %v4186_v5 = vrot.slane %v4185_v24, 2 }
 0xb26   : > { %v4169_v48 = vadd.f32 %v4168_v25, %v4167_v26  ;;  %v4181_v56 = vadd.f32 %v4180_v50, %v4179_v7 }
 0xb27   : > { %v4175_v52 = vadd.f32 %v4174_v42, %v4173_v59  ;;  %v4187_v2 = vadd.f32 %v4186_v5, %v4185_v24 }
 0xb28   : > { %v4170_v3 = vrot.slane %v4169_v48, 1  ;;  %v4182_v28 = vrot.slane %v4181_v56, 1 }
 0xb29   : > { %v4176_v47 = vrot.slane %v4175_v52, 1  ;;  %v4188_v32 = vrot.slane %v4187_v2, 1 }
 0xb2a   : > { %v4171_v53 = vadd.f32 %v4170_v3, %v4169_v48  ;;  %v4183_v4 = vadd.f32 %v4182_v28, %v4181_v56  ;;  %v8217_v28 = vld [vmem:[#allocation26_spill] sm:$0xff] }
 0xb2b   : > { %v4177_v45 = vadd.f32 %v4176_v47, %v4175_v52  ;;  %v4189_v58 = vadd.f32 %v4188_v32, %v4187_v2 }
 0xb2c   : > { %v4190_v19 = vmul.f32 0.125, %v4171_v53  ;;  %v4192_v62 = vmul.f32 0.125, %v4183_v4 }
 0xb2d   : > { %v4191_v63 = vmul.f32 0.125, %v4177_v45  ;;  %v4193_v1 = vmul.f32 0.125, %v4189_v58 }
 0xb2e   : > { %v7680_v11 = vadd.f32 %v4190_v19, %v8198_v15  ;;  %v7688_v60 = vadd.f32 %v4192_v62, %v8201_v21 }
 0xb2f   : > { %v7683_v41 = vadd.f32 %v4191_v63, %v8193_v54  ;;  %v7693_v12 = vadd.f32 %v4193_v1, %v8211_v13  ;;  %v8218_v63 = vld [vmem:[#allocation27_spill] sm:$0xff]  ;;  %v8219_v1 = vld [vmem:[#allocation28_spill] sm:$0xff] }
 0xb30   : > { %v4201_v36 = vrot.slane %v7680_v11, %v8210_v34  ;;  %v4209_v30 = vrot.slane %v7688_v60, %v8210_v34 }
 0xb31   : > { %v4205_v55 = vrot.slane %v7683_v41, %v8210_v34  ;;  %v4213_v43 = vrot.slane %v7693_v12, %v8210_v34 }
 0xb32   : > { %v4214_v38 = vmul.f32 %v4201_v36, %v8212_v14  ;;  %v4218_v57 = vmul.f32 %v4201_v36, %v8213_v0  ;;  %v4222_v44 = vmul.f32 %v4201_v36, %v8214_v9  ;;  %v4216_v26 = vmul.f32 %v4209_v30, %v8212_v14 }
 0xb33   : > { %v4215_v10 = vmul.f32 %v4205_v55, %v8212_v14  ;;  %v4219_v29 = vmul.f32 %v4205_v55, %v8213_v0  ;;  %v4223_v35 = vmul.f32 %v4205_v55, %v8214_v9  ;;  %v4220_v6 = vmul.f32 %v4209_v30, %v8213_v0 }
 0xb34   : > { %v4230_v49 = vadd.f32 %v4214_v38, %v8215_v51  ;;  %v4234_v31 = vadd.f32 %v4218_v57, %v8216_v40  ;;  %v4217_v25 = vmul.f32 %v4213_v43, %v8212_v14  ;;  %v4221_v7 = vmul.f32 %v4213_v43, %v8213_v0 }
 0xb35   : > { %v4231_v59 = vadd.f32 %v4215_v10, %v8215_v51  ;;  %v4235_v27 = vadd.f32 %v4219_v29, %v8216_v40  ;;  %v4232_v48 = vadd.f32 %v4216_v26, %v8215_v51  ;;  %v4236_v50 = vadd.f32 %v4220_v6, %v8216_v40 }
 0xb36   : > { %v4246_v42 = vmax.f32 %v4230_v49, 0.0  ;;  %v4250_v24 = vmax.f32 %v4234_v31, 0.0  ;;  %v4233_v3 = vadd.f32 %v4217_v25, %v8215_v51  ;;  %v4237_v56 = vadd.f32 %v4221_v7, %v8216_v40 }
 0xb37   : > { %v4247_v52 = vmax.f32 %v4231_v59, 0.0  ;;  %v4251_v5 = vmax.f32 %v4235_v27, 0.0  ;;  %v4248_v2 = vmax.f32 %v4232_v48, 0.0  ;;  %v4252_v53 = vmax.f32 %v4236_v50, 0.0  ;;  %v8220_v50 = vld [vmem:[#allocation40_spill] sm:$0xff] }
 0xb38   : > { %v5850_v47 = vpack.c.bf16 %v4250_v24, %v4246_v42  ;;  %v4227_v45 = vmul.f32 %v4205_v55, %v8217_v28  ;;  %v4249_v19 = vmax.f32 %v4233_v3, 0.0  ;;  %v4253_v4 = vmax.f32 %v4237_v56, 0.0 }
 0xb39   : > { %v5848_v32 = vpack.c.bf16 %v4251_v5, %v4247_v52  ;;  %v4239_v58 = vadd.f32 %v4223_v35, %v8218_v63  ;;  %v5858_v62 = vpack.c.bf16 %v4252_v53, %v4248_v2  ;;  %v4225_v38 = vmul.f32 %v4213_v43, %v8214_v9  ;;  %v8221_v52 = vld [vmem:[#allocation30_spill] sm:$0xff] }
 0xb3a   : > { %v4243_v14 = vadd.f32 %v4227_v45, %v8219_v1  ;;  %v4229_v0 = vmul.f32 %v4213_v43, %v8217_v28  ;;  %v5856_v57 = vpack.c.bf16 %v4253_v4, %v4249_v19  ;;  %v4226_v29 = vmul.f32 %v4201_v36, %v8217_v28 }
 0xb3b   : > { %5849 = vmatprep.subr.bf16.mxu0 %v5848_v32  ;;  %v4255_v10 = vmax.f32 %v4239_v58, 0.0  ;;  %v4238_v51 = vadd.f32 %v4222_v44, %v8218_v63  ;;  %v4241_v49 = vadd.f32 %v4225_v38, %v8218_v63  ;;  %v4224_v40 = vmul.f32 %v4209_v30, %v8214_v9 }
 0xb3c   : > { %5851 = vmatpush1.bf16.msra.mxu0 %v5850_v47  ;;  %v4259_v55 = vmax.f32 %v4243_v14, 0.0  ;;  %v4245_v35 = vadd.f32 %v4229_v0, %v8219_v1  ;;  %5857 = vmatprep.subr.bf16.mxu1 %v5856_v57  ;;  %v4242_v31 = vadd.f32 %v4226_v29, %v8219_v1  ;;  %v4228_v43 = vmul.f32 %v4209_v30, %v8217_v28 }
 0xb3d   : > { %v4254_v26 = vmax.f32 %v4238_v51, 0.0  ;;  %5859 = vmatpush1.bf16.msra.mxu1 %v5858_v62  ;;  %v4257_v59 = vmax.f32 %v4241_v49, 0.0  ;;  %v4240_v44 = vadd.f32 %v4224_v40, %v8218_v63 }
 0xb3e   : > { %v5852_v6 = vpack.c.bf16 %v4259_v55, %v4255_v10  ;;  %v4261_v36 = vmax.f32 %v4245_v35, 0.0  ;;  %v4258_v27 = vmax.f32 %v4242_v31, 0.0  ;;  %v4244_v25 = vadd.f32 %v4228_v43, %v8219_v1 }
 0xb3f   : > { %v4256_v42 = vmax.f32 %v4240_v44, 0.0 }
 0xb40   : > { %5853 = vmatprep.subr.bf16.mxu0 %v5852_v6  ;;  %v5860_v7 = vpack.c.bf16 %v4261_v36, %v4257_v59  ;;  %v5854_v24 = vpack.c.bf16 %v4258_v27, %v4254_v26  ;;  %v4260_v9 = vmax.f32 %v4244_v25, 0.0 }
 0xb42   : > { %5861 = vmatprep.subr.bf16.mxu1 %v5860_v7  ;;  %5855 = vmatpush1.bf16.msra.mxu0 %v5854_v24  ;;  %v5862_v48 = vpack.c.bf16 %v4260_v9, %v4256_v42  ;;  %v8222_v24 = vld [vmem:[#allocation24_spill] sm:$0xff] }
 0xb44   : > { %5863 = vmatpush1.bf16.msra.mxu1 %v5862_v48 }
 0xb45   : > { %5448 = vmatmul.mubr.msk.f32.vlgmr.msra.gmra.mrb[26].mxu0 %vm1029_vm2, %v8220_v50 }
 0xb46   : > { %4568 = vmatprep.mubr.f32.mxu0 %v8113_v16 }
 0xb47   : > { %5449 = vmatmul.mubr.msk.f32.vlgmr.msra.gmra.mrb[26].mxu1 %vm1029_vm2, %v8220_v50 }
 0xb48   : > { %4639 = vmatprep.mubr.f32.mxu1 %v8113_v16 }
 0xc18   : > { %v4328_v30 = vpop.f32.mrb[26].mxu0 }
 0xc19   : > { %v4329_v5 = vadd.f32 %v4328_v30, %v8221_v52  ;;  %v4330_v3 = vpop.f32.mrb[27].mxu0 }
 0xc1a   : > { %v4399_v56 = vpop.f32.mrb[26].mxu1  ;;  %v4331_v47 = vadd.f32 %v4330_v3, %v8221_v52 }
 0xc1b   : > { %v4408_v2 = vrot.slane %v4329_v5, 4  ;;  %v4400_v53 = vadd.f32 %v4399_v56, %v8221_v52  ;;  %v4401_v28 = vpop.f32.mrb[27].mxu1  ;;  %v7741_v45 = vadd.f32 %v7666_v18, %v4329_v5  ;;  %v8224_v56 = vld [vmem:[#allocation32_spill] sm:$0xff] }
 0xc1c   : > { %v4414_v32 = vrot.slane %v4331_v47, 4  ;;  %v4402_v19 = vadd.f32 %v4401_v28, %v8221_v52  ;;  %v7745_v4 = vadd.f32 %v7670_v37, %v4331_v47 }
 0xc1d   : > { %v4409_v63 = vadd.f32 %v4408_v2, %v4329_v5  ;;  %v4420_v58 = vrot.slane %v4400_v53, 4  ;;  %v7748_v62 = vadd.f32 %v7674_v23, %v4400_v53  ;;  %v8223_v5 = vld [vmem:[#allocation31_spill] sm:$0xff]  ;;  %v8225_v2 = vld [vmem:[#allocation36_spill] sm:$0xff] }
 0xc1e   : > { %v4415_v1 = vadd.f32 %v4414_v32, %v4331_v47  ;;  %v4426_v14 = vrot.slane %v4402_v19, 4  ;;  %v7751_v38 = vadd.f32 %v7677_v22, %v4402_v19  ;;  %v8226_v32 = vld [vmem:[#allocation33_spill] sm:$0xff] }
 0xc1f   : > { %v4410_v0 = vrot.slane %v4409_v63, 2  ;;  %v4421_v57 = vadd.f32 %v4420_v58, %v4400_v53 }
 0xc20   : > { %v4416_v18 = vrot.slane %v4415_v1, 2  ;;  %v4427_v10 = vadd.f32 %v4426_v14, %v4402_v19 }
 0xc21   : > { %v4411_v29 = vadd.f32 %v4410_v0, %v4409_v63  ;;  %v4422_v51 = vrot.slane %v4421_v57, 2  ;;  %v8227_v63 = vld [vmem:[#allocation34_spill] sm:$0xff] }
 0xc22   : > { %v4417_v55 = vadd.f32 %v4416_v18, %v4415_v1  ;;  %v4428_v49 = vrot.slane %v4427_v10, 2 }
 0xc23   : > { %v4412_v37 = vrot.slane %v4411_v29, 1  ;;  %v4423_v35 = vadd.f32 %v4422_v51, %v4421_v57 }
 0xc24   : > { %v4418_v40 = vrot.slane %v4417_v55, 1  ;;  %v4429_v31 = vadd.f32 %v4428_v49, %v4427_v10 }
 0xc25   : > { %v4413_v26 = vadd.f32 %v4412_v37, %v4411_v29  ;;  %v4424_v23 = vrot.slane %v4423_v35, 1 }
 0xc26   : > { %v4419_v43 = vadd.f32 %v4418_v40, %v4417_v55  ;;  %v4430_v6 = vrot.slane %v4429_v31, 1 }
 0xc27   : > { %v4432_v59 = vmul.f32 0.125, %v4413_v26  ;;  %v4425_v36 = vadd.f32 %v4424_v23, %v4423_v35 }
 0xc28   : > { %v4433_v22 = vmul.f32 0.125, %v4419_v43  ;;  %v4431_v44 = vadd.f32 %v4430_v6, %v4429_v31  ;;  %v8228_v43 = vld [vmem:[#allocation37_spill] sm:$0xff] }
 0xc29   : > { %v4436_v27 = vadd.f32 %v4432_v59, %v8198_v15  ;;  %v4434_v25 = vmul.f32 0.125, %v4425_v36 }
 0xc2a   : > { %v4437_v7 = vadd.f32 %v4433_v22, %v8193_v54  ;;  %v4435_v42 = vmul.f32 0.125, %v4431_v44  ;;  %v8229_v44 = vld [vmem:[#allocation38_spill] sm:$0xff] }
 0xc2b   : > { %v4443_v9 = vrot.slane %v4436_v27, %v8222_v24  ;;  %v4438_v48 = vadd.f32 %v4434_v25, %v8201_v21 }
 0xc2c   : > { %v4447_v50 = vrot.slane %v4437_v7, %v8222_v24  ;;  %v4439_v30 = vadd.f32 %v4435_v42, %v8211_v13  ;;  %v8230_v7 = vld [vmem:[#allocation39_spill] sm:$0xff] }
 0xc2d   : > { %v4451_v52 = vrot.slane %v4438_v48, %v8222_v24  ;;  %v4456_v3 = vmul.f32 %v4443_v9, %v8223_v5  ;;  %v4460_v47 = vmul.f32 %v4443_v9, %v8224_v56  ;;  %v4464_v15 = vmul.f32 %v4443_v9, %v8225_v2 }
 0xc2e   : > { %v4455_v53 = vrot.slane %v4439_v30, %v8222_v24  ;;  %v4457_v54 = vmul.f32 %v4447_v50, %v8223_v5  ;;  %v4461_v28 = vmul.f32 %v4447_v50, %v8224_v56  ;;  %v4465_v21 = vmul.f32 %v4447_v50, %v8225_v2 }
 0xc2f   : > { %v4472_v19 = vadd.f32 %v4456_v3, %v8226_v32  ;;  %v4476_v13 = vadd.f32 %v4460_v47, %v8227_v63  ;;  %v4458_v58 = vmul.f32 %v4451_v52, %v8223_v5  ;;  %v4462_v1 = vmul.f32 %v4451_v52, %v8224_v56 }
 0xc30   : > { %v4473_v14 = vadd.f32 %v4457_v54, %v8226_v32  ;;  %v4477_v0 = vadd.f32 %v4461_v28, %v8227_v63  ;;  %v4459_v57 = vmul.f32 %v4455_v53, %v8223_v5  ;;  %v4463_v18 = vmul.f32 %v4455_v53, %v8224_v56 }
 0xc31   : > { %v4488_v10 = vmax.f32 %v4472_v19, 0.0  ;;  %v4492_v29 = vmax.f32 %v4476_v13, 0.0  ;;  %v4474_v51 = vadd.f32 %v4458_v58, %v8226_v32  ;;  %v4478_v55 = vadd.f32 %v4462_v1, %v8227_v63 }
 0xc32   : > { %v4489_v49 = vmax.f32 %v4473_v14, 0.0  ;;  %v4493_v37 = vmax.f32 %v4477_v0, 0.0  ;;  %v4475_v35 = vadd.f32 %v4459_v57, %v8226_v32  ;;  %v4479_v40 = vadd.f32 %v4463_v18, %v8227_v63  ;;  %v8231_v18 = vld [vmem:[#allocation14_spill] sm:$0xff] }
 0xc33   : > { %v5866_v31 = vpack.c.bf16 %v4492_v29, %v4488_v10  ;;  %v4490_v26 = vmax.f32 %v4474_v51, 0.0  ;;  %v4494_v23 = vmax.f32 %v4478_v55, 0.0  ;;  %v4469_v6 = vmul.f32 %v4447_v50, %v8228_v43  ;;  %v8232_v10 = vld [vmem:[#allocation41_spill] sm:$0xff] }
 0xc34   : > { %v5864_v59 = vpack.c.bf16 %v4493_v37, %v4489_v49  ;;  %v4491_v36 = vmax.f32 %v4475_v35, 0.0  ;;  %v4495_v22 = vmax.f32 %v4479_v40, 0.0  ;;  %v4481_v27 = vadd.f32 %v4465_v21, %v8229_v44 }
 0xc35   : > { %v5874_v25 = vpack.c.bf16 %v4494_v23, %v4490_v26  ;;  %v4485_v42 = vadd.f32 %v4469_v6, %v8230_v7  ;;  %v4467_v24 = vmul.f32 %v4455_v53, %v8225_v2  ;;  %v4471_v48 = vmul.f32 %v4455_v53, %v8228_v43 }
 0xc36   : > { %5865 = vmatprep.subr.bf16.mxu0 %v5864_v59  ;;  %v5872_v30 = vpack.c.bf16 %v4495_v22, %v4491_v36  ;;  %v4497_v5 = vmax.f32 %v4481_v27, 0.0  ;;  %v4468_v3 = vmul.f32 %v4443_v9, %v8228_v43  ;;  %v4480_v56 = vadd.f32 %v4464_v15, %v8229_v44 }
 0xc37   : > { %5867 = vmatpush1.bf16.msra.mxu0 %v5866_v31  ;;  %v4501_v50 = vmax.f32 %v4485_v42, 0.0  ;;  %v4483_v47 = vadd.f32 %v4467_v24, %v8229_v44  ;;  %v4487_v54 = vadd.f32 %v4471_v48, %v8230_v7  ;;  %v4466_v28 = vmul.f32 %v4451_v52, %v8225_v2 }
 0xc38   : > { %5873 = vmatprep.subr.bf16.mxu1 %v5872_v30  ;;  %v4484_v21 = vadd.f32 %v4468_v3, %v8230_v7  ;;  %v4496_v32 = vmax.f32 %v4480_v56, 0.0  ;;  %v4470_v53 = vmul.f32 %v4451_v52, %v8228_v43 }
 0xc39   : > { %5875 = vmatpush1.bf16.msra.mxu1 %v5874_v25  ;;  %v5868_v19 = vpack.c.bf16 %v4501_v50, %v4497_v5  ;;  %v4499_v63 = vmax.f32 %v4483_v47, 0.0  ;;  %v4503_v9 = vmax.f32 %v4487_v54, 0.0  ;;  %v4482_v15 = vadd.f32 %v4466_v28, %v8229_v44 }
 0xc3a   : > { %v4500_v13 = vmax.f32 %v4484_v21, 0.0  ;;  %v4486_v58 = vadd.f32 %v4470_v53, %v8230_v7 }
 0xc3b   : > { %5869 = vmatprep.subr.bf16.mxu0 %v5868_v19  ;;  %v5876_v1 = vpack.c.bf16 %v4503_v9, %v4499_v63  ;;  %v4498_v14 = vmax.f32 %v4482_v15, 0.0 }
 0xc3c   : > { %v5870_v0 = vpack.c.bf16 %v4500_v13, %v4496_v32  ;;  %v4502_v2 = vmax.f32 %v4486_v58, 0.0 }
 0xc3d   : > { %5877 = vmatprep.subr.bf16.mxu1 %v5876_v1 }
 0xc3e   : > { %5871 = vmatpush1.bf16.msra.mxu0 %v5870_v0  ;;  %v5878_v57 = vpack.c.bf16 %v4502_v2, %v4498_v14  ;;  %v8233_v2 = vld [vmem:[#allocation42_spill] sm:$0xff] }
 0xc40   : > { %5879 = vmatpush1.bf16.msra.mxu1 %v5878_v57 }
 0xc41   : > { %5450 = vmatmul.mubr.msk.f32.vlgmr.msra.gmra.mrb[28].mxu0 %vm1029_vm2, %v8231_v18 }
 0xc42   : > { %4810 = vmatprep.mubr.f32.mxu0 %v8113_v16 }
 0xc43   : > { %5451 = vmatmul.mubr.msk.f32.vlgmr.msra.gmra.mrb[28].mxu1 %vm1029_vm2, %v8231_v18  ;;  %v8234_v18 = vld [vmem:[#allocation43_spill] sm:$0xff] }
 0xc44   : > { %4881 = vmatprep.mubr.f32.mxu1 %v8113_v16 }
 0xd14   : > { %v4570_v52 = vpop.f32.mrb[28].mxu0 }
 0xd15   : > { %v4571_v29 = vadd.f32 %v4570_v52, %v8232_v10  ;;  %v4572_v51 = vpop.f32.mrb[29].mxu0 }
 0xd16   : > { %v4641_v55 = vpop.f32.mrb[28].mxu1  ;;  %v4573_v49 = vadd.f32 %v4572_v51, %v8232_v10 }
 0xd17   : > { %v4650_v37 = vrot.slane %v4571_v29, 4  ;;  %v4642_v35 = vadd.f32 %v4641_v55, %v8232_v10  ;;  %v4643_v40 = vpop.f32.mrb[29].mxu1  ;;  %v7803_v31 = vadd.f32 %v7741_v45, %v4571_v29 }
 0xd18   : > { %v4656_v26 = vrot.slane %v4573_v49, 4  ;;  %v4644_v23 = vadd.f32 %v4643_v40, %v8232_v10  ;;  %v7807_v43 = vadd.f32 %v7745_v4, %v4573_v49 }
 0xd19   : > { %v4651_v6 = vadd.f32 %v4650_v37, %v4571_v29  ;;  %v4662_v59 = vrot.slane %v4642_v35, 4  ;;  %v7810_v36 = vadd.f32 %v7748_v62, %v4642_v35 }
 0xd1a   : > { %v4657_v22 = vadd.f32 %v4656_v26, %v4573_v49  ;;  %v4668_v44 = vrot.slane %v4644_v23, 4  ;;  %v7813_v27 = vadd.f32 %v7751_v38, %v4644_v23 }
 0xd1b   : > { %v4652_v25 = vrot.slane %v4651_v6, 2  ;;  %v4663_v7 = vadd.f32 %v4662_v59, %v4642_v35 }
 0xd1c   : > { %v4658_v45 = vrot.slane %v4657_v22, 2  ;;  %v4669_v42 = vadd.f32 %v4668_v44, %v4644_v23 }
 0xd1d   : > { %v4653_v24 = vadd.f32 %v4652_v25, %v4651_v6  ;;  %v4664_v48 = vrot.slane %v4663_v7, 2 }
 0xd1e   : > { %v4659_v30 = vadd.f32 %v4658_v45, %v4657_v22  ;;  %v4670_v5 = vrot.slane %v4669_v42, 2 }
 0xd1f   : > { %v4654_v4 = vrot.slane %v4653_v24, 1  ;;  %v4665_v3 = vadd.f32 %v4664_v48, %v4663_v7 }
 0xd20   : > { %v4660_v56 = vrot.slane %v4659_v30, 1  ;;  %v4671_v50 = vadd.f32 %v4670_v5, %v4669_v42 }
 0xd21   : > { %v4655_v47 = vadd.f32 %v4654_v4, %v4653_v24  ;;  %v4666_v62 = vrot.slane %v4665_v3, 1 }
 0xd22   : > { %v4661_v54 = vadd.f32 %v4660_v56, %v4659_v30  ;;  %v4672_v28 = vrot.slane %v4671_v50, 1 }
 0xd23   : > { %v4674_v21 = vmul.f32 0.125, %v4655_v47  ;;  %v4667_v32 = vadd.f32 %v4666_v62, %v4665_v3 }
 0xd24   : > { %v4675_v38 = vmul.f32 0.125, %v4661_v54  ;;  %v4673_v53 = vadd.f32 %v4672_v28, %v4671_v50 }
 0xd25   : > { %v4678_v19 = vadd.f32 %v4674_v21, %v7680_v11  ;;  %v4676_v63 = vmul.f32 0.125, %v4667_v32 }
 0xd26   : > { %v4679_v9 = vadd.f32 %v4675_v38, %v7683_v41  ;;  %v4677_v15 = vmul.f32 0.125, %v4673_v53 }
 0xd27   : > { %v4685_v13 = vrot.slane %v4678_v19, %v8210_v34  ;;  %v4680_v58 = vadd.f32 %v4676_v63, %v7688_v60 }
 0xd28   : > { %v4689_v1 = vrot.slane %v4679_v9, %v8210_v34  ;;  %v4681_v14 = vadd.f32 %v4677_v15, %v7693_v12 }
 0xd29   : > { %v4693_v0 = vrot.slane %v4680_v58, %v8210_v34  ;;  %v4698_v57 = vmul.f32 %v4685_v13, %v8233_v2  ;;  %v4702_v52 = vmul.f32 %v4685_v13, %v8234_v18  ;;  %v4706_v11 = vmul.f32 %v4685_v13, %v6912_v33 }
 0xd2a   : > { %v4697_v10 = vrot.slane %v4681_v14, %v8210_v34  ;;  %v4699_v41 = vmul.f32 %v4689_v1, %v8233_v2  ;;  %v4703_v29 = vmul.f32 %v4689_v1, %v8234_v18  ;;  %v4707_v60 = vmul.f32 %v4689_v1, %v6912_v33 }
 0xd2b   : > { %v4714_v51 = vadd.f32 %v4698_v57, %v6877_v17  ;;  %v4718_v12 = vadd.f32 %v4702_v52, %v6887_v39  ;;  %v4700_v55 = vmul.f32 %v4693_v0, %v8233_v2  ;;  %v4704_v49 = vmul.f32 %v4693_v0, %v8234_v18 }
 0xd2c   : > { %v4715_v37 = vadd.f32 %v4699_v41, %v6877_v17  ;;  %v4719_v35 = vadd.f32 %v4703_v29, %v6887_v39  ;;  %v4701_v34 = vmul.f32 %v4697_v10, %v8233_v2  ;;  %v4705_v40 = vmul.f32 %v4697_v10, %v8234_v18 }
 0xd2d   : > { %v4730_v26 = vmax.f32 %v4714_v51, 0.0  ;;  %v4734_v23 = vmax.f32 %v4718_v12, 0.0  ;;  %v4716_v6 = vadd.f32 %v4700_v55, %v6877_v17  ;;  %v4720_v59 = vadd.f32 %v4704_v49, %v6887_v39 }
 0xd2e   : > { %v4731_v22 = vmax.f32 %v4715_v37, 0.0  ;;  %v4735_v44 = vmax.f32 %v4719_v35, 0.0  ;;  %v4717_v25 = vadd.f32 %v4701_v34, %v6877_v17  ;;  %v4721_v7 = vadd.f32 %v4705_v40, %v6887_v39 }
 0xd2f   : > { %v5882_v45 = vpack.c.bf16 %v4734_v23, %v4730_v26  ;;  %v4732_v42 = vmax.f32 %v4716_v6, 0.0  ;;  %v4736_v24 = vmax.f32 %v4720_v59, 0.0  ;;  %v4711_v48 = vmul.f32 %v4689_v1, %v6927_v46 }
 0xd30   : > { %v5880_v30 = vpack.c.bf16 %v4735_v44, %v4731_v22  ;;  %v4733_v5 = vmax.f32 %v4717_v25, 0.0  ;;  %v4737_v4 = vmax.f32 %v4721_v7, 0.0  ;;  %v4723_v3 = vadd.f32 %v4707_v60, %v6945_v61  ;;  %v4892_v60 = vld [vmem:[%s7957_s10] sm:$0xff] }
 0xd31   : > { %v5890_v56 = vpack.c.bf16 %v4736_v24, %v4732_v42  ;;  %v4727_v50 = vadd.f32 %v4711_v48, %v6948_v20  ;;  %v4709_v47 = vmul.f32 %v4697_v10, %v6912_v33  ;;  %v4713_v62 = vmul.f32 %v4697_v10, %v6927_v46 }
 0xd32   : > { %5881 = vmatprep.subr.bf16.mxu0 %v5880_v30  ;;  %v5888_v17 = vpack.c.bf16 %v4737_v4, %v4733_v5  ;;  %v4739_v39 = vmax.f32 %v4723_v3, 0.0  ;;  %v4710_v54 = vmul.f32 %v4685_v13, %v6927_v46  ;;  %v4722_v28 = vadd.f32 %v4706_v11, %v6945_v61 }
 0xd33   : > { %5883 = vmatpush1.bf16.msra.mxu0 %v5882_v45  ;;  %v4743_v21 = vmax.f32 %v4727_v50, 0.0  ;;  %v4725_v32 = vadd.f32 %v4709_v47, %v6945_v61  ;;  %v4729_v38 = vadd.f32 %v4713_v62, %v6948_v20  ;;  %v4708_v53 = vmul.f32 %v4693_v0, %v6912_v33 }
 0xd34   : > { %5889 = vmatprep.subr.bf16.mxu1 %v5888_v17  ;;  %v4726_v19 = vadd.f32 %v4710_v54, %v6948_v20  ;;  %v4738_v63 = vmax.f32 %v4722_v28, 0.0  ;;  %v4712_v9 = vmul.f32 %v4693_v0, %v6927_v46 }
 0xd35   : > { %5891 = vmatpush1.bf16.msra.mxu1 %v5890_v56  ;;  %v5884_v15 = vpack.c.bf16 %v4743_v21, %v4739_v39  ;;  %v4741_v58 = vmax.f32 %v4725_v32, 0.0  ;;  %v4745_v13 = vmax.f32 %v4729_v38, 0.0  ;;  %v4724_v1 = vadd.f32 %v4708_v53, %v6945_v61 }
 0xd36   : > { %v4742_v14 = vmax.f32 %v4726_v19, 0.0  ;;  %v4728_v2 = vadd.f32 %v4712_v9, %v6948_v20 }
 0xd37   : > { %5885 = vmatprep.subr.bf16.mxu0 %v5884_v15  ;;  %v5892_v57 = vpack.c.bf16 %v4745_v13, %v4741_v58  ;;  %v4740_v18 = vmax.f32 %v4724_v1, 0.0 }
 0xd38   : > { %v5886_v52 = vpack.c.bf16 %v4742_v14, %v4738_v63  ;;  %v4744_v33 = vmax.f32 %v4728_v2, 0.0 }
 0xd39   : > { %5893 = vmatprep.subr.bf16.mxu1 %v5892_v57 }
 0xd3a   : > { %5887 = vmatpush1.bf16.msra.mxu0 %v5886_v52  ;;  %v5894_v11 = vpack.c.bf16 %v4744_v33, %v4740_v18 }
 0xd3c   : > { %5895 = vmatpush1.bf16.msra.mxu1 %v5894_v11 }
 0xd3d   : > { %5452 = vmatmul.mubr.msk.f32.vlgmr.msra.gmra.mrb[0].mxu0 %vm1029_vm2, %v7649_v8 }
 0xd3e   : > { %4997 = vmatprep.mubr.f32.mxu0 %v8113_v16 }
 0xd3f   : > { %5453 = vmatmul.mubr.msk.f32.vlgmr.msra.gmra.mrb[0].mxu1 %vm1029_vm2, %v7649_v8  ;;  %v4893_v8 = vld [vmem:[%s7957_s10 + $0x8] sm:$0xff] }
 0xd40   : > { %5086 = vmatprep.mubr.f32.mxu1 %v8113_v16 }
 0xe10   : > { %v4812_v61 = vpop.f32.mrb[0].mxu0 }
 0xe11   : > { %v5911_v20 = vadd.f32 %v7803_v31, %v4812_v61  ;;  %v4814_v46 = vpop.f32.mrb[1].mxu0  ;;  %v4894_v31 = vld [vmem:[%s7957_s10 + $0x10] sm:$0xff] }
 0xe12   : > { %v4883_v0 = vpop.f32.mrb[0].mxu1  ;;  %v5927_v10 = vadd.f32 %v7807_v43, %v4814_v46  ;;  %v4895_v43 = vld [vmem:[%s7957_s10 + $0x18] sm:$0xff] }
 0xe13   : > { %v5943_v41 = vadd.f32 %v7810_v36, %v4883_v0  ;;  %v4885_v29 = vpop.f32.mrb[1].mxu1  ;;  %v4903_v36 = vpop.permute.xlu0 %4902 }
 0xe14   : > { %v5959_v51 = vadd.f32 %v7813_v27, %v4885_v29  ;;  %4933 = vmatprep.subr.mxu0 %v5927_v10  ;;  %v4908_v27 = vpop.permute.xlu1 %4907 }
 0xe15   : > { %4934 = vmatpush1.msra.mxu0 %v5911_v20 }
 0xe16   : > { %5022 = vmatprep.subr.mxu1 %v5959_v51  ;;  %5454 = vmatmul.mubr.msk.f32.vlgmr.msra.gmra.mrb[30].mxu0 %vm4920_vm3, %v4892_v60 }
 0xe17   : > { %5023 = vmatpush1.msra.mxu1 %v5943_v41  ;;  %5003 = vmatprep.mubr.f32.mxu0 %v8113_v16  ;;  %v4913_v12 = vpop.permute.xlu0 %4912 }
 0xe18   : > { %5458 = vmatmul.mubr.msk.f32.vlgmr.msra.gmra.mrb[30].mxu1 %vm4920_vm3, %v4892_v60  ;;  %v7891_v35 = vpop.permute.xlu1 %4917 }
 0xe19   : > { %5092 = vmatprep.mubr.f32.mxu1 %v8113_v16 }
 0xe1a   : > { %5455 = vmatmul.mubr.msk.f32.gmra.mrb[32].mxu0 %vm4920_vm3, %v4893_v8 }
 0xe1b   : > { %5009 = vmatprep.mubr.f32.mxu0 %v8113_v16  ;;  %v5134_v45 = vpop.permute.xlu0 %5133 }
 0xe1c   : > { %5459 = vmatmul.mubr.msk.f32.gmra.mrb[32].mxu1 %vm4920_vm3, %v4893_v8  ;;  %v5139_v3 = vpop.permute.xlu1 %5138 }
 0xe1d   : > { %5098 = vmatprep.mubr.f32.mxu1 %v8113_v16 }
 0xe1e   : > { %5456 = vmatmul.mubr.msk.f32.gmra.mrb[34].mxu0 %vm4920_vm3, %v4894_v31 }
 0xe1f   : > { %5015 = vmatprep.mubr.f32.mxu0 %v8113_v16  ;;  %v5144_v2 = vpop.permute.xlu0 %5143 }
 0xe20   : > { %5460 = vmatmul.mubr.msk.f32.gmra.mrb[34].mxu1 %vm4920_vm3, %v4894_v31 }
 0xe21   : > { %5104 = vmatprep.mubr.f32.mxu1 %v8113_v16 }
 0xe22   : > { %5457 = vmatmul.mubr.msk.f32.gmra.mrb[36].mxu0 %vm4920_vm3, %v4895_v43 }
 0xe24   : > { %5461 = vmatmul.mubr.msk.f32.gmra.mrb[36].mxu1 %vm4920_vm3, %v4895_v43 }
 0xee9   : > { %v4999_v55 = vpop.f32.mrb[30].mxu0 }
 0xeea   : > { %v5000_v49 = vadd.f32 %v4999_v55, %v4903_v36  ;;  %v5001_v37 = vpop.f32.mrb[31].mxu0 }
 0xeeb   : > { %v5088_v34 = vpop.f32.mrb[30].mxu1  ;;  %v5002_v40 = vadd.f32 %v5001_v37, %v4903_v36 }
 0xeec   : > { %v5089_v26 = vadd.f32 %v5088_v34, %v4903_v36  ;;  %v5090_v23 = vpop.f32.mrb[31].mxu1  ;;  %v5111_v6 = vmax.f32 %v5000_v49, 0.0 }
 0xeed   : > { %v5112_v59 = vmax.f32 %v5002_v40, 0.0  ;;  %v5091_v22 = vadd.f32 %v5090_v23, %v4903_v36  ;;  %v5005_v16 = vpop.f32.mrb[32].mxu0 }
 0xeee   : > { %v5113_v44 = vmax.f32 %v5089_v26, 0.0  ;;  %v5006_v25 = vadd.f32 %v5005_v16, %v4908_v27  ;;  %v5007_v7 = vpop.f32.mrb[33].mxu0  ;;  %v5151_v56 = vmul.f32 %v5134_v45, %v5111_v6 }
 0xeef   : > { %v5114_v42 = vmax.f32 %v5091_v22, 0.0  ;;  %v5094_v24 = vpop.f32.mrb[32].mxu1  ;;  %v5008_v48 = vadd.f32 %v5007_v7, %v4908_v27  ;;  %v5152_v50 = vmul.f32 %v5134_v45, %v5112_v59 }
 0xef0   : > { %v5115_v30 = vmax.f32 %v5006_v25, 0.0  ;;  %v5095_v5 = vadd.f32 %v5094_v24, %v4908_v27  ;;  %v5096_v4 = vpop.f32.mrb[33].mxu1  ;;  %v5153_v39 = vmul.f32 %v5134_v45, %v5113_v44 }
 0xef1   : > { %v5116_v47 = vmax.f32 %v5008_v48, 0.0  ;;  %v5097_v62 = vadd.f32 %v5096_v4, %v4908_v27  ;;  %v5011_v17 = vpop.f32.mrb[34].mxu0  ;;  %v5154_v38 = vmul.f32 %v5134_v45, %v5114_v42 }
 0xef2   : > { %v5155_v54 = vmul.f32 %v5139_v3, %v5115_v30  ;;  %v5117_v28 = vmax.f32 %v5095_v5, 0.0  ;;  %v5012_v21 = vadd.f32 %v5011_v17, %v4913_v12  ;;  %v5013_v32 = vpop.f32.mrb[35].mxu0  ;;  %v6090_v17 = vmov 1966171168  }
 0xef3   : > { %v5156_v53 = vmul.f32 %v5139_v3, %v5116_v47  ;;  %v5118_v19 = vmax.f32 %v5097_v62, 0.0  ;;  %v5100_v63 = vpop.f32.mrb[34].mxu1  ;;  %v5014_v9 = vadd.f32 %v5013_v32, %v4913_v12 }
 0xef4   : > { %v5167_v15 = vadd.f32 %v5155_v54, %v5151_v56  ;;  %v5157_v58 = vmul.f32 %v5139_v3, %v5117_v28  ;;  %v5119_v13 = vmax.f32 %v5012_v21, 0.0  ;;  %v5101_v1 = vadd.f32 %v5100_v63, %v4913_v12  ;;  %v5102_v14 = vpop.f32.mrb[35].mxu1  ;;  %v5207_v21 = vpop.permute.xlu0 %5206 }
 0xef5   : > { %v5176_v57 = vadd.f32 %v5156_v53, %v5152_v50  ;;  %v5158_v18 = vmul.f32 %v5139_v3, %v5118_v19  ;;  %v5120_v52 = vmax.f32 %v5014_v9, 0.0  ;;  %v5103_v33 = vadd.f32 %v5102_v14, %v4913_v12  ;;  %v5017_v11 = vpop.f32.mrb[36].mxu0  ;;  %v5149_v12 = vpop.permute.xlu1 %5148 }
 0xef6   : > { %v5185_v61 = vadd.f32 %v5157_v58, %v5153_v39  ;;  %v5159_v20 = vmul.f32 %v5144_v2, %v5119_v13  ;;  %v5121_v46 = vmax.f32 %v5101_v1, 0.0  ;;  %v5018_v0 = vadd.f32 %v5017_v11, %v7891_v35  ;;  %v5019_v10 = vpop.f32.mrb[37].mxu0  ;;  %v8235_v58 = vld [vmem:[#allocation35_spill] sm:$0xff] }
 0xef7   : > { %v5194_v41 = vadd.f32 %v5158_v18, %v5154_v38  ;;  %v5160_v29 = vmul.f32 %v5144_v2, %v5120_v52  ;;  %v5122_v60 = vmax.f32 %v5103_v33, 0.0  ;;  %v5106_v51 = vpop.f32.mrb[36].mxu1  ;;  %v5020_v8 = vadd.f32 %v5019_v10, %v7891_v35 }
 0xef8   : > { %v5168_v31 = vadd.f32 %v5167_v15, %v5159_v20  ;;  %v5161_v43 = vmul.f32 %v5144_v2, %v5121_v46  ;;  %v5123_v36 = vmax.f32 %v5018_v0, 0.0  ;;  %v5107_v27 = vadd.f32 %v5106_v51, %v7891_v35  ;;  %v5108_v55 = vpop.f32.mrb[37].mxu1 }
 0xef9   : > { %v5177_v49 = vadd.f32 %v5176_v57, %v5160_v29  ;;  %v5162_v37 = vmul.f32 %v5144_v2, %v5122_v60  ;;  %v5124_v34 = vmax.f32 %v5020_v8, 0.0  ;;  %v5109_v40 = vadd.f32 %v5108_v55, %v7891_v35 }
 0xefa   : > { %v5186_v26 = vadd.f32 %v5185_v61, %v5161_v43  ;;  %v5163_v23 = vmul.f32 %v5149_v12, %v5123_v36  ;;  %v5125_v6 = vmax.f32 %v5107_v27, 0.0  ;;  %v5224_v39 = vunpack.c.l.s4 %v6090_v17  ;;  %v8236_v61 = vld [vmem:[#allocation10_spill] sm:$0xff] }
 0xefb   : > { %v5195_v59 = vadd.f32 %v5194_v41, %v5162_v37  ;;  %v5164_v22 = vmul.f32 %v5149_v12, %v5124_v34  ;;  %v5126_v16 = vmax.f32 %v5109_v40, 0.0  ;;  %v5212_v13 = vrot.slane %v5207_v21, %v8235_v58 }
 0xefc   : > { %v5169_v44 = vadd.f32 %v5168_v31, %v5163_v23  ;;  %v5165_v25 = vmul.f32 %v5149_v12, %v5125_v6  ;;  %v5225_v15 = vunpack.c.0.s8 %v5224_v39  ;;  %v8237_v8 = vlaneseq }
 0xefd   : > { %v5178_v7 = vadd.f32 %v5177_v49, %v5164_v22  ;;  %v5166_v45 = vmul.f32 %v5149_v12, %v5126_v16 }
 0xefe   : > { %v5170_v42 = vrot.slane %v5169_v44, 4  ;;  %v5187_v24 = vadd.f32 %v5186_v26, %v5165_v25  ;;  %v5228_v20 = vsub.s32 %v5225_v15, %v8236_v61  ;;  %vm5248_vm4 = vcmp.lt.s32.totalorder %v8237_v8, 512 }
 0xeff   : > { %v5179_v48 = vrot.slane %v5178_v7, 4  ;;  %v5196_v30 = vadd.f32 %v5195_v59, %v5166_v45 }
 0xf00   : > { %v5171_v5 = vadd.f32 %v5170_v42, %v5169_v44  ;;  %v5188_v4 = vrot.slane %v5187_v24, 4 }
 0xf01   : > { %v5180_v3 = vadd.f32 %v5179_v48, %v5178_v7  ;;  %v5197_v56 = vrot.slane %v5196_v30, 4 }
 0xf02   : > { %v5172_v50 = vrot.slane %v5171_v5, 2  ;;  %v5189_v35 = vadd.f32 %v5188_v4, %v5187_v24 }
 0xf03   : > { %v5181_v47 = vrot.slane %v5180_v3, 2  ;;  %v5198_v62 = vadd.f32 %v5197_v56, %v5196_v30 }
 0xf04   : > { %v5173_v54 = vadd.f32 %v5172_v50, %v5171_v5  ;;  %v5190_v28 = vrot.slane %v5189_v35, 2 }
 0xf05   : > { %v5182_v32 = vadd.f32 %v5181_v47, %v5180_v3  ;;  %v5199_v38 = vrot.slane %v5198_v62, 2 }
 0xf06   : > { %v5174_v53 = vrot.slane %v5173_v54, 1  ;;  %v5191_v19 = vadd.f32 %v5190_v28, %v5189_v35 }
 0xf07   : > { %v5183_v63 = vrot.slane %v5182_v32, 1  ;;  %v5200_v9 = vadd.f32 %v5199_v38, %v5198_v62 }
 0xf08   : > { %v5175_v1 = vadd.f32 %v5174_v53, %v5173_v54  ;;  %v5192_v14 = vrot.slane %v5191_v19, 1 }
 0xf09   : > { %v5184_v2 = vadd.f32 %v5183_v63, %v5182_v32  ;;  %v5201_v57 = vrot.slane %v5200_v9, 1 }
 0xf0a   : > { %v5213_v18 = vadd.f32 %v5212_v13, %v5175_v1  ;;  %v5193_v52 = vadd.f32 %v5192_v14, %v5191_v19 }
 0xf0b   : > { %v5214_v33 = vadd.f32 %v5212_v13, %v5184_v2  ;;  %v5202_v11 = vadd.f32 %v5201_v57, %v5200_v9 }
 0xf0c   : > { %v5215_v46 = vadd.f32 %v5212_v13, %v5193_v52 }
 0xf0d   : > { %v5216_v0 = vadd.f32 %v5212_v13, %v5202_v11  ;;  %v5221_v10 = vcombine.low %v5213_v18, %v5214_v33 }
 0xf0f   : > { %v5222_v41 = vcombine.low %v5215_v46, %v5216_v0  ;;  %v5229_v29 = vrot.slane %v5221_v10, %v5228_v20 }
 0xf11   : > { %v5236_v60 = vrot.slane %v5222_v41, %v5228_v20 }
 0xf13   : > { %v5237_v51 = vcombine.low %v5229_v29, %v5236_v60 }
 0xf15   : > { %v5244_v31 = vrot.slane %v5237_v51, %v5228_v20 }
 0xf17   : > { %5250 = vst.msk [vmem:[%s463_s13] sm:$0xf] %vm5248_vm4, %v5244_v31 }
 0xf18   : > { %6037 = shalt.err (!%p6034_p3)
}
 0xf19   : > { %s6038_s26 = scalar_lea.hbm %s7905_s19, 64  ;;  %s6042_s29 = scalar_lea.hbm %s7961_s14, 256 }
 0xf1a   : > { %p6039_p4 = scmp.ne.s32.totalorder %s7905_s19, %s6038_s26  ;;  %p6043_p9 = scmp.lt.u32.totalorder %s7905_s19, %s7961_s14 }
 0xf1b   : > { %p6044_p10 = scmp.lt.u32.totalorder %s6042_s29, %s6038_s26  ;;  %p6046_p12 = scmp.lt.u32.totalorder %s6038_s26, %s7905_s19 }
 0xf1c   : > { %p6040_p7 = pnand %p6039_p4, %p6205_p5 }
 0xf1d   : > { %p6045_p11 = por %p6044_p10, %p6043_p9 }
 0xf1e   : > { %p6041_p8 = pneg %p6040_p7 }
 0xf1f   : > { %p6047_p13 = por %p6046_p12, %p6045_p11 }
 0xf21   : > { %p6048_p0 = pnand %p6047_p13, %p6041_p8 }
 0xf23   : > { %6051 = shalt.err (!%p6048_p0)
}
 0xf24   : > { %5976 = dma.vmem_to_hbm [thread:$0]  (%p6205_p5), %s7907_s28, 64, %s7905_s19, %s5252_s17  }
 0xf25 PF: > { %p5982_p1 = scmp.ge.s32.totalorder %s6086_s18, 2  ;;  %s5278_s0 = sand.u32 1, %s6074_s15  }
 0xf26   : > { %s5279_s23 = scalar_lea.sflag [#allocation4], %s5278_s0 }
 0xf27   : > { %p5979_p2 = pnand %p5982_p1, %p6209_p6 }
 0xf29   : > { %6069 = dma.done.wait (!%p5979_p2), %s5279_s23, 64  }
 0xf2a   : > { %6071 = vsyncadd (!%p5979_p2), %s5279_s23, 4294967232  ;;  %s8238_s27 = sld [smem:[#allocation6_spill]]  ;;  %s8239_s17 = sld [smem:[#allocation7_spill]] }
 0xf2b   : > { %p26_p3 = scmp.ge.s32.totalorder %s6193_s20, 6   ;;  %s8240_s15 = smov %s6078_s16 }
 0xf2c   : > { %s8242_s18 = smov %s6193_s20 }
 0xf2d   :  { %28 = sbr.rel (!%p26_p3) target bundleno = 6 (0x6), region = 119 }
 0xf30   : > { %s8241_s16 = smov %s8238_s27 }
 0xf34   :  { %5284 = vsyncpa [#allocation4], 1 }
 0xf35   :  { %5286 = vsyncpa [#allocation4 + $0x1], 1 }

</bundles_post_ra>
